<compile_context>
chip_gen: v7x
topology: tpu7x:2x2x1
jax: 0.10.0
libtpu: 0.0.40
codegen_flags: <defaults>
</compile_context>

<pallas_src>
import functools

import jax
import jax.numpy as jnp
from jax.experimental import pallas as pl
from jax.experimental.pallas import tpu as pltpu


def _round_up(x, m):
    return ((x + m - 1) // m) * m


def _vae_kernel(num_hidden_layers, latent_dim, *refs):
    """refs = (acts, w1, b1, ..., wH, bH, wfc, bfc, xhat_out, z_out).

    `acts` is the lane-dense fusion [mu | logvar | eps | 0-pad] of width
    round_up(3*latent, 128).
    """
    acts_ref = refs[0]
    xhat_ref, z_out_ref = refs[-2], refs[-1]
    params = refs[1:-2]

    acts = acts_ref[...]
    mu = acts[:, 0:latent_dim]
    logvar = acts[:, latent_dim:2 * latent_dim]
    eps = acts[:, 2 * latent_dim:3 * latent_dim]

    # Reparameterization (Normal posterior): z = mu + exp(0.5*logvar) * eps.
    z = mu + jnp.exp(0.5 * logvar) * eps
    z_out_ref[...] = z

    # Decoder MLP: bf16 weights (cheap HBM->VMEM DMA), f32 accumulation on MXU.
    h = z
    for i in range(num_hidden_layers):
        w = params[2 * i][...]                     # (in_pad, hid_pad) bf16
        b = params[2 * i + 1][...]                 # (1, hid_pad) f32 broadcast
        h = jnp.dot(h.astype(w.dtype), w, preferred_element_type=jnp.float32) + b
        h = jnp.maximum(h, 0.0)

    w_fc = params[-2][...]
    b_fc = params[-1][...]
    p = jnp.dot(h.astype(w_fc.dtype), w_fc, preferred_element_type=jnp.float32) + b_fc

    # sigmoid + clamp(1e-6, 1 - 1e-6) exactly like the PyTorch decoder head.
    d = jax.nn.sigmoid(p)
    xhat_ref[...] = jnp.clip(d, 1e-6, 1.0 - 1e-6)


def prepare_decoder_params(weights, biases, weight_dtype=jnp.bfloat16):
    """Zero-pad feature dims to 128-multiples and cast weights to `weight_dtype`.

    Zero padding is exact: padded hidden units are ReLU(0)=0 and padded output
    pixels are sliced off by the consumer.  NOTE: bf16 weights are a documented
    precision change vs the f32 PyTorch decoder.
    """
    assert len(weights) == len(biases)
    in_dims = [w.shape[0] for w in weights]
    out_dims = [w.shape[1] for w in weights]
    # Keep the tiny latent input dim as-is (equals the full array dim); pad
    # every other feature dim to a multiple of 128 for full MXU / lane-dense IO.
    pad_in = [in_dims[0]] + [_round_up(d, 128) for d in in_dims[1:]]
    pad_out = [_round_up(d, 128) for d in out_dims]

    w_pad, b_pad = [], []
    for w, b, pi, po in zip(weights, biases, pad_in, pad_out):
        wp = jnp.pad(w, ((0, pi - w.shape[0]), (0, po - w.shape[1])))
        bp = jnp.pad(b, ((0, 0), (0, po - b.shape[1])))
        w_pad.append(wp.astype(weight_dtype))
        b_pad.append(bp.astype(jnp.float32))
    return w_pad, b_pad


def vae_forward(mu, logvar, eps, weights, biases, *,
                max_batch_tile=1024, slice_output=True):
    """Pallas forward: returns (x_hat, z, mu, logvar) like VAEVanilla.forward.

    mu/logvar/eps: (B, latent) f32.  weights[i]: (in_i, out_i) f32,
    biases[i]: (1, out_i) f32; the final layer must produce 784 pixels.
    slice_output=True  -> x_hat is (B, 1, 28, 28) NCHW (spec-compatible view;
                          costs one extra HBM pass over x_hat).
    slice_output=False -> x_hat is the padded (B_pad, 896) slab; slice
                          [:B, :784] lazily in the consumer to avoid that pass.
    """
    batch, latent = mu.shape
    num_hidden_layers = len(weights) - 1
    out_features = weights[-1].shape[1]
    assert out_features == 784

    w_pad, b_pad = prepare_decoder_params(weights, biases)
    out_pad = w_pad[-1].shape[1]                       # 784 -> 896

    # --- batch tiling --------------------------------------------------------
    # As large a tile as possible (amortize per-step overhead), capped at
    # max_batch_tile (VMEM), and split into >= 2 tiles whenever there is enough
    # work so v7x's two TensorCores both get a shard of the parallel grid axis.
    b_padded = _round_up(batch, 8)
    tile_b = min(b_padded, max_batch_tile)
    n_tiles = pl.cdiv(b_padded, tile_b)
    if n_tiles == 1 and b_padded >= 16:
        n_tiles = 2
    tile_b = _round_up(pl.cdiv(b_padded, n_tiles), 8)
    b_padded = tile_b * n_tiles

    # --- fuse mu/logvar/eps into one lane-dense activation slab --------------
    act_w = _round_up(3 * latent, 128)
    acts = jnp.concatenate([mu, logvar, eps], axis=1)
    acts = jnp.pad(acts, ((0, b_padded - batch), (0, act_w - 3 * latent)))

    flat_params = []
    for w, b in zip(w_pad, b_pad):
        flat_params.append(w)
        flat_params.append(b)

    out_shape = (
        jax.ShapeDtypeStruct((b_padded, out_pad), jnp.float32),
        jax.ShapeDtypeStruct((b_padded, latent), jnp.float32),
    )
    out_specs = (
        pl.BlockSpec((tile_b, out_pad), lambda i: (i, 0)),
        pl.BlockSpec((tile_b, latent), lambda i: (i, 0)),
    )

    # Advisory cost so XLA schedules surrounding ops around this small call.
    flops = 2 * b_padded * sum(int(w.shape[0]) * int(w.shape[1]) for w in w_pad)
    transcendentals = b_padded * (latent + out_pad)    # exp (reparam) + sigmoid
    bytes_accessed = (
        sum(int(w.size) * int(w.dtype.itemsize) for w in w_pad)   # bf16 weights
        + sum(int(b.size) * 4 for b in b_pad)                     # f32 biases
        + b_padded * act_w * 4                                    # fused acts
        + b_padded * (out_pad + latent) * 4                       # x_hat, z
    )

    kernel = functools.partial(_vae_kernel, num_hidden_layers, latent)

    def _run(single_buffer_params):
        def param_spec(shape):
            # Constant-index blocks: Pallas skips re-DMA across grid steps so
            # weights stay VMEM-resident; single-buffering drops the dead
            # second buffer (~1.5 MB of pure VMEM headroom).
            if single_buffer_params:
                return pl.BlockSpec(shape, lambda i: (0, 0),
                                    pipeline_mode=pl.Buffered(1))
            return pl.BlockSpec(shape, lambda i: (0, 0))

        in_specs = [pl.BlockSpec((tile_b, act_w), lambda i: (i, 0))]
        in_specs += [param_spec(p_arr.shape) for p_arr in flat_params]

        return pl.pallas_call(
            kernel,
            grid=(n_tiles,),
            in_specs=in_specs,
            out_specs=out_specs,
            out_shape=out_shape,
            compiler_params=pltpu.CompilerParams(
                dimension_semantics=("parallel",),
                vmem_limit_bytes=48 * 1024 * 1024),
            cost_estimate=pl.CostEstimate(
                flops=flops,
                transcendentals=transcendentals,
                bytes_accessed=bytes_accessed),
        )(acts, *flat_params)

    try:
        x_hat_pad, z_pad = _run(hasattr(pl, "Buffered"))
    except Exception:  # fallback for JAX versions without single-buffer specs
        x_hat_pad, z_pad = _run(False)

    z = z_pad[:batch]
    if slice_output:
        # Glue pass (re-reads the 896-wide slab, writes 784-wide NCHW view).
        x_hat = x_hat_pad[:batch, :out_features].reshape(batch, 1, 28, 28)
    else:
        x_hat = x_hat_pad
    return x_hat, z, mu, logvar


def init_params(key, latent_dim, hidden_layers, hidden_dim=400):
    """Deterministic synthetic init mimicking nn.Linear's U(-1/sqrt(fan_in), +)."""
    dims_in = [latent_dim] + [hidden_dim] * (hidden_layers - 1) + [hidden_dim]
    dims_out = [hidden_dim] * hidden_layers + [784]
    weights, biases = [], []
    for d_in, d_out in zip(dims_in, dims_out):
        key, kw, kb = jax.random.split(key, 3)
        bound = 1.0 / jnp.sqrt(jnp.float32(d_in))
        w = jax.random.uniform(kw, (d_in, d_out), jnp.float32, -bound, bound)
        b = jax.random.uniform(kb, (1, d_out), jnp.float32, -bound, bound)
        weights.append(w)
        biases.append(b)
    return weights, biases


def _reference_forward(mu, logvar, eps, weights, biases):
    """Plain-JAX reference using the SAME padded bf16 params (only the MXU
    accumulation order differs from the kernel)."""
    w_pad, b_pad = prepare_decoder_params(weights, biases)
    z = mu + jnp.exp(0.5 * logvar) * eps
    h = z
    for w, b in zip(w_pad[:-1], b_pad[:-1]):
        h = jnp.maximum(
            jnp.dot(h.astype(w.dtype), w, preferred_element_type=jnp.float32) + b,
            0.0)
    p = jnp.dot(h.astype(w_pad[-1].dtype), w_pad[-1],
                preferred_element_type=jnp.float32) + b_pad[-1]
    x = jnp.clip(jax.nn.sigmoid(p), 1e-6, 1.0 - 1e-6)[:, :784]
    return x.reshape(-1, 1, 28, 28), z


if __name__ == "__main__":
    latent_dim = 32
    hidden_layers = 2
    hidden_dim = 400

    key = jax.random.PRNGKey(0)
    key, kparam = jax.random.split(key)
    weights, biases = init_params(kparam, latent_dim, hidden_layers, hidden_dim)

    # batch=2: single-tile latency path.  batch=48: exercises the >=2-tile
    # parallel grid path (two v7x TensorCores / megacore sharding).
    for batch in (2, 48):
        key, kmu, klv, keps = jax.random.split(key, 4)
        mu = jax.random.normal(kmu, (batch, latent_dim), jnp.float32)
        logvar = 0.1 * jax.random.normal(klv, (batch, latent_dim), jnp.float32)
        eps = jax.random.normal(keps, (batch, latent_dim), jnp.float32)

        x_hat, z, mu_out, logvar_out = vae_forward(mu, logvar, eps, weights, biases)
        x_hat = jax.block_until_ready(x_hat)
        z = jax.block_until_ready(z)

        x_ref, z_ref = _reference_forward(mu, logvar, eps, weights, biases)

        assert x_hat.shape == (batch, 1, 28, 28)
        assert z.shape == (batch, latent_dim)
        assert jnp.allclose(z, z_ref, atol=1e-5, rtol=1e-5)
        assert jnp.allclose(x_hat, x_ref, atol=2e-3, rtol=2e-3)

    print("KERNEL_OK")
</pallas_src>

<mosaic_0001>
module attributes {stable_mosaic.version = 11 : i64} {
  func.func @_vae_kernel(%arg0: i32, %arg1: memref<8x128xf32, #tpu.memory_space<vmem>>, %arg2: memref<32x512xbf16, #tpu.memory_space<vmem>>, %arg3: memref<1x512xf32, #tpu.memory_space<vmem>>, %arg4: memref<512x512xbf16, #tpu.memory_space<vmem>>, %arg5: memref<1x512xf32, #tpu.memory_space<vmem>>, %arg6: memref<512x896xbf16, #tpu.memory_space<vmem>>, %arg7: memref<1x896xf32, #tpu.memory_space<vmem>>, %arg8: memref<8x896xf32, #tpu.memory_space<vmem>>, %arg9: memref<8x32xf32, #tpu.memory_space<vmem>>) attributes {dimension_semantics = [#tpu.dimension_semantics<parallel>], iteration_bounds = array<i64: 1>, scalar_prefetch = 0 : i64, scratch_operands = 0 : i64, tpu.core_type = #tpu.core_type<tc>, window_params = [{transform_indices = @transform_0, window_bounds = array<i64: 8, 128>}, {pipeline_mode = #tpu.pipeline_mode<synchronous>, transform_indices = @transform_1, window_bounds = array<i64: 32, 512>}, {pipeline_mode = #tpu.pipeline_mode<synchronous>, transform_indices = @transform_2, window_bounds = array<i64: 1, 512>}, {pipeline_mode = #tpu.pipeline_mode<synchronous>, transform_indices = @transform_3, window_bounds = array<i64: 512, 512>}, {pipeline_mode = #tpu.pipeline_mode<synchronous>, transform_indices = @transform_4, window_bounds = array<i64: 1, 512>}, {pipeline_mode = #tpu.pipeline_mode<synchronous>, transform_indices = @transform_5, window_bounds = array<i64: 512, 896>}, {pipeline_mode = #tpu.pipeline_mode<synchronous>, transform_indices = @transform_6, window_bounds = array<i64: 1, 896>}, {transform_indices = @transform_7, window_bounds = array<i64: 8, 896>}, {transform_indices = @transform_8, window_bounds = array<i64: 8, 32>}]} {
    %c0 = arith.constant 0 : index
    %c0_0 = arith.constant 0 : index
    %0 = vector.load %arg1[%c0, %c0_0] : memref<8x128xf32, #tpu.memory_space<vmem>>, vector<8x128xf32>
    %1 = vector.extract_strided_slice %0 {offsets = [0, 0], sizes = [8, 32], strides = [1, 1]} : vector<8x128xf32> to vector<8x32xf32>
    %2 = vector.extract_strided_slice %0 {offsets = [0, 32], sizes = [8, 32], strides = [1, 1]} : vector<8x128xf32> to vector<8x32xf32>
    %3 = vector.extract_strided_slice %0 {offsets = [0, 64], sizes = [8, 32], strides = [1, 1]} : vector<8x128xf32> to vector<8x32xf32>
    %cst = arith.constant 5.000000e-01 : f32
    %4 = vector.broadcast %cst : f32 to vector<8x32xf32>
    %5 = arith.mulf %4, %2 : vector<8x32xf32>
    %6 = math.exp %5 : vector<8x32xf32>
    %7 = arith.mulf %6, %3 : vector<8x32xf32>
    %8 = arith.addf %1, %7 : vector<8x32xf32>
    %c0_1 = arith.constant 0 : index
    %c0_2 = arith.constant 0 : index
    %9 = vector.load %arg9[%c0_1, %c0_2] : memref<8x32xf32, #tpu.memory_space<vmem>>, vector<8x32xf32>
    tpu.vector_store %arg9[%c0_1, %c0_2], %8 {strides = array<i32>} : memref<8x32xf32, #tpu.memory_space<vmem>>, vector<8x32xf32>,
    %c0_3 = arith.constant 0 : index
    %c0_4 = arith.constant 0 : index
    %10 = vector.load %arg2[%c0_3, %c0_4] : memref<32x512xbf16, #tpu.memory_space<vmem>>, vector<32x512xbf16>
    %c0_5 = arith.constant 0 : index
    %c0_6 = arith.constant 0 : index
    %11 = vector.load %arg3[%c0_5, %c0_6] : memref<1x512xf32, #tpu.memory_space<vmem>>, vector<1x512xf32>
    %12 = arith.truncf %8 : vector<8x32xf32> to vector<8x32xbf16>
    %cst_7 = arith.constant dense<0.000000e+00> : vector<8x512xf32>
    %13 = tpu.matmul %12, %10, %cst_7 {dimension_numbers = #tpu.dot_dimension_numbers<[1], [0], [0], [1], [0, 0, 1, 1], [], []>} : vector<8x32xbf16>, vector<32x512xbf16>, vector<8x512xf32> -> vector<8x512xf32>
    %14 = vector.broadcast %11 : vector<1x512xf32> to vector<8x512xf32>
    %15 = arith.addf %13, %14 : vector<8x512xf32>
    %cst_8 = arith.constant 0.000000e+00 : f32
    %16 = vector.broadcast %cst_8 : f32 to vector<8x512xf32>
    %17 = arith.maximumf %15, %16 : vector<8x512xf32>
    %c0_9 = arith.constant 0 : index
    %c0_10 = arith.constant 0 : index
    %18 = vector.load %arg4[%c0_9, %c0_10] : memref<512x512xbf16, #tpu.memory_space<vmem>>, vector<512x512xbf16>
    %c0_11 = arith.constant 0 : index
    %c0_12 = arith.constant 0 : index
    %19 = vector.load %arg5[%c0_11, %c0_12] : memref<1x512xf32, #tpu.memory_space<vmem>>, vector<1x512xf32>
    %20 = arith.truncf %17 : vector<8x512xf32> to vector<8x512xbf16>
    %cst_13 = arith.constant dense<0.000000e+00> : vector<8x512xf32>
    %21 = tpu.matmul %20, %18, %cst_13 {dimension_numbers = #tpu.dot_dimension_numbers<[1], [0], [0], [1], [0, 0, 1, 1], [], []>} : vector<8x512xbf16>, vector<512x512xbf16>, vector<8x512xf32> -> vector<8x512xf32>
    %22 = vector.broadcast %19 : vector<1x512xf32> to vector<8x512xf32>
    %23 = arith.addf %21, %22 : vector<8x512xf32>
    %cst_14 = arith.constant 0.000000e+00 : f32
    %24 = vector.broadcast %cst_14 : f32 to vector<8x512xf32>
    %25 = arith.maximumf %23, %24 : vector<8x512xf32>
    %c0_15 = arith.constant 0 : index
    %c0_16 = arith.constant 0 : index
    %26 = vector.load %arg6[%c0_15, %c0_16] : memref<512x896xbf16, #tpu.memory_space<vmem>>, vector<512x896xbf16>
    %c0_17 = arith.constant 0 : index
    %c0_18 = arith.constant 0 : index
    %27 = vector.load %arg7[%c0_17, %c0_18] : memref<1x896xf32, #tpu.memory_space<vmem>>, vector<1x896xf32>
    %28 = arith.truncf %25 : vector<8x512xf32> to vector<8x512xbf16>
    %cst_19 = arith.constant dense<0.000000e+00> : vector<8x896xf32>
    %29 = tpu.matmul %28, %26, %cst_19 {dimension_numbers = #tpu.dot_dimension_numbers<[1], [0], [0], [1], [0, 0, 1, 1], [], []>} : vector<8x512xbf16>, vector<512x896xbf16>, vector<8x896xf32> -> vector<8x896xf32>
    %30 = vector.broadcast %27 : vector<1x896xf32> to vector<8x896xf32>
    %31 = arith.addf %29, %30 : vector<8x896xf32>
    %32 = arith.negf %31 : vector<8x896xf32>
    %33 = math.exp %32 : vector<8x896xf32>
    %cst_20 = arith.constant 1.000000e+00 : f32
    %34 = vector.broadcast %cst_20 : f32 to vector<8x896xf32>
    %35 = arith.addf %34, %33 : vector<8x896xf32>
    %36 = arith.divf %34, %35 : vector<8x896xf32>
    %cst_21 = arith.constant 9.99999997E-7 : f32
    %cst_22 = arith.constant 0.999998986 : f32
    %37 = vector.broadcast %cst_21 : f32 to vector<8x896xf32>
    %38 = arith.maximumf %37, %36 : vector<8x896xf32>
    %39 = vector.broadcast %cst_22 : f32 to vector<8x896xf32>
    %40 = arith.minimumf %39, %38 : vector<8x896xf32>
    %c0_23 = arith.constant 0 : index
    %c0_24 = arith.constant 0 : index
    %41 = vector.load %arg8[%c0_23, %c0_24] : memref<8x896xf32, #tpu.memory_space<vmem>>, vector<8x896xf32>
    tpu.vector_store %arg8[%c0_23, %c0_24], %40 {strides = array<i32>} : memref<8x896xf32, #tpu.memory_space<vmem>>, vector<8x896xf32>,
    return
  }
  func.func @transform_0(%arg0: i32) -> (i32, i32) {
    %c0_i32 = arith.constant 0 : i32
    %c0_i32_0 = arith.constant 0 : i32
    return %arg0, %c0_i32 : i32, i32
  }
  func.func @transform_1(%arg0: i32) -> (i32, i32) {
    %c0_i32 = arith.constant 0 : i32
    %c0_i32_0 = arith.constant 0 : i32
    %c0_i32_1 = arith.constant 0 : i32
    return %c0_i32, %c0_i32_0 : i32, i32
  }
  func.func @transform_2(%arg0: i32) -> (i32, i32) {
    %c0_i32 = arith.constant 0 : i32
    %c0_i32_0 = arith.constant 0 : i32
    %c0_i32_1 = arith.constant 0 : i32
    return %c0_i32, %c0_i32_0 : i32, i32
  }
  func.func @transform_3(%arg0: i32) -> (i32, i32) {
    %c0_i32 = arith.constant 0 : i32
    %c0_i32_0 = arith.constant 0 : i32
    %c0_i32_1 = arith.constant 0 : i32
    return %c0_i32, %c0_i32_0 : i32, i32
  }
  func.func @transform_4(%arg0: i32) -> (i32, i32) {
    %c0_i32 = arith.constant 0 : i32
    %c0_i32_0 = arith.constant 0 : i32
    %c0_i32_1 = arith.constant 0 : i32
    return %c0_i32, %c0_i32_0 : i32, i32
  }
  func.func @transform_5(%arg0: i32) -> (i32, i32) {
    %c0_i32 = arith.constant 0 : i32
    %c0_i32_0 = arith.constant 0 : i32
    %c0_i32_1 = arith.constant 0 : i32
    return %c0_i32, %c0_i32_0 : i32, i32
  }
  func.func @transform_6(%arg0: i32) -> (i32, i32) {
    %c0_i32 = arith.constant 0 : i32
    %c0_i32_0 = arith.constant 0 : i32
    %c0_i32_1 = arith.constant 0 : i32
    return %c0_i32, %c0_i32_0 : i32, i32
  }
  func.func @transform_7(%arg0: i32) -> (i32, i32) {
    %c0_i32 = arith.constant 0 : i32
    %c0_i32_0 = arith.constant 0 : i32
    return %arg0, %c0_i32 : i32, i32
  }
  func.func @transform_8(%arg0: i32) -> (i32, i32) {
    %c0_i32 = arith.constant 0 : i32
    %c0_i32_0 = arith.constant 0 : i32
    return %arg0, %c0_i32 : i32, i32
  }
}

module attributes {stable_mosaic.version = 11 : i64} {
  func.func @_vae_kernel(%arg0: i32, %arg1: memref<8x128xf32, #tpu.memory_space<vmem>>, %arg2: memref<32x512xbf16, #tpu.memory_space<vmem>>, %arg3: memref<1x512xf32, #tpu.memory_space<vmem>>, %arg4: memref<512x512xbf16, #tpu.memory_space<vmem>>, %arg5: memref<1x512xf32, #tpu.memory_space<vmem>>, %arg6: memref<512x896xbf16, #tpu.memory_space<vmem>>, %arg7: memref<1x896xf32, #tpu.memory_space<vmem>>, %arg8: memref<8x896xf32, #tpu.memory_space<vmem>>, %arg9: memref<8x32xf32, #tpu.memory_space<vmem>>) attributes {dimension_semantics = [#tpu.dimension_semantics<parallel>], iteration_bounds = array<i64: 1>, scalar_prefetch = 0 : i64, scratch_operands = 0 : i64, tpu.core_type = #tpu.core_type<tc>, window_params = [{transform_indices = @transform_0, window_bounds = array<i64: 8, 128>}, {pipeline_mode = #tpu.pipeline_mode<synchronous>, transform_indices = @transform_1, window_bounds = array<i64: 32, 512>}, {pipeline_mode = #tpu.pipeline_mode<synchronous>, transform_indices = @transform_2, window_bounds = array<i64: 1, 512>}, {pipeline_mode = #tpu.pipeline_mode<synchronous>, transform_indices = @transform_3, window_bounds = array<i64: 512, 512>}, {pipeline_mode = #tpu.pipeline_mode<synchronous>, transform_indices = @transform_4, window_bounds = array<i64: 1, 512>}, {pipeline_mode = #tpu.pipeline_mode<synchronous>, transform_indices = @transform_5, window_bounds = array<i64: 512, 896>}, {pipeline_mode = #tpu.pipeline_mode<synchronous>, transform_indices = @transform_6, window_bounds = array<i64: 1, 896>}, {transform_indices = @transform_7, window_bounds = array<i64: 8, 896>}, {transform_indices = @transform_8, window_bounds = array<i64: 8, 32>}]} {
    %c0 = arith.constant 0 : index
    %c0_0 = arith.constant 0 : index
    %0 = vector.load %arg1[%c0, %c0_0] : memref<8x128xf32, #tpu.memory_space<vmem>>, vector<8x128xf32>
    %1 = vector.extract_strided_slice %0 {offsets = [0, 0], sizes = [8, 32], strides = [1, 1]} : vector<8x128xf32> to vector<8x32xf32>
    %2 = vector.extract_strided_slice %0 {offsets = [0, 32], sizes = [8, 32], strides = [1, 1]} : vector<8x128xf32> to vector<8x32xf32>
    %3 = vector.extract_strided_slice %0 {offsets = [0, 64], sizes = [8, 32], strides = [1, 1]} : vector<8x128xf32> to vector<8x32xf32>
    %cst = arith.constant 5.000000e-01 : f32
    %4 = vector.broadcast %cst : f32 to vector<8x32xf32>
    %5 = arith.mulf %4, %2 : vector<8x32xf32>
    %6 = math.exp %5 : vector<8x32xf32>
    %7 = arith.mulf %6, %3 : vector<8x32xf32>
    %8 = arith.addf %1, %7 : vector<8x32xf32>
    %c0_1 = arith.constant 0 : index
    %c0_2 = arith.constant 0 : index
    %9 = vector.load %arg9[%c0_1, %c0_2] : memref<8x32xf32, #tpu.memory_space<vmem>>, vector<8x32xf32>
    tpu.vector_store %arg9[%c0_1, %c0_2], %8 {strides = array<i32>} : memref<8x32xf32, #tpu.memory_space<vmem>>, vector<8x32xf32>,
    %c0_3 = arith.constant 0 : index
    %c0_4 = arith.constant 0 : index
    %10 = vector.load %arg2[%c0_3, %c0_4] : memref<32x512xbf16, #tpu.memory_space<vmem>>, vector<32x512xbf16>
    %c0_5 = arith.constant 0 : index
    %c0_6 = arith.constant 0 : index
    %11 = vector.load %arg3[%c0_5, %c0_6] : memref<1x512xf32, #tpu.memory_space<vmem>>, vector<1x512xf32>
    %12 = arith.truncf %8 : vector<8x32xf32> to vector<8x32xbf16>
    %cst_7 = arith.constant dense<0.000000e+00> : vector<8x512xf32>
    %13 = tpu.matmul %12, %10, %cst_7 {dimension_numbers = #tpu.dot_dimension_numbers<[1], [0], [0], [1], [0, 0, 1, 1], [], []>} : vector<8x32xbf16>, vector<32x512xbf16>, vector<8x512xf32> -> vector<8x512xf32>
    %14 = vector.broadcast %11 : vector<1x512xf32> to vector<8x512xf32>
    %15 = arith.addf %13, %14 : vector<8x512xf32>
    %cst_8 = arith.constant 0.000000e+00 : f32
    %16 = vector.broadcast %cst_8 : f32 to vector<8x512xf32>
    %17 = arith.maximumf %15, %16 : vector<8x512xf32>
    %c0_9 = arith.constant 0 : index
    %c0_10 = arith.constant 0 : index
    %18 = vector.load %arg4[%c0_9, %c0_10] : memref<512x512xbf16, #tpu.memory_space<vmem>>, vector<512x512xbf16>
    %c0_11 = arith.constant 0 : index
    %c0_12 = arith.constant 0 : index
    %19 = vector.load %arg5[%c0_11, %c0_12] : memref<1x512xf32, #tpu.memory_space<vmem>>, vector<1x512xf32>
    %20 = arith.truncf %17 : vector<8x512xf32> to vector<8x512xbf16>
    %cst_13 = arith.constant dense<0.000000e+00> : vector<8x512xf32>
    %21 = tpu.matmul %20, %18, %cst_13 {dimension_numbers = #tpu.dot_dimension_numbers<[1], [0], [0], [1], [0, 0, 1, 1], [], []>} : vector<8x512xbf16>, vector<512x512xbf16>, vector<8x512xf32> -> vector<8x512xf32>
    %22 = vector.broadcast %19 : vector<1x512xf32> to vector<8x512xf32>
    %23 = arith.addf %21, %22 : vector<8x512xf32>
    %cst_14 = arith.constant 0.000000e+00 : f32
    %24 = vector.broadcast %cst_14 : f32 to vector<8x512xf32>
    %25 = arith.maximumf %23, %24 : vector<8x512xf32>
    %c0_15 = arith.constant 0 : index
    %c0_16 = arith.constant 0 : index
    %26 = vector.load %arg6[%c0_15, %c0_16] : memref<512x896xbf16, #tpu.memory_space<vmem>>, vector<512x896xbf16>
    %c0_17 = arith.constant 0 : index
    %c0_18 = arith.constant 0 : index
    %27 = vector.load %arg7[%c0_17, %c0_18] : memref<1x896xf32, #tpu.memory_space<vmem>>, vector<1x896xf32>
    %28 = arith.truncf %25 : vector<8x512xf32> to vector<8x512xbf16>
    %cst_19 = arith.constant dense<0.000000e+00> : vector<8x896xf32>
    %29 = tpu.matmul %28, %26, %cst_19 {dimension_numbers = #tpu.dot_dimension_numbers<[1], [0], [0], [1], [0, 0, 1, 1], [], []>} : vector<8x512xbf16>, vector<512x896xbf16>, vector<8x896xf32> -> vector<8x896xf32>
    %30 = vector.broadcast %27 : vector<1x896xf32> to vector<8x896xf32>
    %31 = arith.addf %29, %30 : vector<8x896xf32>
    %32 = arith.negf %31 : vector<8x896xf32>
    %33 = math.exp %32 : vector<8x896xf32>
    %cst_20 = arith.constant 1.000000e+00 : f32
    %34 = vector.broadcast %cst_20 : f32 to vector<8x896xf32>
    %35 = arith.addf %34, %33 : vector<8x896xf32>
    %36 = arith.divf %34, %35 : vector<8x896xf32>
    %cst_21 = arith.constant 9.99999997E-7 : f32
    %cst_22 = arith.constant 0.999998986 : f32
    %37 = vector.broadcast %cst_21 : f32 to vector<8x896xf32>
    %38 = arith.maximumf %37, %36 : vector<8x896xf32>
    %39 = vector.broadcast %cst_22 : f32 to vector<8x896xf32>
    %40 = arith.minimumf %39, %38 : vector<8x896xf32>
    %c0_23 = arith.constant 0 : index
    %c0_24 = arith.constant 0 : index
    %41 = vector.load %arg8[%c0_23, %c0_24] : memref<8x896xf32, #tpu.memory_space<vmem>>, vector<8x896xf32>
    tpu.vector_store %arg8[%c0_23, %c0_24], %40 {strides = array<i32>} : memref<8x896xf32, #tpu.memory_space<vmem>>, vector<8x896xf32>,
    return
  }
  func.func @transform_0(%arg0: i32) -> (i32, i32) {
    %c0_i32 = arith.constant 0 : i32
    %c0_i32_0 = arith.constant 0 : i32
    return %arg0, %c0_i32 : i32, i32
  }
  func.func @transform_1(%arg0: i32) -> (i32, i32) {
    %c0_i32 = arith.constant 0 : i32
    %c0_i32_0 = arith.constant 0 : i32
    %c0_i32_1 = arith.constant 0 : i32
    return %c0_i32, %c0_i32_0 : i32, i32
  }
  func.func @transform_2(%arg0: i32) -> (i32, i32) {
    %c0_i32 = arith.constant 0 : i32
    %c0_i32_0 = arith.constant 0 : i32
    %c0_i32_1 = arith.constant 0 : i32
    return %c0_i32, %c0_i32_0 : i32, i32
  }
  func.func @transform_3(%arg0: i32) -> (i32, i32) {
    %c0_i32 = arith.constant 0 : i32
    %c0_i32_0 = arith.constant 0 : i32
    %c0_i32_1 = arith.constant 0 : i32
    return %c0_i32, %c0_i32_0 : i32, i32
  }
  func.func @transform_4(%arg0: i32) -> (i32, i32) {
    %c0_i32 = arith.constant 0 : i32
    %c0_i32_0 = arith.constant 0 : i32
    %c0_i32_1 = arith.constant 0 : i32
    return %c0_i32, %c0_i32_0 : i32, i32
  }
  func.func @transform_5(%arg0: i32) -> (i32, i32) {
    %c0_i32 = arith.constant 0 : i32
    %c0_i32_0 = arith.constant 0 : i32
    %c0_i32_1 = arith.constant 0 : i32
    return %c0_i32, %c0_i32_0 : i32, i32
  }
  func.func @transform_6(%arg0: i32) -> (i32, i32) {
    %c0_i32 = arith.constant 0 : i32
    %c0_i32_0 = arith.constant 0 : i32
    %c0_i32_1 = arith.constant 0 : i32
    return %c0_i32, %c0_i32_0 : i32, i32
  }
  func.func @transform_7(%arg0: i32) -> (i32, i32) {
    %c0_i32 = arith.constant 0 : i32
    %c0_i32_0 = arith.constant 0 : i32
    return %arg0, %c0_i32 : i32, i32
  }
  func.func @transform_8(%arg0: i32) -> (i32, i32) {
    %c0_i32 = arith.constant 0 : i32
    %c0_i32_0 = arith.constant 0 : i32
    return %arg0, %c0_i32 : i32, i32
  }
}

</mosaic_0001>

<bundles_post_ra>
// kernel: tpu_custom_call.1
= control target key start
LH: loop header
LB: loop body
LE: loop exit
PB: predicated region body
PF: predicated region fallthrough
CT: control target
= control target key end

     0   :  { %14 = vsyncpa [#allocation3], 0  ;;  %s4476_s0 = inlined_call_operand.hbm [shape: f32[8,128], index: 0, kind: input, shape index: {}]   ;;  %s4477_s1 = inlined_call_operand.hbm [shape: bf16[32,512], index: 1, kind: input, shape index: {}]   ;;  %s4478_s2 = inlined_call_operand.vmem [shape: f32[1,512], index: 2, kind: input, shape index: {}]   ;;  %s4479_s3 = inlined_call_operand.hbm [shape: bf16[512,512], index: 3, kind: input, shape index: {}]   ;;  %s4480_s4 = inlined_call_operand.vmem [shape: f32[1,512], index: 4, kind: input, shape index: {}]   ;;  %s4481_s5 = inlined_call_operand.hbm [shape: bf16[512,896], index: 5, kind: input, shape index: {}]   ;;  %s4482_s6 = inlined_call_operand.vmem [shape: f32[1,896], index: 6, kind: input, shape index: {}]   ;;  %s4483_s7 = inlined_call_operand.hbm [shape: f32[8,896], index: 7, kind: output, shape index: {0}]   ;;  %s4484_s8 = inlined_call_operand.hbm [shape: f32[8,32], index: 8, kind: output, shape index: {1}]  }
   0x1   :  { %15 = vsyncpa [#allocation6], 0 }
   0x2   :  { %16 = vsyncpa [#allocation9], 0 }
   0x3   :  { %17 = vsyncpa [#allocation4], 0 }
   0x4   :  { %18 = vsyncpa [#allocation12], 0  ;;  %s4242_s27 = smov [#allocation5]   ;;  %s4100_s9 = scalar_lea.hbm %s4477_s1, 1024 }
   0x5   :  { %s34_s28 = sshll.u32 %s4242_s27, 4  ;;  %p4101_p0 = scmp.ne.s32.totalorder %s4477_s1, %s4100_s9  ;;  %s35_s28 = int_to_ptr.vmem [resolvable:$true] %s34_s28 }
   0x6   :  { %p4104_p1 = scmp.lt.u32.totalorder %s4100_s9, %s4477_s1 }
   0x8   :  { %p4106_p2 = pnand %p4104_p1, %p4101_p0 }
   0xa   :  { %4109 = shalt.err (!%p4106_p2)
}
   0xb   :  { %s4110_s14 = scalar_lea.vmem %s35_s28, 1024  ;;  %p4115_p4 = scmp.lt.s32.totalorder %s35_s28, %s35_s28 }
   0xc   :  { %p4111_p3 = scmp.ne.s32.totalorder %s35_s28, %s4110_s14  ;;  %p4116_p5 = scmp.lt.s32.totalorder %s4110_s14, %s4110_s14 }
   0xe   :  { %p4117_p6 = por %p4116_p5, %p4115_p4 }
  0x10   :  { %p4118_p7 = pnand %p4117_p6, %p4111_p3 }
  0x12   :  { %4121 = shalt.err (!%p4118_p7)
}
  0x13   :  { %s4243_s15 = smov 256   ;;  %s4244_s16 = smov 16  }
  0x14   :  { %40 = dma.hbm_to_vmem [thread:$0]  %s4477_s1, 1024, %s35_s28, [#allocation6], %s4243_s15, %s4243_s15, %s4244_s16  }
  0x15   :  { %s4245_s19 = smov [#allocation2]   ;;  %s4246_s21 = smov [#allocation7]  }
  0x16   :  { %s25_s20 = sshll.u32 %s4245_s19, 4  ;;  %s48_s22 = sshll.u32 %s4246_s21, 4  ;;  %s26_s20 = int_to_ptr.vmem [resolvable:$true] %s25_s20  ;;  %s49_s22 = int_to_ptr.vmem [resolvable:$true] %s48_s22 }
  0x17   :  { %s4122_s25 = scalar_lea.hbm %s4476_s0, 128 }
  0x18   :  { %p4123_p8 = scmp.ne.s32.totalorder %s4476_s0, %s4122_s25  ;;  %p4126_p9 = scmp.lt.u32.totalorder %s4122_s25, %s4476_s0 }
  0x1a   :  { %p4128_p10 = pnand %p4126_p9, %p4123_p8 }
  0x1c   :  { %4131 = shalt.err (!%p4128_p10)
}
  0x1d   :  { %s4132_s1 = scalar_lea.vmem %s26_s20, 128  ;;  %p4137_p12 = scmp.lt.s32.totalorder %s26_s20, %s26_s20 }
  0x1e   :  { %p4133_p11 = scmp.ne.s32.totalorder %s26_s20, %s4132_s1  ;;  %p4138_p13 = scmp.lt.s32.totalorder %s4132_s1, %s4132_s1 }
  0x20   :  { %p4139_p0 = por %p4138_p13, %p4137_p12 }
  0x22   :  { %p4140_p1 = pnand %p4139_p0, %p4133_p11 }
  0x24   :  { %4143 = shalt.err (!%p4140_p1)
}
  0x25   :  { %28 = dma.hbm_to_vmem [thread:$0]  %s4476_s0, 128, %s26_s20, [#allocation3]  }
  0x26   :  { %s4144_s12 = scalar_lea.hbm %s4479_s3, 16384 }
  0x27   :  { %p4145_p2 = scmp.ne.s32.totalorder %s4479_s3, %s4144_s12  ;;  %p4148_p3 = scmp.lt.u32.totalorder %s4144_s12, %s4479_s3 }
  0x29   :  { %p4150_p4 = pnand %p4148_p3, %p4145_p2 }
  0x2b   :  { %4153 = shalt.err (!%p4150_p4)
}
  0x2c   :  { %s4154_s19 = scalar_lea.vmem %s49_s22, 16384  ;;  %p4159_p6 = scmp.lt.s32.totalorder %s49_s22, %s49_s22 }
  0x2d   :  { %p4155_p5 = scmp.ne.s32.totalorder %s49_s22, %s4154_s19  ;;  %p4160_p7 = scmp.lt.s32.totalorder %s4154_s19, %s4154_s19 }
  0x2f   :  { %p4161_p8 = por %p4160_p7, %p4159_p6 }
  0x31   :  { %p4162_p9 = pnand %p4161_p8, %p4155_p5 }
  0x33   :  { %4165 = shalt.err (!%p4162_p9)
}
  0x34   :  { %54 = dma.hbm_to_vmem [thread:$0]  %s4479_s3, 16384, %s49_s22, [#allocation6], %s4243_s15, %s4243_s15, %s4244_s16  }
  0x35   :  { %s4247_s21 = smov [#allocation8]   ;;  %s4166_s26 = scalar_lea.hbm %s4481_s5, 28672 }
  0x36   :  { %s62_s23 = sshll.u32 %s4247_s21, 4  ;;  %p4167_p10 = scmp.ne.s32.totalorder %s4481_s5, %s4166_s26  ;;  %s63_s23 = int_to_ptr.vmem [resolvable:$true] %s62_s23 }
  0x37   :  { %p4170_p11 = scmp.lt.u32.totalorder %s4166_s26, %s4481_s5 }
  0x39   :  { %p4172_p12 = pnand %p4170_p11, %p4167_p10 }
  0x3b   :  { %4175 = shalt.err (!%p4172_p12)
}
  0x3c   :  { %s4176_s28 = scalar_lea.vmem %s63_s23, 28672  ;;  %p4181_p0 = scmp.lt.s32.totalorder %s63_s23, %s63_s23 }
  0x3d   :  { %p4177_p13 = scmp.ne.s32.totalorder %s63_s23, %s4176_s28  ;;  %p4182_p1 = scmp.lt.s32.totalorder %s4176_s28, %s4176_s28 }
  0x3f   :  { %p4183_p2 = por %p4182_p1, %p4181_p0 }
  0x41   :  { %p4184_p3 = pnand %p4183_p2, %p4177_p13 }
  0x43   :  { %4187 = shalt.err (!%p4184_p3)
}
  0x44   :  { %s4248_s3 = smov 448   ;;  %s4249_s15 = smov 28  }
  0x45   :  { %68 = dma.hbm_to_vmem [thread:$0]  %s4481_s5, 28672, %s63_s23, [#allocation9], %s4248_s3, %s4248_s3, %s4249_s15  }
  0x46   :  { %4232 = dma.done.wait [#allocation3], 128  }
  0x47   :  { %4233 = vsyncadd [#allocation3], 4294967168 }
  0x48   :  { %4234 = dma.done.wait [#allocation6], 17408  }
  0x49   :  { %4235 = vsyncadd [#allocation6], 4294949888 }
  0x4a   :  { %4236 = dma.done.wait [#allocation9], 28672  }
  0x4b   :  { %4237 = vsyncadd [#allocation9], 4294938624  ;;  %v4353_v0 = vld [vmem:[#allocation2] sm:$0xff]  ;;  %s4250_s9 = smov 96   ;;  %v3546_v1 = vld [vmem:[#allocation5 + $0x4] ss:$16 sps:$4 sm:$0xff]  }
  0x4c   :  { %89 = vrot.lane.b32.xlu0 %v4353_v0, %s4250_s9  ;;  %v3548_v2 = vld [vmem:[#allocation5] ss:$16 sps:$4 sm:$0xff]   ;;  %174 = vmatprep.subr.bf16.mxu1 %v3546_v1  ;;  %v85_v3 = vmul.f32 0.5, %v4353_v0  ;;  %v3549_v5 = vld [vmem:[#allocation5 + $0x24] ss:$16 sps:$4 sm:$0xff]   ;;  %v4251_v8 = vmov 0  }
  0x4d   :  { %175 = vmatpush1.bf16.msra.mxu1 %v3548_v2  ;;  %v3551_v6 = vld [vmem:[#allocation5 + $0x20] ss:$16 sps:$4 sm:$0xff]   ;;  %v3554_v7 = vld [vmem:[#allocation5 + $0xc] ss:$16 sps:$4 sm:$0xff]   ;;  %206 = vmatprep.mubr.bf16.mxu1 %v4251_v8  ;;  %v3558_v12 = vld [vmem:[#allocation7 + $0x4] ss:$16 sps:$4 sm:$0xff]  }
  0x4e   :  { %v86_v4 = vmul.f32 1.442695, %v85_v3  ;;  %176 = vmatprep.subr.bf16.mxu1 %v3549_v5  ;;  %v3563_v13 = vld [vmem:[#allocation7] ss:$16 sps:$4 sm:$0xff]   ;;  %v3564_v14 = vld [vmem:[#allocation7 + $0x24] ss:$16 sps:$4 sm:$0xff]   ;;  %1054 = vmatprep.subr.bf16.mxu0 %v3558_v12 }
  0x4f   :  { %v3569_v15 = vld [vmem:[#allocation7 + $0x20] ss:$16 sps:$4 sm:$0xff]   ;;  %1055 = vmatpush1.bf16.msra.mxu0 %v3563_v13  ;;  %v3570_v16 = vld [vmem:[#allocation7 + $0x44] ss:$16 sps:$4 sm:$0xff]   ;;  %vm98_vm0 = vcmask 261120  }
  0x50   :  { %4070 = vpow2.f32 %v86_v4  ;;  %1056 = vmatprep.subr.bf16.mxu0 %v3564_v14  ;;  %v3575_v17 = vld [vmem:[#allocation7 + $0x40] ss:$16 sps:$4 sm:$0xff]   ;;  %v3576_v18 = vld [vmem:[#allocation7 + $0x64] ss:$16 sps:$4 sm:$0xff]   ;;  %v3552_v42 = vld [vmem:[#allocation5 + $0x8] ss:$16 sps:$4 sm:$0xff]  }
  0x51   :  { %177 = vmatpush1.bf16.msra.mxu1 %v3551_v6  ;;  %v3581_v19 = vld [vmem:[#allocation7 + $0x60] ss:$16 sps:$4 sm:$0xff]   ;;  %v3582_v20 = vld [vmem:[#allocation7 + $0x84] ss:$16 sps:$4 sm:$0xff]   ;;  %v3557_v44 = vld [vmem:[#allocation5 + $0x2c] ss:$16 sps:$4 sm:$0xff]  }
  0x52   :  { %215 = vmatprep.subr.bf16.mxu1 %v3554_v7  ;;  %v3587_v21 = vld [vmem:[#allocation7 + $0x80] ss:$16 sps:$4 sm:$0xff]   ;;  %v3588_v22 = vld [vmem:[#allocation7 + $0xa4] ss:$16 sps:$4 sm:$0xff]   ;;  %v3555_v45 = vld [vmem:[#allocation5 + $0x28] ss:$16 sps:$4 sm:$0xff]  }
  0x53   :  { %1057 = vmatpush1.bf16.msra.mxu0 %v3569_v15  ;;  %v3593_v23 = vld [vmem:[#allocation7 + $0xa0] ss:$16 sps:$4 sm:$0xff]   ;;  %v3594_v24 = vld [vmem:[#allocation7 + $0xc4] ss:$16 sps:$4 sm:$0xff]   ;;  %v3562_v46 = vld [vmem:[#allocation7 + $0xc] ss:$16 sps:$4 sm:$0xff]  }
  0x54   :  { %1058 = vmatprep.subr.bf16.mxu0 %v3570_v16  ;;  %v3599_v25 = vld [vmem:[#allocation7 + $0xc0] ss:$16 sps:$4 sm:$0xff]   ;;  %v3600_v26 = vld [vmem:[#allocation7 + $0xe4] ss:$16 sps:$4 sm:$0xff]   ;;  %v3560_v47 = vld [vmem:[#allocation7 + $0x8] ss:$16 sps:$4 sm:$0xff]  }
  0x55   :  { %v3605_v27 = vld [vmem:[#allocation7 + $0xe0] ss:$16 sps:$4 sm:$0xff]   ;;  %v3606_v28 = vld [vmem:[#allocation7 + $0x104] ss:$16 sps:$4 sm:$0xff]   ;;  %v3568_v48 = vld [vmem:[#allocation7 + $0x2c] ss:$16 sps:$4 sm:$0xff]  }
  0x56   :  { %v3611_v29 = vld [vmem:[#allocation7 + $0x100] ss:$16 sps:$4 sm:$0xff]   ;;  %v3612_v30 = vld [vmem:[#allocation7 + $0x124] ss:$16 sps:$4 sm:$0xff]   ;;  %v3566_v49 = vld [vmem:[#allocation7 + $0x28] ss:$16 sps:$4 sm:$0xff]  }
  0x57   :  { %1059 = vmatpush1.bf16.msra.mxu0 %v3575_v17  ;;  %v3617_v31 = vld [vmem:[#allocation7 + $0x120] ss:$16 sps:$4 sm:$0xff]   ;;  %v3618_v32 = vld [vmem:[#allocation7 + $0x144] ss:$16 sps:$4 sm:$0xff]   ;;  %v3574_v50 = vld [vmem:[#allocation7 + $0x4c] ss:$16 sps:$4 sm:$0xff]  }
  0x58   :  { %1060 = vmatprep.subr.bf16.mxu0 %v3576_v18  ;;  %v3623_v33 = vld [vmem:[#allocation7 + $0x140] ss:$16 sps:$4 sm:$0xff]   ;;  %v3624_v34 = vld [vmem:[#allocation7 + $0x164] ss:$16 sps:$4 sm:$0xff]   ;;  %v3572_v51 = vld [vmem:[#allocation7 + $0x48] ss:$16 sps:$4 sm:$0xff]  }
  0x59   :  { %v3629_v35 = vld [vmem:[#allocation7 + $0x160] ss:$16 sps:$4 sm:$0xff]   ;;  %v3630_v36 = vld [vmem:[#allocation7 + $0x184] ss:$16 sps:$4 sm:$0xff]   ;;  %v3580_v52 = vld [vmem:[#allocation7 + $0x6c] ss:$16 sps:$4 sm:$0xff]  }
  0x5a   :  { %v4071_v9 = vpop.eup %4070  ;;  %v3635_v37 = vld [vmem:[#allocation7 + $0x180] ss:$16 sps:$4 sm:$0xff]   ;;  %v3636_v38 = vld [vmem:[#allocation7 + $0x1a4] ss:$16 sps:$4 sm:$0xff]   ;;  %v3578_v53 = vld [vmem:[#allocation7 + $0x68] ss:$16 sps:$4 sm:$0xff]  }
  0x5b   :  { %1061 = vmatpush1.bf16.msra.mxu0 %v3581_v19  ;;  %v3641_v39 = vld [vmem:[#allocation7 + $0x1a0] ss:$16 sps:$4 sm:$0xff]   ;;  %v3586_v54 = vld [vmem:[#allocation7 + $0x8c] ss:$16 sps:$4 sm:$0xff]   ;;  %v3584_v55 = vld [vmem:[#allocation7 + $0x88] ss:$16 sps:$4 sm:$0xff]  }
  0x5c   :  { %1062 = vmatprep.subr.bf16.mxu0 %v3582_v20  ;;  %v3592_v56 = vld [vmem:[#allocation7 + $0xac] ss:$16 sps:$4 sm:$0xff]   ;;  %v3590_v57 = vld [vmem:[#allocation7 + $0xa8] ss:$16 sps:$4 sm:$0xff]   ;;  %v3647_v13 = vld [vmem:[#allocation7 + $0x1c0] ss:$16 sps:$4 sm:$0xff]   ;;  %v111_v20 = vlaneseq }
  0x5d   :  { %v3598_v58 = vld [vmem:[#allocation7 + $0xcc] ss:$16 sps:$4 sm:$0xff]   ;;  %v3596_v59 = vld [vmem:[#allocation7 + $0xc8] ss:$16 sps:$4 sm:$0xff]   ;;  %v3648_v14 = vld [vmem:[#allocation7 + $0x1e4] ss:$16 sps:$4 sm:$0xff]  }
  0x5e   :  { %v3604_v60 = vld [vmem:[#allocation7 + $0xec] ss:$16 sps:$4 sm:$0xff]   ;;  %v3602_v61 = vld [vmem:[#allocation7 + $0xe8] ss:$16 sps:$4 sm:$0xff]   ;;  %v3653_v17 = vld [vmem:[#allocation7 + $0x1e0] ss:$16 sps:$4 sm:$0xff]  }
  0x5f   :  { %1063 = vmatpush1.bf16.msra.mxu0 %v3587_v21  ;;  %v3610_v62 = vld [vmem:[#allocation7 + $0x10c] ss:$16 sps:$4 sm:$0xff]   ;;  %v3608_v63 = vld [vmem:[#allocation7 + $0x108] ss:$16 sps:$4 sm:$0xff]   ;;  %v3656_v18 = vld [vmem:[#allocation7 + $0x204] ss:$16 sps:$4 sm:$0xff]  }
  0x60   :  { %1064 = vmatprep.subr.bf16.mxu0 %v3588_v22  ;;  %v3614_v1 = vld [vmem:[#allocation7 + $0x128] ss:$16 sps:$4 sm:$0xff]   ;;  %v3622_v2 = vld [vmem:[#allocation7 + $0x14c] ss:$16 sps:$4 sm:$0xff]   ;;  %v4363_v21 = vshrl.u32 %v111_v20, 7 }
  0x61   :  { %v3620_v3 = vld [vmem:[#allocation7 + $0x148] ss:$16 sps:$4 sm:$0xff]   ;;  %v3628_v4 = vld [vmem:[#allocation7 + $0x16c] ss:$16 sps:$4 sm:$0xff]   ;;  %v3716_v20 = vld [vmem:[#allocation7 + $0x344] ss:$16 sps:$4 sm:$0xff]  }
  0x62   :  { %v3626_v5 = vld [vmem:[#allocation7 + $0x168] ss:$16 sps:$4 sm:$0xff]   ;;  %v3634_v6 = vld [vmem:[#allocation7 + $0x18c] ss:$16 sps:$4 sm:$0xff]   ;;  %v4366_v22 = vsub.s32 0, %v4363_v21 }
  0x63   :  { %1065 = vmatpush1.bf16.msra.mxu0 %v3593_v23  ;;  %v3632_v7 = vld [vmem:[#allocation7 + $0x188] ss:$16 sps:$4 sm:$0xff]   ;;  %v3652_v15 = vld [vmem:[#allocation7 + $0x1ec] ss:$16 sps:$4 sm:$0xff]  }
  0x64   :  { %1066 = vmatprep.subr.bf16.mxu0 %v3594_v24  ;;  %v3644_v12 = vld [vmem:[#allocation7 + $0x1c8] ss:$16 sps:$4 sm:$0xff]   ;;  %v3659_v19 = vld [vmem:[#allocation7 + $0x20c] ss:$16 sps:$4 sm:$0xff]   ;;  %v4374_v24 = vsub.s32 1, %v4363_v21 }
  0x65   :  { %v3650_v16 = vld [vmem:[#allocation7 + $0x1e8] ss:$16 sps:$4 sm:$0xff]  }
  0x66   :  { %v4371_v23 = vld [vmem:[%s4478_s2] sm:$0xf] }
  0x67   :  { %1067 = vmatpush1.bf16.msra.mxu0 %v3599_v25  ;;  %v114_v25 = vrot.slane %v4371_v23, %v4366_v22 }
  0x68   :  { %1068 = vmatprep.subr.bf16.mxu0 %v3600_v26  ;;  %v118_v26 = vrot.slane %v4371_v23, %v4374_v24 }
  0x6b   :  { %1069 = vmatpush1.bf16.msra.mxu0 %v3605_v27 }
  0x6c   :  { %1070 = vmatprep.subr.bf16.mxu0 %v3606_v28 }
  0x6f   :  { %1071 = vmatpush1.bf16.msra.mxu0 %v3611_v29 }
  0x70   :  { %1072 = vmatprep.subr.bf16.mxu0 %v3612_v30 }
  0x73   :  { %1073 = vmatpush1.bf16.msra.mxu0 %v3617_v31 }
  0x74   :  { %1074 = vmatprep.subr.bf16.mxu0 %v3618_v32  ;;  %v4381_v32 = vsub.s32 3, %v4363_v21 }
  0x77   :  { %1075 = vmatpush1.bf16.msra.mxu0 %v3623_v33 }
  0x78   :  { %1076 = vmatprep.subr.bf16.mxu0 %v3624_v34 }
  0x7b   :  { %1077 = vmatpush1.bf16.msra.mxu0 %v3629_v35 }
  0x7c   :  { %1078 = vmatprep.subr.bf16.mxu0 %v3630_v36 }
  0x7f   :  { %1079 = vmatpush1.bf16.msra.mxu0 %v3635_v37  ;;  %v3654_v37 = vld [vmem:[#allocation7 + $0x200] ss:$16 sps:$4 sm:$0xff]  }
  0x80   :  { %1080 = vmatprep.subr.bf16.mxu0 %v3636_v38  ;;  %v3657_v38 = vld [vmem:[#allocation7 + $0x208] ss:$16 sps:$4 sm:$0xff]  }
  0x83   :  { %1081 = vmatpush1.bf16.msra.mxu0 %v3641_v39  ;;  %v126_v39 = vrot.slane %v4371_v23, %v4381_v32 }
  0xbe   :  { %v90_v10 = vpop.permute.xlu0 %89 }
  0xbf   :  { %v92_v11 = vmul.f32 %v4071_v9, %v90_v10  ;;  %v3638_v9 = vld [vmem:[#allocation7 + $0x1a8] ss:$16 sps:$4 sm:$0xff]   ;;  %v3642_v10 = vld [vmem:[#allocation7 + $0x1c4] ss:$16 sps:$4 sm:$0xff]  }
  0xc0   :  { %1082 = vmatprep.subr.bf16.mxu0 %v3642_v10  ;;  %v3696_v10 = vld [vmem:[#allocation7 + $0x2e0] ss:$16 sps:$4 sm:$0xff]  }
  0xc1   :  { %94 = vrot.lane.b32.xlu0 %v92_v11, %s4250_s9  ;;  %v3646_v11 = vld [vmem:[#allocation7 + $0x1cc] ss:$16 sps:$4 sm:$0xff]   ;;  %1083 = vmatpush1.bf16.msra.mxu0 %v3647_v13 }
  0xc2   :  { %1084 = vmatprep.subr.bf16.mxu0 %v3648_v14  ;;  %v3707_v13 = vld [vmem:[#allocation7 + $0x30c] ss:$16 sps:$4 sm:$0xff]   ;;  %v3702_v14 = vld [vmem:[#allocation7 + $0x300] ss:$16 sps:$4 sm:$0xff]  }
  0xc5   :  { %1085 = vmatpush1.bf16.msra.mxu0 %v3653_v17  ;;  %v3713_v17 = vld [vmem:[#allocation7 + $0x32c] ss:$16 sps:$4 sm:$0xff]  }
  0xc6   :  { %1095 = vmatprep.subr.bf16.mxu0 %v3656_v18  ;;  %v3708_v18 = vld [vmem:[#allocation7 + $0x320] ss:$16 sps:$4 sm:$0xff]  }
 0x133   :  { %v95_v40 = vpop.permute.xlu0 %94 }
 0x134   :  { %v97_v41 = vadd.f32 %v95_v40, %v4353_v0  ;;  %v3616_v0 = vld [vmem:[#allocation7 + $0x12c] ss:$16 sps:$4 sm:$0xff]  }
 0x136   :  { %v109_v43 = vpack.c.bf16 %v97_v41, %v97_v41  ;;  %99 = vst.msk [vmem:[#allocation11] sm:$0xff] %vm98_vm0, %v97_v41  ;;  %v3662_v41 = vld [vmem:[#allocation7 + $0x224] ss:$16 sps:$4 sm:$0xff]  }
 0x138   :  { %3099 = vmatmul.mubr.msk.bf16.vlgmr.msra.gmra.mrb[0].mxu1 %vm98_vm0, %v109_v43 }
 0x139   :  { %216 = vmatpush1.bf16.msra.mxu1 %v3552_v42  ;;  %247 = vmatprep.mubr.bf16.mxu1 %v4251_v8  ;;  %v3640_v8 = vld [vmem:[#allocation7 + $0x1ac] ss:$16 sps:$4 sm:$0xff]  }
 0x13a   :  { %217 = vmatprep.subr.bf16.mxu1 %v3557_v44  ;;  %v3665_v42 = vld [vmem:[#allocation7 + $0x22c] ss:$16 sps:$4 sm:$0xff]  }
 0x13d   :  { %218 = vmatpush1.bf16.msra.mxu1 %v3555_v45 }
 0x13e   :  { %1136 = vmatprep.subr.bf16.mxu1 %v3562_v46 }
 0x140   :  { %3100 = vmatmul.mubr.msk.bf16.vlgmr.msra.gmra.mrb[4].mxu1 %vm98_vm0, %v109_v43 }
 0x141   :  { %1137 = vmatpush1.bf16.msra.mxu1 %v3560_v47  ;;  %v3660_v47 = vld [vmem:[#allocation7 + $0x220] ss:$16 sps:$4 sm:$0xff]  }
 0x142   :  { %1138 = vmatprep.subr.bf16.mxu1 %v3568_v48  ;;  %v3663_v48 = vld [vmem:[#allocation7 + $0x228] ss:$16 sps:$4 sm:$0xff]  }
 0x145   :  { %1139 = vmatpush1.bf16.msra.mxu1 %v3566_v49 }
 0x146   :  { %1140 = vmatprep.subr.bf16.mxu1 %v3574_v50  ;;  %v3668_v50 = vld [vmem:[#allocation7 + $0x244] ss:$16 sps:$4 sm:$0xff]  }
 0x149   :  { %1141 = vmatpush1.bf16.msra.mxu1 %v3572_v51  ;;  %v3671_v51 = vld [vmem:[#allocation7 + $0x24c] ss:$16 sps:$4 sm:$0xff]  }
 0x14a   :  { %1142 = vmatprep.subr.bf16.mxu1 %v3580_v52 }
 0x14d   :  { %1143 = vmatpush1.bf16.msra.mxu1 %v3578_v53 }
 0x14e   :  { %1144 = vmatprep.subr.bf16.mxu1 %v3586_v54  ;;  %v3666_v54 = vld [vmem:[#allocation7 + $0x240] ss:$16 sps:$4 sm:$0xff]  }
 0x151   :  { %1145 = vmatpush1.bf16.msra.mxu1 %v3584_v55  ;;  %v3669_v55 = vld [vmem:[#allocation7 + $0x248] ss:$16 sps:$4 sm:$0xff]  }
 0x152   :  { %1146 = vmatprep.subr.bf16.mxu1 %v3592_v56  ;;  %v3674_v56 = vld [vmem:[#allocation7 + $0x264] ss:$16 sps:$4 sm:$0xff]  }
 0x155   :  { %1147 = vmatpush1.bf16.msra.mxu1 %v3590_v57  ;;  %v3677_v57 = vld [vmem:[#allocation7 + $0x26c] ss:$16 sps:$4 sm:$0xff]  }
 0x156   :  { %1148 = vmatprep.subr.bf16.mxu1 %v3598_v58  ;;  %v3672_v58 = vld [vmem:[#allocation7 + $0x260] ss:$16 sps:$4 sm:$0xff]  }
 0x159   :  { %1149 = vmatpush1.bf16.msra.mxu1 %v3596_v59  ;;  %v3675_v59 = vld [vmem:[#allocation7 + $0x268] ss:$16 sps:$4 sm:$0xff]  }
 0x15a   :  { %1150 = vmatprep.subr.bf16.mxu1 %v3604_v60  ;;  %v3680_v60 = vld [vmem:[#allocation7 + $0x284] ss:$16 sps:$4 sm:$0xff]  }
 0x15d   :  { %1151 = vmatpush1.bf16.msra.mxu1 %v3602_v61  ;;  %v3683_v61 = vld [vmem:[#allocation7 + $0x28c] ss:$16 sps:$4 sm:$0xff]  }
 0x15e   :  { %1152 = vmatprep.subr.bf16.mxu1 %v3610_v62  ;;  %v3678_v62 = vld [vmem:[#allocation7 + $0x280] ss:$16 sps:$4 sm:$0xff]  }
 0x161   :  { %1153 = vmatpush1.bf16.msra.mxu1 %v3608_v63  ;;  %v3681_v63 = vld [vmem:[#allocation7 + $0x288] ss:$16 sps:$4 sm:$0xff]  }
 0x162   :  { %1154 = vmatprep.subr.bf16.mxu1 %v3616_v0  ;;  %v3686_v0 = vld [vmem:[#allocation7 + $0x2a4] ss:$16 sps:$4 sm:$0xff]  }
 0x165   :  { %1155 = vmatpush1.bf16.msra.mxu1 %v3614_v1  ;;  %v3689_v1 = vld [vmem:[#allocation7 + $0x2ac] ss:$16 sps:$4 sm:$0xff]  }
 0x166   :  { %1156 = vmatprep.subr.bf16.mxu1 %v3622_v2  ;;  %v3684_v2 = vld [vmem:[#allocation7 + $0x2a0] ss:$16 sps:$4 sm:$0xff]  }
 0x169   :  { %1157 = vmatpush1.bf16.msra.mxu1 %v3620_v3  ;;  %v3687_v3 = vld [vmem:[#allocation7 + $0x2a8] ss:$16 sps:$4 sm:$0xff]  }
 0x16a   :  { %1158 = vmatprep.subr.bf16.mxu1 %v3628_v4  ;;  %v3692_v4 = vld [vmem:[#allocation7 + $0x2c4] ss:$16 sps:$4 sm:$0xff]  }
 0x16d   :  { %1159 = vmatpush1.bf16.msra.mxu1 %v3626_v5  ;;  %v3695_v5 = vld [vmem:[#allocation7 + $0x2cc] ss:$16 sps:$4 sm:$0xff]  }
 0x16e   :  { %1160 = vmatprep.subr.bf16.mxu1 %v3634_v6  ;;  %v3690_v6 = vld [vmem:[#allocation7 + $0x2c0] ss:$16 sps:$4 sm:$0xff]  }
 0x171   :  { %1161 = vmatpush1.bf16.msra.mxu1 %v3632_v7  ;;  %v3693_v7 = vld [vmem:[#allocation7 + $0x2c8] ss:$16 sps:$4 sm:$0xff]  }
 0x172   :  { %1162 = vmatprep.subr.bf16.mxu1 %v3640_v8  ;;  %v3698_v8 = vld [vmem:[#allocation7 + $0x2e4] ss:$16 sps:$4 sm:$0xff]  }
 0x175   :  { %1163 = vmatpush1.bf16.msra.mxu1 %v3638_v9  ;;  %v3701_v9 = vld [vmem:[#allocation7 + $0x2ec] ss:$16 sps:$4 sm:$0xff]  }
 0x176   :  { %1164 = vmatprep.subr.bf16.mxu1 %v3646_v11  ;;  %v3699_v11 = vld [vmem:[#allocation7 + $0x2e8] ss:$16 sps:$4 sm:$0xff]  }
 0x179   :  { %1165 = vmatpush1.bf16.msra.mxu1 %v3644_v12  ;;  %v3704_v12 = vld [vmem:[#allocation7 + $0x304] ss:$16 sps:$4 sm:$0xff]  }
 0x17a   :  { %1166 = vmatprep.subr.bf16.mxu1 %v3652_v15  ;;  %v3705_v15 = vld [vmem:[#allocation7 + $0x308] ss:$16 sps:$4 sm:$0xff]  }
 0x17d   :  { %1167 = vmatpush1.bf16.msra.mxu1 %v3650_v16  ;;  %v3710_v16 = vld [vmem:[#allocation7 + $0x324] ss:$16 sps:$4 sm:$0xff]  }
 0x17e   :  { %1177 = vmatprep.subr.bf16.mxu1 %v3659_v19  ;;  %v3711_v19 = vld [vmem:[#allocation7 + $0x328] ss:$16 sps:$4 sm:$0xff]  }
 0x20b   :  { %v208_v27 = vpop.f32.mrb[0].mxu1 }
 0x20c   :  { %v209_v28 = vadd.f32 %v208_v27, %v114_v25  ;;  %v210_v29 = vpop.f32.mrb[1].mxu1  ;;  %v3719_v25 = vld [vmem:[#allocation7 + $0x34c] ss:$16 sps:$4 sm:$0xff]   ;;  %v3717_v27 = vld [vmem:[#allocation7 + $0x348] ss:$16 sps:$4 sm:$0xff]  }
 0x20d   :  { %v211_v30 = vadd.f32 %v210_v29, %v118_v26  ;;  %v212_v31 = vpop.f32.mrb[2].mxu1  ;;  %v3714_v26 = vld [vmem:[#allocation7 + $0x340] ss:$16 sps:$4 sm:$0xff]   ;;  %v3725_v29 = vld [vmem:[#allocation7 + $0x36c] ss:$16 sps:$4 sm:$0xff]  }
 0x20e   :  { %v256_v33 = vmax.f32 %v209_v28, 0.0  ;;  %v213_v34 = vpop.f32.mrb[3].mxu1  ;;  %v3722_v28 = vld [vmem:[#allocation7 + $0x364] ss:$16 sps:$4 sm:$0xff]   ;;  %v3723_v31 = vld [vmem:[#allocation7 + $0x368] ss:$16 sps:$4 sm:$0xff]  }
 0x20f   :  { %v257_v35 = vmax.f32 %v211_v30, 0.0  ;;  %v3720_v30 = vld [vmem:[#allocation7 + $0x360] ss:$16 sps:$4 sm:$0xff]   ;;  %v3731_v34 = vld [vmem:[#allocation7 + $0x38c] ss:$16 sps:$4 sm:$0xff]  }
 0x210   :  { %v389_v40 = vpack.c.bf16 %v256_v33, %v256_v33  ;;  %v3728_v33 = vld [vmem:[#allocation7 + $0x384] ss:$16 sps:$4 sm:$0xff]  }
 0x211   :  { %v390_v36 = vpack.c.bf16 %v257_v35, %v257_v35  ;;  %v3726_v35 = vld [vmem:[#allocation7 + $0x380] ss:$16 sps:$4 sm:$0xff]  }
 0x213   :  { %v4385_v43 = vpop.f32.mrb[4].mxu1  ;;  %1086 = vmatprep.mubr.bf16.mxu0 %v390_v36  ;;  %1168 = vmatprep.mubr.bf16.mxu1 %v390_v36  ;;  %v3729_v36 = vld [vmem:[#allocation7 + $0x388] ss:$16 sps:$4 sm:$0xff]  }
 0x214   :  { %v251_v44 = vpop.f32.mrb[5].mxu1  ;;  %1087 = vmatmul.mubr.bf16.vlgmr.msra.gmra.mrb[0].mxu0 %v389_v40  ;;  %1169 = vmatmul.mubr.bf16.vlgmr.msra.gmra.mrb[8].mxu1 %v389_v40  ;;  %v3732_v40 = vld [vmem:[#allocation7 + $0x3a0] ss:$16 sps:$4 sm:$0xff]  }
 0x215   :  { %v252_v45 = vadd.f32 %v251_v44, %v126_v39  ;;  %1096 = vmatpush1.bf16.msra.mxu0 %v3654_v37  ;;  %1178 = vmatpush1.bf16.msra.mxu1 %v3657_v38  ;;  %v253_v46 = vpop.f32.mrb[6].mxu1  ;;  %v4388_v37 = vsub.s32 2, %v4363_v21  ;;  %v3734_v38 = vld [vmem:[#allocation7 + $0x3a4] ss:$16 sps:$4 sm:$0xff]   ;;  %v3737_v39 = vld [vmem:[#allocation7 + $0x3ac] ss:$16 sps:$4 sm:$0xff]  }
 0x216   :  { %v254_v49 = vpop.f32.mrb[7].mxu1  ;;  %1097 = vmatprep.subr.bf16.mxu0 %v3662_v41  ;;  %1179 = vmatprep.subr.bf16.mxu1 %v3665_v42  ;;  %v3735_v41 = vld [vmem:[#allocation7 + $0x3a8] ss:$16 sps:$4 sm:$0xff]   ;;  %v3740_v44 = vld [vmem:[#allocation7 + $0x3c4] ss:$16 sps:$4 sm:$0xff]  }
 0x217   :  { %v259_v52 = vmax.f32 %v252_v45, 0.0  ;;  %v122_v42 = vrot.slane %v4371_v23, %v4388_v37  ;;  %v3743_v45 = vld [vmem:[#allocation7 + $0x3cc] ss:$16 sps:$4 sm:$0xff]   ;;  %v3738_v46 = vld [vmem:[#allocation7 + $0x3c0] ss:$16 sps:$4 sm:$0xff]  }
 0x218   :  { %v3746_v49 = vld [vmem:[#allocation7 + $0x3e4] ss:$16 sps:$4 sm:$0xff]  }
 0x219   :  { %v392_v53 = vpack.c.bf16 %v259_v52, %v259_v52  ;;  %1098 = vmatpush1.bf16.msra.mxu0 %v3660_v47  ;;  %1180 = vmatpush1.bf16.msra.mxu1 %v3663_v48  ;;  %v3741_v47 = vld [vmem:[#allocation7 + $0x3c8] ss:$16 sps:$4 sm:$0xff]   ;;  %v250_v48 = vadd.f32 %v4385_v43, %v122_v42  ;;  %v3752_v23 = vld [vmem:[#allocation8 + $0x4] ss:$28 sps:$4 sm:$0xff]   ;;  %v3819_v42 = vld [vmem:[#allocation8 + $0x270] ss:$28 sps:$4 sm:$0xff]  }
 0x21a   :  { %1099 = vmatprep.subr.bf16.mxu0 %v3668_v50  ;;  %1181 = vmatprep.subr.bf16.mxu1 %v3671_v51  ;;  %v3749_v50 = vld [vmem:[#allocation7 + $0x3ec] ss:$16 sps:$4 sm:$0xff]   ;;  %v3744_v51 = vld [vmem:[#allocation7 + $0x3e0] ss:$16 sps:$4 sm:$0xff]   ;;  %v3747_v52 = vld [vmem:[#allocation7 + $0x3e8] ss:$16 sps:$4 sm:$0xff]  }
 0x21b   :  { %1127 = vmatprep.mubr.bf16.mxu0 %v392_v53  ;;  %1209 = vmatprep.mubr.bf16.mxu1 %v392_v53  ;;  %v258_v53 = vmax.f32 %v250_v48, 0.0  ;;  %v3758_v43 = vld [vmem:[#allocation8 + $0x3c] ss:$28 sps:$4 sm:$0xff]  }
 0x21c   :  { %v3830_v48 = vld [vmem:[#allocation8 + $0x2dc] ss:$28 sps:$4 sm:$0xff]  }
 0x21d   :  { %1100 = vmatpush1.bf16.msra.mxu0 %v3666_v54  ;;  %1182 = vmatpush1.bf16.msra.mxu1 %v3669_v55  ;;  %v3755_v54 = vld [vmem:[#allocation8 + $0xc] ss:$28 sps:$4 sm:$0xff]   ;;  %v3750_v55 = vld [vmem:[#allocation8] ss:$28 sps:$4 sm:$0xff]  }
 0x21e   :  { %1101 = vmatprep.subr.bf16.mxu0 %v3674_v56  ;;  %1183 = vmatprep.subr.bf16.mxu1 %v3677_v57  ;;  %v3753_v56 = vld [vmem:[#allocation8 + $0x8] ss:$28 sps:$4 sm:$0xff]   ;;  %v391_v57 = vpack.c.bf16 %v258_v53, %v258_v53  ;;  %v3839_v53 = vld [vmem:[#allocation8 + $0x31c] ss:$28 sps:$4 sm:$0xff]  }
 0x221   :  { %1102 = vmatpush1.bf16.msra.mxu0 %v3672_v58  ;;  %1184 = vmatpush1.bf16.msra.mxu1 %v3675_v59  ;;  %v3761_v58 = vld [vmem:[#allocation8 + $0x44] ss:$28 sps:$4 sm:$0xff]   ;;  %v3756_v59 = vld [vmem:[#allocation8 + $0x38] ss:$28 sps:$4 sm:$0xff]  }
 0x222   :  { %1103 = vmatprep.subr.bf16.mxu0 %v3680_v60  ;;  %1185 = vmatprep.subr.bf16.mxu1 %v3683_v61  ;;  %v3759_v60 = vld [vmem:[#allocation8 + $0x40] ss:$28 sps:$4 sm:$0xff]   ;;  %v3764_v61 = vld [vmem:[#allocation8 + $0x74] ss:$28 sps:$4 sm:$0xff]  }
 0x225   :  { %1104 = vmatpush1.bf16.msra.mxu0 %v3678_v62  ;;  %1186 = vmatpush1.bf16.msra.mxu1 %v3681_v63  ;;  %v3767_v62 = vld [vmem:[#allocation8 + $0x7c] ss:$28 sps:$4 sm:$0xff]   ;;  %v3762_v63 = vld [vmem:[#allocation8 + $0x70] ss:$28 sps:$4 sm:$0xff]  }
 0x226   :  { %1105 = vmatprep.subr.bf16.mxu0 %v3686_v0  ;;  %1187 = vmatprep.subr.bf16.mxu1 %v3689_v1  ;;  %v3765_v0 = vld [vmem:[#allocation8 + $0x78] ss:$28 sps:$4 sm:$0xff]   ;;  %v3770_v1 = vld [vmem:[#allocation8 + $0xac] ss:$28 sps:$4 sm:$0xff]  }
 0x229   :  { %1106 = vmatpush1.bf16.msra.mxu0 %v3684_v2  ;;  %1188 = vmatpush1.bf16.msra.mxu1 %v3687_v3  ;;  %v3773_v2 = vld [vmem:[#allocation8 + $0xb4] ss:$28 sps:$4 sm:$0xff]   ;;  %v3768_v3 = vld [vmem:[#allocation8 + $0xa8] ss:$28 sps:$4 sm:$0xff]  }
 0x22a   :  { %1107 = vmatprep.subr.bf16.mxu0 %v3692_v4  ;;  %1189 = vmatprep.subr.bf16.mxu1 %v3695_v5  ;;  %v3771_v4 = vld [vmem:[#allocation8 + $0xb0] ss:$28 sps:$4 sm:$0xff]   ;;  %v3776_v5 = vld [vmem:[#allocation8 + $0xe4] ss:$28 sps:$4 sm:$0xff]  }
 0x22d   :  { %1108 = vmatpush1.bf16.msra.mxu0 %v3690_v6  ;;  %1190 = vmatpush1.bf16.msra.mxu1 %v3693_v7  ;;  %v3779_v6 = vld [vmem:[#allocation8 + $0xec] ss:$28 sps:$4 sm:$0xff]   ;;  %v3774_v7 = vld [vmem:[#allocation8 + $0xe0] ss:$28 sps:$4 sm:$0xff]  }
 0x22e   :  { %1109 = vmatprep.subr.bf16.mxu0 %v3698_v8  ;;  %1191 = vmatprep.subr.bf16.mxu1 %v3701_v9  ;;  %v3777_v8 = vld [vmem:[#allocation8 + $0xe8] ss:$28 sps:$4 sm:$0xff]   ;;  %v3782_v9 = vld [vmem:[#allocation8 + $0x11c] ss:$28 sps:$4 sm:$0xff]  }
 0x231   :  { %1110 = vmatpush1.bf16.msra.mxu0 %v3696_v10  ;;  %1192 = vmatpush1.bf16.msra.mxu1 %v3699_v11  ;;  %v3785_v10 = vld [vmem:[#allocation8 + $0x124] ss:$28 sps:$4 sm:$0xff]   ;;  %v3780_v11 = vld [vmem:[#allocation8 + $0x118] ss:$28 sps:$4 sm:$0xff]  }
 0x232   :  { %1111 = vmatprep.subr.bf16.mxu0 %v3704_v12  ;;  %1193 = vmatprep.subr.bf16.mxu1 %v3707_v13  ;;  %v3783_v12 = vld [vmem:[#allocation8 + $0x120] ss:$28 sps:$4 sm:$0xff]   ;;  %v3788_v13 = vld [vmem:[#allocation8 + $0x154] ss:$28 sps:$4 sm:$0xff]  }
 0x235   :  { %1112 = vmatpush1.bf16.msra.mxu0 %v3702_v14  ;;  %1194 = vmatpush1.bf16.msra.mxu1 %v3705_v15  ;;  %v3791_v14 = vld [vmem:[#allocation8 + $0x15c] ss:$28 sps:$4 sm:$0xff]   ;;  %v3786_v15 = vld [vmem:[#allocation8 + $0x150] ss:$28 sps:$4 sm:$0xff]  }
 0x236   :  { %1113 = vmatprep.subr.bf16.mxu0 %v3710_v16  ;;  %1195 = vmatprep.subr.bf16.mxu1 %v3713_v17  ;;  %v3789_v16 = vld [vmem:[#allocation8 + $0x158] ss:$28 sps:$4 sm:$0xff]   ;;  %v3794_v17 = vld [vmem:[#allocation8 + $0x18c] ss:$28 sps:$4 sm:$0xff]  }
 0x239   :  { %1114 = vmatpush1.bf16.msra.mxu0 %v3708_v18  ;;  %1196 = vmatpush1.bf16.msra.mxu1 %v3711_v19  ;;  %v3797_v18 = vld [vmem:[#allocation8 + $0x194] ss:$28 sps:$4 sm:$0xff]   ;;  %v3792_v19 = vld [vmem:[#allocation8 + $0x188] ss:$28 sps:$4 sm:$0xff]  }
 0x23a   :  { %1115 = vmatprep.subr.bf16.mxu0 %v3716_v20  ;;  %1197 = vmatprep.subr.bf16.mxu1 %v3719_v25  ;;  %v3795_v20 = vld [vmem:[#allocation8 + $0x190] ss:$28 sps:$4 sm:$0xff]   ;;  %v3800_v25 = vld [vmem:[#allocation8 + $0x1c4] ss:$28 sps:$4 sm:$0xff]  }
 0x23d   :  { %1116 = vmatpush1.bf16.msra.mxu0 %v3714_v26  ;;  %1198 = vmatpush1.bf16.msra.mxu1 %v3717_v27  ;;  %v3803_v26 = vld [vmem:[#allocation8 + $0x1cc] ss:$28 sps:$4 sm:$0xff]   ;;  %v3798_v27 = vld [vmem:[#allocation8 + $0x1c0] ss:$28 sps:$4 sm:$0xff]  }
 0x23e   :  { %1117 = vmatprep.subr.bf16.mxu0 %v3722_v28  ;;  %1199 = vmatprep.subr.bf16.mxu1 %v3725_v29  ;;  %v3801_v28 = vld [vmem:[#allocation8 + $0x1c8] ss:$28 sps:$4 sm:$0xff]   ;;  %v3806_v29 = vld [vmem:[#allocation8 + $0x1fc] ss:$28 sps:$4 sm:$0xff]  }
 0x241   :  { %1118 = vmatpush1.bf16.msra.mxu0 %v3720_v30  ;;  %1200 = vmatpush1.bf16.msra.mxu1 %v3723_v31  ;;  %v3809_v30 = vld [vmem:[#allocation8 + $0x204] ss:$28 sps:$4 sm:$0xff]   ;;  %v3804_v31 = vld [vmem:[#allocation8 + $0x1f8] ss:$28 sps:$4 sm:$0xff]  }
 0x242   :  { %1119 = vmatprep.subr.bf16.mxu0 %v3728_v33  ;;  %1201 = vmatprep.subr.bf16.mxu1 %v3731_v34  ;;  %v3807_v33 = vld [vmem:[#allocation8 + $0x200] ss:$28 sps:$4 sm:$0xff]   ;;  %v3812_v34 = vld [vmem:[#allocation8 + $0x234] ss:$28 sps:$4 sm:$0xff]  }
 0x245   :  { %1120 = vmatpush1.bf16.msra.mxu0 %v3726_v35  ;;  %1202 = vmatpush1.bf16.msra.mxu1 %v3729_v36  ;;  %v3815_v35 = vld [vmem:[#allocation8 + $0x23c] ss:$28 sps:$4 sm:$0xff]   ;;  %v3810_v36 = vld [vmem:[#allocation8 + $0x230] ss:$28 sps:$4 sm:$0xff]  }
 0x246   :  { %1121 = vmatprep.subr.bf16.mxu0 %v3734_v38  ;;  %1203 = vmatprep.subr.bf16.mxu1 %v3737_v39  ;;  %v3813_v38 = vld [vmem:[#allocation8 + $0x238] ss:$28 sps:$4 sm:$0xff]   ;;  %v3818_v39 = vld [vmem:[#allocation8 + $0x26c] ss:$28 sps:$4 sm:$0xff]  }
 0x249   :  { %1122 = vmatpush1.bf16.msra.mxu0 %v3732_v40  ;;  %1204 = vmatpush1.bf16.msra.mxu1 %v3735_v41  ;;  %v3821_v40 = vld [vmem:[#allocation8 + $0x274] ss:$28 sps:$4 sm:$0xff]   ;;  %v3816_v41 = vld [vmem:[#allocation8 + $0x268] ss:$28 sps:$4 sm:$0xff]  }
 0x24a   :  { %1123 = vmatprep.subr.bf16.mxu0 %v3740_v44  ;;  %1205 = vmatprep.subr.bf16.mxu1 %v3743_v45  ;;  %v3824_v44 = vld [vmem:[#allocation8 + $0x2a4] ss:$28 sps:$4 sm:$0xff]   ;;  %v3827_v45 = vld [vmem:[#allocation8 + $0x2ac] ss:$28 sps:$4 sm:$0xff]  }
 0x24d   :  { %1124 = vmatpush1.bf16.msra.mxu0 %v3738_v46  ;;  %1206 = vmatpush1.bf16.msra.mxu1 %v3741_v47  ;;  %v3822_v46 = vld [vmem:[#allocation8 + $0x2a0] ss:$28 sps:$4 sm:$0xff]   ;;  %v3825_v47 = vld [vmem:[#allocation8 + $0x2a8] ss:$28 sps:$4 sm:$0xff]  }
 0x24e   :  { %1125 = vmatprep.subr.bf16.mxu0 %v3746_v49  ;;  %1207 = vmatprep.subr.bf16.mxu1 %v3749_v50  ;;  %v3833_v49 = vld [vmem:[#allocation8 + $0x2e4] ss:$28 sps:$4 sm:$0xff]   ;;  %v3828_v50 = vld [vmem:[#allocation8 + $0x2d8] ss:$28 sps:$4 sm:$0xff]  }
 0x251   :  { %1126 = vmatpush1.bf16.msra.mxu0 %v3744_v51  ;;  %1208 = vmatpush1.bf16.msra.mxu1 %v3747_v52  ;;  %v3831_v51 = vld [vmem:[#allocation8 + $0x2e0] ss:$28 sps:$4 sm:$0xff]   ;;  %v3836_v52 = vld [vmem:[#allocation8 + $0x314] ss:$28 sps:$4 sm:$0xff]  }
 0x252   :  { %2671 = vmatprep.subr.bf16.mxu0 %v3752_v23  ;;  %2753 = vmatprep.subr.bf16.mxu1 %v3755_v54  ;;  %v3834_v23 = vld [vmem:[#allocation8 + $0x310] ss:$28 sps:$4 sm:$0xff]   ;;  %v3837_v54 = vld [vmem:[#allocation8 + $0x318] ss:$28 sps:$4 sm:$0xff]  }
 0x254   :  { %1128 = vmatmul.mubr.bf16.vlgmr.msra.gmra.mrb[0].mxu0 %v391_v57  ;;  %1210 = vmatmul.mubr.bf16.vlgmr.msra.gmra.mrb[8].mxu1 %v391_v57  ;;  %v3840_v57 = vld [vmem:[#allocation8 + $0x348] ss:$28 sps:$4 sm:$0xff]  }
 0x255   :  { %2672 = vmatpush1.bf16.msra.mxu0 %v3750_v55  ;;  %2754 = vmatpush1.bf16.msra.mxu1 %v3753_v56  ;;  %v3842_v55 = vld [vmem:[#allocation8 + $0x34c] ss:$28 sps:$4 sm:$0xff]   ;;  %v3845_v56 = vld [vmem:[#allocation8 + $0x354] ss:$28 sps:$4 sm:$0xff]  }
 0x256   :  { %2673 = vmatprep.subr.bf16.mxu0 %v3758_v43  ;;  %2755 = vmatprep.subr.bf16.mxu1 %v3761_v58  ;;  %v3843_v43 = vld [vmem:[#allocation8 + $0x350] ss:$28 sps:$4 sm:$0xff]   ;;  %v3848_v58 = vld [vmem:[#allocation8 + $0x384] ss:$28 sps:$4 sm:$0xff]  }
 0x259   :  { %2674 = vmatpush1.bf16.msra.mxu0 %v3756_v59  ;;  %2756 = vmatpush1.bf16.msra.mxu1 %v3759_v60  ;;  %v3851_v59 = vld [vmem:[#allocation8 + $0x38c] ss:$28 sps:$4 sm:$0xff]   ;;  %v4396_v60 = vld [vmem:[%s4480_s4] sm:$0xf] }
 0x25a   :  { %2675 = vmatprep.subr.bf16.mxu0 %v3764_v61  ;;  %2757 = vmatprep.subr.bf16.mxu1 %v3767_v62  ;;  %v397_v61 = vrot.slane %v4396_v60, %v4366_v22  ;;  %v401_v62 = vrot.slane %v4396_v60, %v4374_v24 }
 0x25d   :  { %2676 = vmatpush1.bf16.msra.mxu0 %v3762_v63  ;;  %2758 = vmatpush1.bf16.msra.mxu1 %v3765_v0  ;;  %v409_v63 = vrot.slane %v4396_v60, %v4381_v32 }
 0x25e   :  { %2677 = vmatprep.subr.bf16.mxu0 %v3770_v1  ;;  %2759 = vmatprep.subr.bf16.mxu1 %v3773_v2 }
 0x261   :  { %2678 = vmatpush1.bf16.msra.mxu0 %v3768_v3  ;;  %2760 = vmatpush1.bf16.msra.mxu1 %v3771_v4 }
 0x262   :  { %2679 = vmatprep.subr.bf16.mxu0 %v3776_v5  ;;  %2761 = vmatprep.subr.bf16.mxu1 %v3779_v6 }
 0x265   :  { %2680 = vmatpush1.bf16.msra.mxu0 %v3774_v7  ;;  %2762 = vmatpush1.bf16.msra.mxu1 %v3777_v8 }
 0x266   :  { %2681 = vmatprep.subr.bf16.mxu0 %v3782_v9  ;;  %2763 = vmatprep.subr.bf16.mxu1 %v3785_v10 }
 0x269   :  { %2682 = vmatpush1.bf16.msra.mxu0 %v3780_v11  ;;  %2764 = vmatpush1.bf16.msra.mxu1 %v3783_v12 }
 0x26a   :  { %2683 = vmatprep.subr.bf16.mxu0 %v3788_v13  ;;  %2765 = vmatprep.subr.bf16.mxu1 %v3791_v14 }
 0x26d   :  { %2684 = vmatpush1.bf16.msra.mxu0 %v3786_v15  ;;  %2766 = vmatpush1.bf16.msra.mxu1 %v3789_v16  ;;  %v3846_v15 = vld [vmem:[#allocation8 + $0x380] ss:$28 sps:$4 sm:$0xff]   ;;  %v3849_v16 = vld [vmem:[#allocation8 + $0x388] ss:$28 sps:$4 sm:$0xff]  }
 0x26e   :  { %2685 = vmatprep.subr.bf16.mxu0 %v3794_v17  ;;  %2767 = vmatprep.subr.bf16.mxu1 %v3797_v18  ;;  %v3854_v18 = vld [vmem:[#allocation8 + $0x3bc] ss:$28 sps:$4 sm:$0xff]  }
 0x271   :  { %2686 = vmatpush1.bf16.msra.mxu0 %v3792_v19  ;;  %2768 = vmatpush1.bf16.msra.mxu1 %v3795_v20  ;;  %v3857_v19 = vld [vmem:[#allocation8 + $0x3c4] ss:$28 sps:$4 sm:$0xff]  }
 0x272   :  { %2687 = vmatprep.subr.bf16.mxu0 %v3800_v25  ;;  %2769 = vmatprep.subr.bf16.mxu1 %v3803_v26  ;;  %v3852_v25 = vld [vmem:[#allocation8 + $0x3b8] ss:$28 sps:$4 sm:$0xff]   ;;  %v3855_v26 = vld [vmem:[#allocation8 + $0x3c0] ss:$28 sps:$4 sm:$0xff]  }
 0x275   :  { %2688 = vmatpush1.bf16.msra.mxu0 %v3798_v27  ;;  %2770 = vmatpush1.bf16.msra.mxu1 %v3801_v28  ;;  %v3860_v27 = vld [vmem:[#allocation8 + $0x3f4] ss:$28 sps:$4 sm:$0xff]   ;;  %v3863_v28 = vld [vmem:[#allocation8 + $0x3fc] ss:$28 sps:$4 sm:$0xff]  }
 0x276   :  { %2689 = vmatprep.subr.bf16.mxu0 %v3806_v29  ;;  %2771 = vmatprep.subr.bf16.mxu1 %v3809_v30  ;;  %v3858_v29 = vld [vmem:[#allocation8 + $0x3f0] ss:$28 sps:$4 sm:$0xff]   ;;  %v3861_v30 = vld [vmem:[#allocation8 + $0x3f8] ss:$28 sps:$4 sm:$0xff]  }
 0x279   :  { %2690 = vmatpush1.bf16.msra.mxu0 %v3804_v31  ;;  %2772 = vmatpush1.bf16.msra.mxu1 %v3807_v33  ;;  %v3866_v31 = vld [vmem:[#allocation8 + $0x42c] ss:$28 sps:$4 sm:$0xff]   ;;  %v3869_v33 = vld [vmem:[#allocation8 + $0x434] ss:$28 sps:$4 sm:$0xff]  }
 0x27a   :  { %2691 = vmatprep.subr.bf16.mxu0 %v3812_v34  ;;  %2773 = vmatprep.subr.bf16.mxu1 %v3815_v35  ;;  %v3864_v34 = vld [vmem:[#allocation8 + $0x428] ss:$28 sps:$4 sm:$0xff]   ;;  %v3867_v35 = vld [vmem:[#allocation8 + $0x430] ss:$28 sps:$4 sm:$0xff]  }
 0x27d   :  { %2692 = vmatpush1.bf16.msra.mxu0 %v3810_v36  ;;  %2774 = vmatpush1.bf16.msra.mxu1 %v3813_v38  ;;  %v3872_v36 = vld [vmem:[#allocation8 + $0x464] ss:$28 sps:$4 sm:$0xff]   ;;  %v3875_v38 = vld [vmem:[#allocation8 + $0x46c] ss:$28 sps:$4 sm:$0xff]  }
 0x27e   :  { %2693 = vmatprep.subr.bf16.mxu0 %v3818_v39  ;;  %2775 = vmatprep.subr.bf16.mxu1 %v3821_v40  ;;  %v3870_v39 = vld [vmem:[#allocation8 + $0x460] ss:$28 sps:$4 sm:$0xff]   ;;  %v3873_v40 = vld [vmem:[#allocation8 + $0x468] ss:$28 sps:$4 sm:$0xff]  }
 0x281   :  { %2694 = vmatpush1.bf16.msra.mxu0 %v3816_v41  ;;  %2776 = vmatpush1.bf16.msra.mxu1 %v3819_v42  ;;  %v3878_v41 = vld [vmem:[#allocation8 + $0x49c] ss:$28 sps:$4 sm:$0xff]   ;;  %v3881_v42 = vld [vmem:[#allocation8 + $0x4a4] ss:$28 sps:$4 sm:$0xff]  }
 0x282   :  { %2695 = vmatprep.subr.bf16.mxu0 %v3824_v44  ;;  %2777 = vmatprep.subr.bf16.mxu1 %v3827_v45  ;;  %v3876_v44 = vld [vmem:[#allocation8 + $0x498] ss:$28 sps:$4 sm:$0xff]   ;;  %v3879_v45 = vld [vmem:[#allocation8 + $0x4a0] ss:$28 sps:$4 sm:$0xff]  }
 0x285   :  { %2696 = vmatpush1.bf16.msra.mxu0 %v3822_v46  ;;  %2778 = vmatpush1.bf16.msra.mxu1 %v3825_v47  ;;  %v3884_v46 = vld [vmem:[#allocation8 + $0x4d4] ss:$28 sps:$4 sm:$0xff]   ;;  %v3887_v47 = vld [vmem:[#allocation8 + $0x4dc] ss:$28 sps:$4 sm:$0xff]  }
 0x286   :  { %2697 = vmatprep.subr.bf16.mxu0 %v3830_v48  ;;  %2779 = vmatprep.subr.bf16.mxu1 %v3833_v49  ;;  %v3882_v48 = vld [vmem:[#allocation8 + $0x4d0] ss:$28 sps:$4 sm:$0xff]   ;;  %v3885_v49 = vld [vmem:[#allocation8 + $0x4d8] ss:$28 sps:$4 sm:$0xff]  }
 0x289   :  { %2698 = vmatpush1.bf16.msra.mxu0 %v3828_v50  ;;  %2780 = vmatpush1.bf16.msra.mxu1 %v3831_v51  ;;  %v3890_v50 = vld [vmem:[#allocation8 + $0x50c] ss:$28 sps:$4 sm:$0xff]   ;;  %v3893_v51 = vld [vmem:[#allocation8 + $0x514] ss:$28 sps:$4 sm:$0xff]  }
 0x28a   :  { %2699 = vmatprep.subr.bf16.mxu0 %v3836_v52  ;;  %2781 = vmatprep.subr.bf16.mxu1 %v3839_v53  ;;  %v3888_v52 = vld [vmem:[#allocation8 + $0x508] ss:$28 sps:$4 sm:$0xff]   ;;  %v3891_v53 = vld [vmem:[#allocation8 + $0x510] ss:$28 sps:$4 sm:$0xff]  }
 0x28d   :  { %2700 = vmatpush1.bf16.msra.mxu0 %v3834_v23  ;;  %2782 = vmatpush1.bf16.msra.mxu1 %v3837_v54  ;;  %v3896_v23 = vld [vmem:[#allocation8 + $0x544] ss:$28 sps:$4 sm:$0xff]   ;;  %v3899_v54 = vld [vmem:[#allocation8 + $0x54c] ss:$28 sps:$4 sm:$0xff]  }
 0x28e   :  { %2701 = vmatprep.subr.bf16.mxu0 %v3842_v55  ;;  %2783 = vmatprep.subr.bf16.mxu1 %v3845_v56  ;;  %v3894_v55 = vld [vmem:[#allocation8 + $0x540] ss:$28 sps:$4 sm:$0xff]   ;;  %v3897_v56 = vld [vmem:[#allocation8 + $0x548] ss:$28 sps:$4 sm:$0xff]  }
 0x291   :  { %2702 = vmatpush1.bf16.msra.mxu0 %v3840_v57  ;;  %2784 = vmatpush1.bf16.msra.mxu1 %v3843_v43  ;;  %v3902_v57 = vld [vmem:[#allocation8 + $0x57c] ss:$28 sps:$4 sm:$0xff]   ;;  %v3905_v43 = vld [vmem:[#allocation8 + $0x584] ss:$28 sps:$4 sm:$0xff]  }
 0x292   :  { %2712 = vmatprep.subr.bf16.mxu0 %v3848_v58  ;;  %2794 = vmatprep.subr.bf16.mxu1 %v3851_v59  ;;  %v3900_v58 = vld [vmem:[#allocation8 + $0x578] ss:$28 sps:$4 sm:$0xff]   ;;  %v3903_v59 = vld [vmem:[#allocation8 + $0x580] ss:$28 sps:$4 sm:$0xff]  }
 0x327   :  { %v1129_v0 = vpop.f32.mrb[0].mxu0  ;;  %v4404_v1 = vpop.f32.mrb[8].mxu1 }
 0x328   :  { %v3504_v2 = vadd.f32 %v1129_v0, %v397_v61  ;;  %v1131_v3 = vpop.f32.mrb[1].mxu0  ;;  %v1213_v4 = vpop.f32.mrb[9].mxu1  ;;  %v3908_v61 = vld [vmem:[#allocation8 + $0x5b4] ss:$28 sps:$4 sm:$0xff]  }
 0x329   :  { %v3505_v5 = vadd.f32 %v1131_v3, %v401_v62  ;;  %v3507_v6 = vadd.f32 %v1213_v4, %v409_v63  ;;  %v1133_v7 = vpop.f32.mrb[2].mxu0  ;;  %v1215_v8 = vpop.f32.mrb[10].mxu1  ;;  %v3911_v62 = vld [vmem:[#allocation8 + $0x5bc] ss:$28 sps:$4 sm:$0xff]   ;;  %v3906_v63 = vld [vmem:[#allocation8 + $0x5b0] ss:$28 sps:$4 sm:$0xff]  }
 0x32a   :  { %v1218_v9 = vmax.f32 %v3504_v2, 0.0  ;;  %v1134_v10 = vpop.f32.mrb[3].mxu0  ;;  %v1216_v11 = vpop.f32.mrb[11].mxu1  ;;  %v3909_v0 = vld [vmem:[#allocation8 + $0x5b8] ss:$28 sps:$4 sm:$0xff]  }
 0x32b   :  { %v1219_v12 = vmax.f32 %v3505_v5, 0.0  ;;  %v1221_v13 = vmax.f32 %v3507_v6, 0.0  ;;  %v3914_v2 = vld [vmem:[#allocation8 + $0x5ec] ss:$28 sps:$4 sm:$0xff]   ;;  %v3917_v3 = vld [vmem:[#allocation8 + $0x5f4] ss:$28 sps:$4 sm:$0xff]  }
 0x32c   :  { %v4408_v17 = vpack.c.bf16 %v1218_v9, %v1218_v9  ;;  %v3912_v4 = vld [vmem:[#allocation8 + $0x5e8] ss:$28 sps:$4 sm:$0xff]   ;;  %v3915_v5 = vld [vmem:[#allocation8 + $0x5f0] ss:$28 sps:$4 sm:$0xff]   ;;  %v3918_v8 = vld [vmem:[#allocation8 + $0x620] ss:$28 sps:$4 sm:$0xff]  }
 0x32d   :  { %v4406_v14 = vpack.c.bf16 %v1219_v12, %v1219_v12  ;;  %v4412_v20 = vpack.c.bf16 %v1221_v13, %v1221_v13  ;;  %v3920_v6 = vld [vmem:[#allocation8 + $0x624] ss:$28 sps:$4 sm:$0xff]   ;;  %v3923_v7 = vld [vmem:[#allocation8 + $0x62c] ss:$28 sps:$4 sm:$0xff]   ;;  %v3926_v10 = vld [vmem:[#allocation8 + $0x65c] ss:$28 sps:$4 sm:$0xff]  }
 0x32e   :  { %v3921_v9 = vld [vmem:[#allocation8 + $0x628] ss:$28 sps:$4 sm:$0xff]   ;;  %v3924_v12 = vld [vmem:[#allocation8 + $0x658] ss:$28 sps:$4 sm:$0xff]   ;;  %v3927_v13 = vld [vmem:[#allocation8 + $0x660] ss:$28 sps:$4 sm:$0xff]  }
 0x32f   :  { %2703 = vmatprep.mubr.bf16.mxu0 %v4406_v14  ;;  %2785 = vmatprep.mubr.bf16.mxu1 %v4406_v14  ;;  %v3929_v11 = vld [vmem:[#allocation8 + $0x664] ss:$28 sps:$4 sm:$0xff]  }
 0x330   :  { %2704 = vmatmul.mubr.bf16.vlgmr.msra.gmra.mrb[4].mxu0 %v4408_v17  ;;  %2786 = vmatmul.mubr.bf16.vlgmr.msra.gmra.mrb[12].mxu1 %v4408_v17 }
 0x331   :  { %2713 = vmatpush1.bf16.msra.mxu0 %v3846_v15  ;;  %2795 = vmatpush1.bf16.msra.mxu1 %v3849_v16  ;;  %v405_v15 = vrot.slane %v4396_v60, %v4388_v37  ;;  %v3932_v16 = vld [vmem:[#allocation8 + $0x694] ss:$28 sps:$4 sm:$0xff]  }
 0x332   :  { %2744 = vmatprep.mubr.bf16.mxu0 %v4412_v20  ;;  %2826 = vmatprep.mubr.bf16.mxu1 %v4412_v20  ;;  %v3944_v60 = vld [vmem:[#allocation8 + $0x14] ss:$28 sps:$4 sm:$0xff]  }
 0x333   :  { %2714 = vmatprep.subr.bf16.mxu0 %v3854_v18  ;;  %2796 = vmatprep.subr.bf16.mxu1 %v3857_v19  ;;  %v3935_v18 = vld [vmem:[#allocation8 + $0x69c] ss:$28 sps:$4 sm:$0xff]   ;;  %v3930_v19 = vld [vmem:[#allocation8 + $0x690] ss:$28 sps:$4 sm:$0xff]  }
 0x335   :  { %2715 = vmatpush1.bf16.msra.mxu0 %v3852_v25  ;;  %2797 = vmatpush1.bf16.msra.mxu1 %v3855_v26  ;;  %v3933_v25 = vld [vmem:[#allocation8 + $0x698] ss:$28 sps:$4 sm:$0xff]   ;;  %v3506_v26 = vadd.f32 %v4404_v1, %v405_v15  ;;  %v4000_v15 = vld [vmem:[#allocation8 + $0x600] ss:$28 sps:$4 sm:$0xff]  }
 0x336   :  { %2716 = vmatprep.subr.bf16.mxu0 %v3860_v27  ;;  %2798 = vmatprep.subr.bf16.mxu1 %v3863_v28  ;;  %v3938_v27 = vld [vmem:[#allocation8 + $0x6cc] ss:$28 sps:$4 sm:$0xff]   ;;  %v3941_v28 = vld [vmem:[#allocation8 + $0x6d4] ss:$28 sps:$4 sm:$0xff]  }
 0x337   :  { %v3946_v1 = vld [vmem:[#allocation8 + $0x18] ss:$28 sps:$4 sm:$0xff]  }
 0x339   :  { %2717 = vmatpush1.bf16.msra.mxu0 %v3858_v29  ;;  %2799 = vmatpush1.bf16.msra.mxu1 %v3861_v30  ;;  %v3936_v29 = vld [vmem:[#allocation8 + $0x6c8] ss:$28 sps:$4 sm:$0xff]   ;;  %v3939_v30 = vld [vmem:[#allocation8 + $0x6d0] ss:$28 sps:$4 sm:$0xff]  }
 0x33a   :  { %2718 = vmatprep.subr.bf16.mxu0 %v3866_v31  ;;  %2800 = vmatprep.subr.bf16.mxu1 %v3869_v33  ;;  %v1220_v31 = vmax.f32 %v3506_v26, 0.0  ;;  %v3945_v33 = vld [vmem:[#allocation8 + $0x1d8] ss:$28 sps:$4 sm:$0xff]   ;;  %v4002_v26 = vld [vmem:[#allocation8 + $0x2b0] ss:$28 sps:$4 sm:$0xff]  }
 0x33d   :  { %2719 = vmatpush1.bf16.msra.mxu0 %v3864_v34  ;;  %2801 = vmatpush1.bf16.msra.mxu1 %v3867_v35  ;;  %v3942_v34 = vld [vmem:[#allocation8 + $0x10] ss:$28 sps:$4 sm:$0xff]   ;;  %v4421_v35 = vpack.c.bf16 %v1220_v31, %v1220_v31 }
 0x33e   :  { %2720 = vmatprep.subr.bf16.mxu0 %v3872_v36  ;;  %2802 = vmatprep.subr.bf16.mxu1 %v3875_v38  ;;  %v3949_v36 = vld [vmem:[#allocation8 + $0x4c] ss:$28 sps:$4 sm:$0xff]  }
 0x33f   :  { %v3950_v38 = vld [vmem:[#allocation8 + $0x210] ss:$28 sps:$4 sm:$0xff]  }
 0x340   :  { %v4011_v31 = vld [vmem:[#allocation8 + $0x4b0] ss:$28 sps:$4 sm:$0xff]  }
 0x341   :  { %2721 = vmatpush1.bf16.msra.mxu0 %v3870_v39  ;;  %2803 = vmatpush1.bf16.msra.mxu1 %v3873_v40  ;;  %v3947_v39 = vld [vmem:[#allocation8 + $0x48] ss:$28 sps:$4 sm:$0xff]   ;;  %v3951_v40 = vld [vmem:[#allocation8 + $0x50] ss:$28 sps:$4 sm:$0xff]  }
 0x342   :  { %2722 = vmatprep.subr.bf16.mxu0 %v3878_v41  ;;  %2804 = vmatprep.subr.bf16.mxu1 %v3881_v42  ;;  %v3954_v41 = vld [vmem:[#allocation8 + $0x84] ss:$28 sps:$4 sm:$0xff]  }
 0x343   :  { %v3955_v42 = vld [vmem:[#allocation8 + $0x248] ss:$28 sps:$4 sm:$0xff]  }
 0x345   :  { %2723 = vmatpush1.bf16.msra.mxu0 %v3876_v44  ;;  %2805 = vmatpush1.bf16.msra.mxu1 %v3879_v45  ;;  %v3952_v44 = vld [vmem:[#allocation8 + $0x80] ss:$28 sps:$4 sm:$0xff]   ;;  %v3956_v45 = vld [vmem:[#allocation8 + $0x88] ss:$28 sps:$4 sm:$0xff]  }
 0x346   :  { %2724 = vmatprep.subr.bf16.mxu0 %v3884_v46  ;;  %2806 = vmatprep.subr.bf16.mxu1 %v3887_v47  ;;  %v3959_v46 = vld [vmem:[#allocation8 + $0xbc] ss:$28 sps:$4 sm:$0xff]  }
 0x347   :  { %v3960_v47 = vld [vmem:[#allocation8 + $0x280] ss:$28 sps:$4 sm:$0xff]  }
 0x349   :  { %2725 = vmatpush1.bf16.msra.mxu0 %v3882_v48  ;;  %2807 = vmatpush1.bf16.msra.mxu1 %v3885_v49  ;;  %v3957_v48 = vld [vmem:[#allocation8 + $0xb8] ss:$28 sps:$4 sm:$0xff]   ;;  %v3961_v49 = vld [vmem:[#allocation8 + $0xc0] ss:$28 sps:$4 sm:$0xff]  }
 0x34a   :  { %2726 = vmatprep.subr.bf16.mxu0 %v3890_v50  ;;  %2808 = vmatprep.subr.bf16.mxu1 %v3893_v51  ;;  %v3964_v50 = vld [vmem:[#allocation8 + $0xf4] ss:$28 sps:$4 sm:$0xff]  }
 0x34b   :  { %v3962_v51 = vld [vmem:[#allocation8 + $0xf0] ss:$28 sps:$4 sm:$0xff]  }
 0x34d   :  { %2727 = vmatpush1.bf16.msra.mxu0 %v3888_v52  ;;  %2809 = vmatpush1.bf16.msra.mxu1 %v3891_v53  ;;  %v3966_v52 = vld [vmem:[#allocation8 + $0xf8] ss:$28 sps:$4 sm:$0xff]   ;;  %v3969_v53 = vld [vmem:[#allocation8 + $0x12c] ss:$28 sps:$4 sm:$0xff]  }
 0x34e   :  { %2728 = vmatprep.subr.bf16.mxu0 %v3896_v23  ;;  %2810 = vmatprep.subr.bf16.mxu1 %v3899_v54  ;;  %v3970_v23 = vld [vmem:[#allocation8 + $0x2f0] ss:$28 sps:$4 sm:$0xff]   ;;  %v3967_v54 = vld [vmem:[#allocation8 + $0x128] ss:$28 sps:$4 sm:$0xff]  }
 0x351   :  { %2729 = vmatpush1.bf16.msra.mxu0 %v3894_v55  ;;  %2811 = vmatpush1.bf16.msra.mxu1 %v3897_v56  ;;  %v3971_v55 = vld [vmem:[#allocation8 + $0x130] ss:$28 sps:$4 sm:$0xff]   ;;  %v3974_v56 = vld [vmem:[#allocation8 + $0x164] ss:$28 sps:$4 sm:$0xff]  }
 0x352   :  { %2730 = vmatprep.subr.bf16.mxu0 %v3902_v57  ;;  %2812 = vmatprep.subr.bf16.mxu1 %v3905_v43  ;;  %v3975_v57 = vld [vmem:[#allocation8 + $0x328] ss:$28 sps:$4 sm:$0xff]   ;;  %v3972_v43 = vld [vmem:[#allocation8 + $0x160] ss:$28 sps:$4 sm:$0xff]  }
 0x355   :  { %2731 = vmatpush1.bf16.msra.mxu0 %v3900_v58  ;;  %2813 = vmatpush1.bf16.msra.mxu1 %v3903_v59  ;;  %v3976_v58 = vld [vmem:[#allocation8 + $0x168] ss:$28 sps:$4 sm:$0xff]   ;;  %v3979_v59 = vld [vmem:[#allocation8 + $0x19c] ss:$28 sps:$4 sm:$0xff]  }
 0x356   :  { %2732 = vmatprep.subr.bf16.mxu0 %v3908_v61  ;;  %2814 = vmatprep.subr.bf16.mxu1 %v3911_v62  ;;  %v3980_v61 = vld [vmem:[#allocation8 + $0x360] ss:$28 sps:$4 sm:$0xff]   ;;  %v3977_v62 = vld [vmem:[#allocation8 + $0x198] ss:$28 sps:$4 sm:$0xff]  }
 0x359   :  { %2733 = vmatpush1.bf16.msra.mxu0 %v3906_v63  ;;  %2815 = vmatpush1.bf16.msra.mxu1 %v3909_v0  ;;  %v3981_v63 = vld [vmem:[#allocation8 + $0x1a0] ss:$28 sps:$4 sm:$0xff]   ;;  %v3984_v0 = vld [vmem:[#allocation8 + $0x1d4] ss:$28 sps:$4 sm:$0xff]  }
 0x35a   :  { %2734 = vmatprep.subr.bf16.mxu0 %v3914_v2  ;;  %2816 = vmatprep.subr.bf16.mxu1 %v3917_v3  ;;  %v3985_v2 = vld [vmem:[#allocation8 + $0x558] ss:$28 sps:$4 sm:$0xff]   ;;  %v3982_v3 = vld [vmem:[#allocation8 + $0x1d0] ss:$28 sps:$4 sm:$0xff]  }
 0x35d   :  { %2735 = vmatpush1.bf16.msra.mxu0 %v3912_v4  ;;  %2817 = vmatpush1.bf16.msra.mxu1 %v3915_v5  ;;  %v3986_v4 = vld [vmem:[#allocation8 + $0x398] ss:$28 sps:$4 sm:$0xff]   ;;  %v3989_v5 = vld [vmem:[#allocation8 + $0x20c] ss:$28 sps:$4 sm:$0xff]  }
 0x35e   :  { %2736 = vmatprep.subr.bf16.mxu0 %v3920_v6  ;;  %2818 = vmatprep.subr.bf16.mxu1 %v3923_v7  ;;  %v3990_v6 = vld [vmem:[#allocation8 + $0x590] ss:$28 sps:$4 sm:$0xff]   ;;  %v3987_v7 = vld [vmem:[#allocation8 + $0x208] ss:$28 sps:$4 sm:$0xff]  }
 0x361   :  { %2737 = vmatpush1.bf16.msra.mxu0 %v3918_v8  ;;  %2819 = vmatpush1.bf16.msra.mxu1 %v3921_v9  ;;  %v3991_v8 = vld [vmem:[#allocation8 + $0x3d0] ss:$28 sps:$4 sm:$0xff]   ;;  %v3994_v9 = vld [vmem:[#allocation8 + $0x244] ss:$28 sps:$4 sm:$0xff]  }
 0x362   :  { %2738 = vmatprep.subr.bf16.mxu0 %v3926_v10  ;;  %2820 = vmatprep.subr.bf16.mxu1 %v3929_v11  ;;  %v3995_v10 = vld [vmem:[#allocation8 + $0x5c8] ss:$28 sps:$4 sm:$0xff]   ;;  %v3992_v11 = vld [vmem:[#allocation8 + $0x240] ss:$28 sps:$4 sm:$0xff]  }
 0x365   :  { %2739 = vmatpush1.bf16.msra.mxu0 %v3924_v12  ;;  %2821 = vmatpush1.bf16.msra.mxu1 %v3927_v13  ;;  %v3996_v12 = vld [vmem:[#allocation8 + $0x408] ss:$28 sps:$4 sm:$0xff]   ;;  %v3999_v13 = vld [vmem:[#allocation8 + $0x27c] ss:$28 sps:$4 sm:$0xff]  }
 0x366   :  { %2740 = vmatprep.subr.bf16.mxu0 %v3932_v16  ;;  %2822 = vmatprep.subr.bf16.mxu1 %v3935_v18  ;;  %v3997_v16 = vld [vmem:[#allocation8 + $0x278] ss:$28 sps:$4 sm:$0xff]   ;;  %v4001_v18 = vld [vmem:[#allocation8 + $0x440] ss:$28 sps:$4 sm:$0xff]  }
 0x369   :  { %2741 = vmatpush1.bf16.msra.mxu0 %v3930_v19  ;;  %2823 = vmatpush1.bf16.msra.mxu1 %v3933_v25  ;;  %v4004_v19 = vld [vmem:[#allocation8 + $0x2b4] ss:$28 sps:$4 sm:$0xff]  }
 0x36a   :  { %2742 = vmatprep.subr.bf16.mxu0 %v3938_v27  ;;  %2824 = vmatprep.subr.bf16.mxu1 %v3941_v28  ;;  %v4005_v25 = vld [vmem:[#allocation8 + $0x638] ss:$28 sps:$4 sm:$0xff]   ;;  %v4009_v28 = vld [vmem:[#allocation8 + $0x2ec] ss:$28 sps:$4 sm:$0xff]  }
 0x36b   :  { %v4006_v27 = vld [vmem:[#allocation8 + $0x478] ss:$28 sps:$4 sm:$0xff]  }
 0x36d   :  { %2743 = vmatpush1.bf16.msra.mxu0 %v3936_v29  ;;  %2825 = vmatpush1.bf16.msra.mxu1 %v3939_v30  ;;  %v4010_v29 = vld [vmem:[#allocation8 + $0x670] ss:$28 sps:$4 sm:$0xff]   ;;  %v4007_v30 = vld [vmem:[#allocation8 + $0x2e8] ss:$28 sps:$4 sm:$0xff]  }
 0x36e   :  { %2835 = vmatprep.subr.bf16.mxu0 %v3944_v60  ;;  %3460 = vmatprep.subr.bf16.mxu1 %v3945_v33  ;;  %v4014_v60 = vld [vmem:[#allocation8 + $0x324] ss:$28 sps:$4 sm:$0xff]  }
 0x36f   :  { %v4015_v33 = vld [vmem:[#allocation8 + $0x6a8] ss:$28 sps:$4 sm:$0xff]  }
 0x370   :  { %2745 = vmatmul.mubr.bf16.vlgmr.msra.gmra.mrb[4].mxu0 %v4421_v35  ;;  %2827 = vmatmul.mubr.bf16.vlgmr.msra.gmra.mrb[12].mxu1 %v4421_v35 }
 0x371   :  { %2836 = vmatpush1.bf16.msra.mxu0 %v3942_v34  ;;  %2867 = vmatprep.mubr.bf16.mxu0 %v4406_v14  ;;  %v4012_v34 = vld [vmem:[#allocation8 + $0x320] ss:$28 sps:$4 sm:$0xff]  }
 0x372   :  { %3461 = vmatpush3.bf16.msra.mxu1 %v3946_v1  ;;  %2949 = vmatprep.mubr.bf16.mxu1 %v4406_v14  ;;  %v3965_v14 = vld [vmem:[#allocation8 + $0x2b8] ss:$28 sps:$4 sm:$0xff]   ;;  %v4016_v1 = vld [vmem:[#allocation8 + $0x4e8] ss:$28 sps:$4 sm:$0xff]  }
 0x373   :  { %2837 = vmatprep.subr.bf16.mxu0 %v3949_v36  ;;  %3462 = vmatprep.subr.bf16.mxu1 %v3950_v38  ;;  %v4019_v36 = vld [vmem:[#allocation8 + $0x35c] ss:$28 sps:$4 sm:$0xff]  }
 0x374   :  { %v4020_v38 = vld [vmem:[#allocation8 + $0x6e0] ss:$28 sps:$4 sm:$0xff]  }
 0x375   :  { %2838 = vmatpush1.bf16.msra.mxu0 %v3947_v39  ;;  %v4017_v39 = vld [vmem:[#allocation8 + $0x358] ss:$28 sps:$4 sm:$0xff]  }
 0x376   :  { %3463 = vmatpush3.bf16.msra.mxu1 %v3951_v40  ;;  %2839 = vmatprep.subr.bf16.mxu0 %v3954_v41  ;;  %v4021_v40 = vld [vmem:[#allocation8 + $0x520] ss:$28 sps:$4 sm:$0xff]   ;;  %v4024_v41 = vld [vmem:[#allocation8 + $0x394] ss:$28 sps:$4 sm:$0xff]  }
 0x377   :  { %3464 = vmatprep.subr.bf16.mxu1 %v3955_v42  ;;  %v4022_v42 = vld [vmem:[#allocation8 + $0x390] ss:$28 sps:$4 sm:$0xff]  }
 0x379   :  { %2840 = vmatpush1.bf16.msra.mxu0 %v3952_v44  ;;  %v4027_v44 = vld [vmem:[#allocation8 + $0x3cc] ss:$28 sps:$4 sm:$0xff]  }
 0x37a   :  { %3465 = vmatpush3.bf16.msra.mxu1 %v3956_v45  ;;  %2841 = vmatprep.subr.bf16.mxu0 %v3959_v46  ;;  %v4025_v45 = vld [vmem:[#allocation8 + $0x3c8] ss:$28 sps:$4 sm:$0xff]  }
 0x37b   :  { %3466 = vmatprep.subr.bf16.mxu1 %v3960_v47  ;;  %v4030_v46 = vld [vmem:[#allocation8 + $0x404] ss:$28 sps:$4 sm:$0xff]  }
 0x37c   :  { %v4028_v47 = vld [vmem:[#allocation8 + $0x400] ss:$28 sps:$4 sm:$0xff]  }
 0x37d   :  { %2842 = vmatpush1.bf16.msra.mxu0 %v3957_v48  ;;  %v4033_v48 = vld [vmem:[#allocation8 + $0x43c] ss:$28 sps:$4 sm:$0xff]  }
 0x37e   :  { %3467 = vmatpush3.bf16.msra.mxu1 %v3961_v49  ;;  %2843 = vmatprep.subr.bf16.mxu0 %v3964_v50  ;;  %v4031_v49 = vld [vmem:[#allocation8 + $0x438] ss:$28 sps:$4 sm:$0xff]  }
 0x37f   :  { %3468 = vmatprep.subr.bf16.mxu1 %v3965_v14  ;;  %v4036_v50 = vld [vmem:[#allocation8 + $0x474] ss:$28 sps:$4 sm:$0xff]  }
 0x380   :  { %v4034_v14 = vld [vmem:[#allocation8 + $0x470] ss:$28 sps:$4 sm:$0xff]  }
 0x381   :  { %2844 = vmatpush1.bf16.msra.mxu0 %v3962_v51  ;;  %v4037_v51 = vld [vmem:[#allocation8 + $0x4a8] ss:$28 sps:$4 sm:$0xff]  }
 0x382   :  { %3469 = vmatpush3.bf16.msra.mxu1 %v3966_v52  ;;  %2845 = vmatprep.subr.bf16.mxu0 %v3969_v53  ;;  %v4042_v52 = vld [vmem:[#allocation8 + $0x4e4] ss:$28 sps:$4 sm:$0xff]   ;;  %v4045_v53 = vld [vmem:[#allocation8 + $0x51c] ss:$28 sps:$4 sm:$0xff]  }
 0x383   :  { %3470 = vmatprep.subr.bf16.mxu1 %v3970_v23  ;;  %v4043_v23 = vld [vmem:[#allocation8 + $0x518] ss:$28 sps:$4 sm:$0xff]  }
 0x385   :  { %2846 = vmatpush1.bf16.msra.mxu0 %v3967_v54  ;;  %v4048_v54 = vld [vmem:[#allocation8 + $0x554] ss:$28 sps:$4 sm:$0xff]  }
 0x386   :  { %3471 = vmatpush3.bf16.msra.mxu1 %v3971_v55  ;;  %2847 = vmatprep.subr.bf16.mxu0 %v3974_v56  ;;  %v4046_v55 = vld [vmem:[#allocation8 + $0x550] ss:$28 sps:$4 sm:$0xff]  }
 0x387   :  { %3472 = vmatprep.subr.bf16.mxu1 %v3975_v57  ;;  %v4051_v56 = vld [vmem:[#allocation8 + $0x58c] ss:$28 sps:$4 sm:$0xff]  }
 0x388   :  { %v4049_v57 = vld [vmem:[#allocation8 + $0x588] ss:$28 sps:$4 sm:$0xff]  }
 0x389   :  { %2848 = vmatpush1.bf16.msra.mxu0 %v3972_v43  ;;  %v4054_v43 = vld [vmem:[#allocation8 + $0x5c4] ss:$28 sps:$4 sm:$0xff]  }
 0x38a   :  { %3473 = vmatpush3.bf16.msra.mxu1 %v3976_v58  ;;  %2849 = vmatprep.subr.bf16.mxu0 %v3979_v59  ;;  %v4052_v58 = vld [vmem:[#allocation8 + $0x5c0] ss:$28 sps:$4 sm:$0xff]  }
 0x38b   :  { %3474 = vmatprep.subr.bf16.mxu1 %v3980_v61  ;;  %v4057_v59 = vld [vmem:[#allocation8 + $0x5fc] ss:$28 sps:$4 sm:$0xff]  }
 0x38c   :  { %v4055_v61 = vld [vmem:[#allocation8 + $0x5f8] ss:$28 sps:$4 sm:$0xff]  }
 0x38d   :  { %2850 = vmatpush1.bf16.msra.mxu0 %v3977_v62  ;;  %v4060_v62 = vld [vmem:[#allocation8 + $0x634] ss:$28 sps:$4 sm:$0xff]  }
 0x38e   :  { %3475 = vmatpush3.bf16.msra.mxu1 %v3981_v63  ;;  %2851 = vmatprep.subr.bf16.mxu0 %v3984_v0  ;;  %v4058_v63 = vld [vmem:[#allocation8 + $0x630] ss:$28 sps:$4 sm:$0xff]  }
 0x38f   :  { %3482 = vmatprep.subr.bf16.mxu1 %v3985_v2  ;;  %v4063_v0 = vld [vmem:[#allocation8 + $0x66c] ss:$28 sps:$4 sm:$0xff]  }
 0x390   :  { %v4061_v2 = vld [vmem:[#allocation8 + $0x668] ss:$28 sps:$4 sm:$0xff]  }
 0x391   :  { %2950 = vmatmul.mubr.bf16.vlgmr.msra.gmra.mrb[16].mxu1 %v4408_v17  ;;  %2852 = vmatpush1.bf16.msra.mxu0 %v3982_v3  ;;  %v4066_v3 = vld [vmem:[#allocation8 + $0x6a4] ss:$28 sps:$4 sm:$0xff]  }
 0x392   :  { %3483 = vmatpush3.bf16.msra.mxu1 %v3986_v4  ;;  %2989 = vmatprep.mubr.bf16.mxu1 %v4412_v20  ;;  %v4064_v4 = vld [vmem:[#allocation8 + $0x6a0] ss:$28 sps:$4 sm:$0xff]  }
 0x393   :  { %2853 = vmatprep.subr.bf16.mxu0 %v3989_v5  ;;  %3484 = vmatprep.subr.bf16.mxu1 %v3990_v6  ;;  %v4069_v5 = vld [vmem:[#allocation8 + $0x6dc] ss:$28 sps:$4 sm:$0xff]  }
 0x394   :  { %v4067_v6 = vld [vmem:[#allocation8 + $0x6d8] ss:$28 sps:$4 sm:$0xff]  }
 0x395   :  { %2854 = vmatpush1.bf16.msra.mxu0 %v3987_v7  ;;  %v4436_v7 = vld [vmem:[%s4482_s6] sm:$0xff]  ;;  %s4252_s6 = smov [#allocation11]  }
 0x396   :  { %3485 = vmatpush3.bf16.msra.mxu1 %v3991_v8  ;;  %2855 = vmatprep.subr.bf16.mxu0 %v3994_v9  ;;  %v1487_v8 = vrot.slane %v4436_v7, %v4366_v22  ;;  %v1495_v9 = vrot.slane %v4436_v7, %v4388_v37  ;;  %s3076_s13 = sshll.u32 %s4252_s6, 4  ;;  %s3077_s13 = int_to_ptr.vmem [resolvable:$true] %s3076_s13 }
 0x397   :  { %3486 = vmatprep.subr.bf16.mxu1 %v3995_v10  ;;  %v1491_v10 = vrot.slane %v4436_v7, %v4374_v24  ;;  %s4188_s14 = scalar_lea.vmem %s3077_s13, 128  ;;  %p4193_p5 = scmp.lt.s32.totalorder %s3077_s13, %s3077_s13 }
 0x398   :  { %p4189_p4 = scmp.ne.s32.totalorder %s3077_s13, %s4188_s14  ;;  %p4194_p6 = scmp.lt.s32.totalorder %s4188_s14, %s4188_s14 }
 0x399   :  { %2856 = vmatpush1.bf16.msra.mxu0 %v3992_v11  ;;  %v1499_v11 = vrot.slane %v4436_v7, %v4381_v32 }
 0x39a   :  { %3487 = vmatpush3.bf16.msra.mxu1 %v3996_v12  ;;  %2857 = vmatprep.subr.bf16.mxu0 %v3999_v13  ;;  %p4195_p7 = por %p4194_p6, %p4193_p5 }
 0x39b   :  { %3488 = vmatprep.subr.bf16.mxu1 %v4000_v15 }
 0x39c   :  { %p4196_p8 = pnand %p4195_p7, %p4189_p4 }
 0x39d   :  { %2858 = vmatpush1.bf16.msra.mxu0 %v3997_v16 }
 0x39e   :  { %3489 = vmatpush3.bf16.msra.mxu1 %v4001_v18  ;;  %2859 = vmatprep.subr.bf16.mxu0 %v4004_v19 }
 0x39f   :  { %3490 = vmatprep.subr.bf16.mxu1 %v4005_v25 }
 0x3a1   :  { %2860 = vmatpush1.bf16.msra.mxu0 %v4002_v26 }
 0x3a2   :  { %3491 = vmatpush3.bf16.msra.mxu1 %v4006_v27  ;;  %2861 = vmatprep.subr.bf16.mxu0 %v4009_v28 }
 0x3a3   :  { %3492 = vmatprep.subr.bf16.mxu1 %v4010_v29 }
 0x3a5   :  { %2862 = vmatpush1.bf16.msra.mxu0 %v4007_v30 }
 0x3a6   :  { %3493 = vmatpush3.bf16.msra.mxu1 %v4011_v31  ;;  %2863 = vmatprep.subr.bf16.mxu0 %v4014_v60 }
 0x3a7   :  { %3494 = vmatprep.subr.bf16.mxu1 %v4015_v33 }
 0x3a9   :  { %2864 = vmatpush1.bf16.msra.mxu0 %v4012_v34 }
 0x3aa   :  { %3495 = vmatpush3.bf16.msra.mxu1 %v4016_v1  ;;  %2865 = vmatprep.subr.bf16.mxu0 %v4019_v36 }
 0x3ab   :  { %3496 = vmatprep.subr.bf16.mxu1 %v4020_v38 }
 0x3ad   :  { %2866 = vmatpush1.bf16.msra.mxu0 %v4017_v39 }
 0x3ae   :  { %3497 = vmatpush3.bf16.msra.mxu1 %v4021_v40  ;;  %2876 = vmatprep.subr.bf16.mxu0 %v4024_v41 }
 0x3b0   :  { %2868 = vmatmul.mubr.bf16.vlgmr.msra.gmra.mrb[8].mxu0 %v4408_v17  ;;  %v4039_v17 = vld [vmem:[#allocation8 + $0x4ac] ss:$28 sps:$4 sm:$0xff]  }
 0x3b1   :  { %2990 = vmatmul.mubr.bf16.vlgmr.msra.gmra.mrb[20].mxu1 %v4421_v35  ;;  %2877 = vmatpush1.bf16.msra.mxu0 %v4022_v42 }
 0x3b2   :  { %2908 = vmatprep.mubr.bf16.mxu0 %v4412_v20  ;;  %2878 = vmatprep.subr.bf16.mxu0 %v4027_v44  ;;  %v4040_v20 = vld [vmem:[#allocation8 + $0x4e0] ss:$28 sps:$4 sm:$0xff]  }
 0x3b5   :  { %2879 = vmatpush1.bf16.msra.mxu0 %v4025_v45 }
 0x3b6   :  { %2880 = vmatprep.subr.bf16.mxu0 %v4030_v46 }
 0x3b9   :  { %2881 = vmatpush1.bf16.msra.mxu0 %v4028_v47 }
 0x3ba   :  { %2882 = vmatprep.subr.bf16.mxu0 %v4033_v48 }
 0x3bd   :  { %2883 = vmatpush1.bf16.msra.mxu0 %v4031_v49 }
 0x3be   :  { %2884 = vmatprep.subr.bf16.mxu0 %v4036_v50 }
 0x3c1   :  { %2885 = vmatpush1.bf16.msra.mxu0 %v4034_v14 }
 0x3c2   :  { %2886 = vmatprep.subr.bf16.mxu0 %v4039_v17 }
 0x3c5   :  { %2887 = vmatpush1.bf16.msra.mxu0 %v4037_v51 }
 0x3c6   :  { %2888 = vmatprep.subr.bf16.mxu0 %v4042_v52 }
 0x3c9   :  { %2889 = vmatpush1.bf16.msra.mxu0 %v4040_v20 }
 0x3ca   :  { %2890 = vmatprep.subr.bf16.mxu0 %v4045_v53 }
 0x3cd   :  { %2891 = vmatpush1.bf16.msra.mxu0 %v4043_v23 }
 0x3ce   :  { %2892 = vmatprep.subr.bf16.mxu0 %v4048_v54 }
 0x3d1   :  { %2893 = vmatpush1.bf16.msra.mxu0 %v4046_v55 }
 0x3d2   :  { %2894 = vmatprep.subr.bf16.mxu0 %v4051_v56 }
 0x3d5   :  { %2895 = vmatpush1.bf16.msra.mxu0 %v4049_v57 }
 0x3d6   :  { %2896 = vmatprep.subr.bf16.mxu0 %v4054_v43 }
 0x3d9   :  { %2897 = vmatpush1.bf16.msra.mxu0 %v4052_v58 }
 0x3da   :  { %2898 = vmatprep.subr.bf16.mxu0 %v4057_v59 }
 0x3dd   :  { %2899 = vmatpush1.bf16.msra.mxu0 %v4055_v61 }
 0x3de   :  { %2900 = vmatprep.subr.bf16.mxu0 %v4060_v62 }
 0x3e1   :  { %2901 = vmatpush1.bf16.msra.mxu0 %v4058_v63 }
 0x3e2   :  { %2902 = vmatprep.subr.bf16.mxu0 %v4063_v0 }
 0x3e5   :  { %2903 = vmatpush1.bf16.msra.mxu0 %v4061_v2 }
 0x3e6   :  { %2904 = vmatprep.subr.bf16.mxu0 %v4066_v3 }
 0x3e9   :  { %2905 = vmatpush1.bf16.msra.mxu0 %v4064_v4 }
 0x3ea   :  { %2906 = vmatprep.subr.bf16.mxu0 %v4069_v5 }
 0x3ed   :  { %2907 = vmatpush1.bf16.msra.mxu0 %v4067_v6 }
 0x3f0   :  { %2909 = vmatmul.mubr.bf16.vlgmr.msra.gmra.mrb[8].mxu0 %v4421_v35 }
 0x443   :  { %v2746_v12 = vpop.f32.mrb[4].mxu0  ;;  %v2828_v13 = vpop.f32.mrb[12].mxu1 }
 0x444   :  { %v3508_v35 = vadd.f32 %v2746_v12, %v1487_v8  ;;  %v3510_v15 = vadd.f32 %v2828_v13, %v1495_v9  ;;  %v2748_v16 = vpop.f32.mrb[5].mxu0  ;;  %v2830_v18 = vpop.f32.mrb[13].mxu1 }
 0x445   :  { %v3509_v19 = vadd.f32 %v2748_v16, %v1491_v10  ;;  %v3511_v25 = vadd.f32 %v2830_v18, %v1499_v11  ;;  %v2750_v26 = vpop.f32.mrb[6].mxu0  ;;  %v2832_v27 = vpop.f32.mrb[14].mxu1 }
 0x446   :  { %v3453_v22 = vmul.f32 -1.442695, %v3508_v35  ;;  %v3455_v28 = vmul.f32 -1.442695, %v3510_v15  ;;  %v2751_v29 = vpop.f32.mrb[7].mxu0  ;;  %v2833_v37 = vpop.f32.mrb[15].mxu1 }
 0x447   :  { %v3454_v30 = vmul.f32 -1.442695, %v3509_v19  ;;  %v3456_v31 = vmul.f32 -1.442695, %v3511_v25 }
 0x448   :  { %4072 = vpow2.f32 %v3453_v22 }
 0x449   :  { %4074 = vpow2.f32 %v3455_v28 }
 0x44a   :  { %4076 = vpow2.f32 %v3454_v30 }
 0x44b   :  { %4078 = vpow2.f32 %v3456_v31 }
 0x452   :  { %v4073_v24 = vpop.eup %4072 }
 0x453   :  { %v4075_v32 = vpop.eup %4074  ;;  %v3018_v60 = vadd.f32 1.0, %v4073_v24 }
 0x454   :  { %v4077_v33 = vpop.eup %4076  ;;  %v3020_v34 = vadd.f32 1.0, %v4075_v32 }
 0x455   :  { %v4079_v1 = vpop.eup %4078  ;;  %4080 = vrcp.f32 %v3018_v60  ;;  %v3019_v36 = vadd.f32 1.0, %v4077_v33 }
 0x456   :  { %4082 = vrcp.f32 %v3020_v34  ;;  %v3021_v38 = vadd.f32 1.0, %v4079_v1 }
 0x457   :  { %4084 = vrcp.f32 %v3019_v36 }
 0x458   :  { %4086 = vrcp.f32 %v3021_v38 }
 0x45f   :  { %v4081_v39 = vpop.eup %4080 }
 0x460   :  { %v4083_v40 = vpop.eup %4082  ;;  %v3039_v41 = vmax.f32 %v4081_v39, 1e-06 }
 0x461   :  { %v4085_v42 = vpop.eup %4084  ;;  %v3041_v44 = vmax.f32 %v4083_v40, 1e-06 }
 0x462   :  { %v4087_v45 = vpop.eup %4086  ;;  %v3046_v46 = vmin.f32 %v3039_v41, 0.999999  ;;  %v3040_v47 = vmax.f32 %v4085_v42, 1e-06 }
 0x463   :  { %v3048_v48 = vmin.f32 %v3041_v44, 0.999999  ;;  %v3042_v49 = vmax.f32 %v4087_v45, 1e-06 }
 0x464   :  { %3053 = vst [vmem:[#allocation10] sm:$0xff] %v3046_v46  ;;  %v3047_v50 = vmin.f32 %v3040_v47, 0.999999  ;;  %v3476_v14 = vpop.f32.mrb[16].mxu1 }
 0x465   :  { %3055 = vst [vmem:[#allocation10 + $0x10] sm:$0xff] %v3048_v48  ;;  %v3049_v17 = vmin.f32 %v3042_v49, 0.999999  ;;  %v3477_v51 = vpop.f32.mrb[17].mxu1 }
 0x466   :  { %3054 = vst [vmem:[#allocation10 + $0x8] sm:$0xff] %v3047_v50  ;;  %v3478_v52 = vadd.f32 %v3477_v51, %v3476_v14  ;;  %v3479_v20 = vpop.f32.mrb[18].mxu1 }
 0x467   :  { %3056 = vst [vmem:[#allocation10 + $0x18] sm:$0xff] %v3049_v17  ;;  %v3480_v53 = vpop.f32.mrb[19].mxu1 }
 0x468   :  { %4199 = shalt.err (!%p4196_p8)
}
 0x469   :  { %s4200_s19 = scalar_lea.hbm %s4484_s8, 128 }
 0x46a   :  { %p4201_p9 = scmp.ne.s32.totalorder %s4484_s8, %s4200_s19  ;;  %p4204_p10 = scmp.lt.u32.totalorder %s4200_s19, %s4484_s8 }
 0x46c   :  { %p4206_p11 = pnand %p4204_p10, %p4201_p9 }
 0x46e   :  { %4209 = shalt.err (!%p4206_p11)
}
 0x46f   :  { %3079 = dma.vmem_to_hbm [thread:$0]  %s3077_s13, 128, %s4484_s8, [#allocation12]   ;;  %v1510_v23 = vsub.s32 6, %v4363_v21  ;;  %v1502_v5 = vsub.s32 4, %v4363_v21  ;;  %v1506_v6 = vsub.s32 5, %v4363_v21 }
 0x470   :  { %s4253_s8 = smov [#allocation10]  }
 0x471   :  { %v1511_v54 = vrot.slane %v4436_v7, %v1510_v23  ;;  %v1503_v8 = vrot.slane %v4436_v7, %v1502_v5  ;;  %v1507_v9 = vrot.slane %v4436_v7, %v1506_v6  ;;  %s3066_s26 = sshll.u32 %s4253_s8, 4  ;;  %s3067_s26 = int_to_ptr.vmem [resolvable:$true] %s3066_s26 }
 0x472   :  { %s4210_s27 = scalar_lea.vmem %s3067_s26, 896  ;;  %p4215_p13 = scmp.lt.s32.totalorder %s3067_s26, %s3067_s26 }
 0x473   :  { %v2952_v57 = vadd.f32 %v3478_v52, %v1511_v54  ;;  %p4211_p12 = scmp.ne.s32.totalorder %s3067_s26, %s4210_s27  ;;  %p4216_p0 = scmp.lt.s32.totalorder %s4210_s27, %s4210_s27 }
 0x475   :  { %p4217_p1 = por %p4216_p0, %p4215_p13 }
 0x477   :  { %p4218_p2 = pnand %p4217_p1, %p4211_p12 }
 0x484   :  { %v3498_v55 = vpop.f32.mrb[20].mxu1 }
 0x485   :  { %v3499_v56 = vpop.f32.mrb[21].mxu1 }
 0x486   :  { %v3500_v43 = vadd.f32 %v3499_v56, %v3498_v55  ;;  %v3501_v58 = vpop.f32.mrb[22].mxu1 }
 0x487   :  { %v3502_v59 = vpop.f32.mrb[23].mxu1 }
 0x488   :  { %v2992_v61 = vadd.f32 %v3500_v43, %v2952_v57 }
 0x48a   :  { %v3459_v62 = vmul.f32 -1.442695, %v2992_v61 }
 0x48c   :  { %4088 = vpow2.f32 %v3459_v62 }
 0x496   :  { %v4089_v63 = vpop.eup %4088 }
 0x497   :  { %v3024_v0 = vadd.f32 1.0, %v4089_v63 }
 0x499   :  { %4090 = vrcp.f32 %v3024_v0 }
 0x4a3   :  { %v4091_v2 = vpop.eup %4090 }
 0x4a4   :  { %v3045_v3 = vmax.f32 %v4091_v2, 1e-06 }
 0x4a6   :  { %v3052_v4 = vmin.f32 %v3045_v3, 0.999999 }
 0x4a8   :  { %3059 = vst [vmem:[#allocation10 + $0x30] sm:$0xff] %v3052_v4 }
 0x4c3   :  { %v2910_v10 = vpop.f32.mrb[8].mxu0 }
 0x4c4   :  { %v3512_v11 = vadd.f32 %v2910_v10, %v1503_v8  ;;  %v2912_v12 = vpop.f32.mrb[9].mxu0 }
 0x4c5   :  { %v3513_v13 = vadd.f32 %v2912_v12, %v1507_v9  ;;  %v2914_v35 = vpop.f32.mrb[10].mxu0 }
 0x4c6   :  { %v3457_v15 = vmul.f32 -1.442695, %v3512_v11  ;;  %v2915_v16 = vpop.f32.mrb[11].mxu0 }
 0x4c7   :  { %v3458_v18 = vmul.f32 -1.442695, %v3513_v13 }
 0x4c8   :  { %4092 = vpow2.f32 %v3457_v15 }
 0x4c9   :  { %4094 = vpow2.f32 %v3458_v18 }
 0x4d2   :  { %v4093_v19 = vpop.eup %4092 }
 0x4d3   :  { %v4095_v25 = vpop.eup %4094  ;;  %v3022_v26 = vadd.f32 1.0, %v4093_v19 }
 0x4d4   :  { %v3023_v27 = vadd.f32 1.0, %v4095_v25 }
 0x4d5   :  { %4096 = vrcp.f32 %v3022_v26 }
 0x4d6   :  { %4098 = vrcp.f32 %v3023_v27 }
 0x4df   :  { %v4097_v21 = vpop.eup %4096 }
 0x4e0   :  { %v4099_v22 = vpop.eup %4098  ;;  %v3043_v28 = vmax.f32 %v4097_v21, 1e-06 }
 0x4e1   :  { %v3044_v7 = vmax.f32 %v4099_v22, 1e-06 }
 0x4e2   :  { %v3050_v29 = vmin.f32 %v3043_v28, 0.999999 }
 0x4e3   :  { %v3051_v37 = vmin.f32 %v3044_v7, 0.999999 }
 0x4e4   :  { %3057 = vst [vmem:[#allocation10 + $0x20] sm:$0xff] %v3050_v29 }
 0x4e5   :  { %3058 = vst [vmem:[#allocation10 + $0x28] sm:$0xff] %v3051_v37 }
 0x4e6   :  { %4221 = shalt.err (!%p4218_p2)
}
 0x4e7   :  { %s4222_s1 = scalar_lea.hbm %s4483_s7, 896 }
 0x4e8   :  { %p4223_p3 = scmp.ne.s32.totalorder %s4483_s7, %s4222_s1  ;;  %p4226_p4 = scmp.lt.u32.totalorder %s4222_s1, %s4483_s7 }
 0x4ea   :  { %p4228_p5 = pnand %p4226_p4, %p4223_p3 }
 0x4ec   :  { %4231 = shalt.err (!%p4228_p5)
}
 0x4ed   :  { %3069 = dma.vmem_to_hbm [thread:$0]  %s3067_s26, 896, %s4483_s7, [#allocation4]  }
 0x4ee   :  { %4238 = dma.done.wait [#allocation4], 896  }
 0x4ef   :  { %4239 = vsyncadd [#allocation4], 4294966400 }
 0x4f0   :  { %4240 = dma.done.wait [#allocation12], 128  }
 0x4f1   :  { %4241 = vsyncadd [#allocation12], 4294967168 }
 0x4f2   :  { %3086 = vsyncpa [#allocation3], 1 }
 0x4f3   :  { %3087 = vsyncpa [#allocation6], 1 }
 0x4f4   :  { %3088 = vsyncpa [#allocation9], 1 }
 0x4f5   :  { %3089 = vsyncpa [#allocation4], 1 }
 0x4f6   :  { %3090 = vsyncpa [#allocation12], 1 }

// kernel: tpu_custom_call.1
= control target key start
LH: loop header
LB: loop body
LE: loop exit
PB: predicated region body
PF: predicated region fallthrough
CT: control target
= control target key end

     0   :  { %14 = vsyncpa [#allocation3], 0  ;;  %s4476_s0 = inlined_call_operand.hbm [shape: f32[8,128], index: 0, kind: input, shape index: {}]   ;;  %s4477_s1 = inlined_call_operand.hbm [shape: bf16[32,512], index: 1, kind: input, shape index: {}]   ;;  %s4478_s2 = inlined_call_operand.vmem [shape: f32[1,512], index: 2, kind: input, shape index: {}]   ;;  %s4479_s3 = inlined_call_operand.hbm [shape: bf16[512,512], index: 3, kind: input, shape index: {}]   ;;  %s4480_s4 = inlined_call_operand.vmem [shape: f32[1,512], index: 4, kind: input, shape index: {}]   ;;  %s4481_s5 = inlined_call_operand.hbm [shape: bf16[512,896], index: 5, kind: input, shape index: {}]   ;;  %s4482_s6 = inlined_call_operand.vmem [shape: f32[1,896], index: 6, kind: input, shape index: {}]   ;;  %s4483_s7 = inlined_call_operand.hbm [shape: f32[8,896], index: 7, kind: output, shape index: {0}]   ;;  %s4484_s8 = inlined_call_operand.hbm [shape: f32[8,32], index: 8, kind: output, shape index: {1}]  }
   0x1   :  { %15 = vsyncpa [#allocation6], 0 }
   0x2   :  { %16 = vsyncpa [#allocation9], 0 }
   0x3   :  { %17 = vsyncpa [#allocation4], 0 }
   0x4   :  { %18 = vsyncpa [#allocation12], 0  ;;  %s4242_s27 = smov [#allocation5]   ;;  %s4100_s9 = scalar_lea.hbm %s4477_s1, 1024 }
   0x5   :  { %s34_s28 = sshll.u32 %s4242_s27, 4  ;;  %p4101_p0 = scmp.ne.s32.totalorder %s4477_s1, %s4100_s9  ;;  %s35_s28 = int_to_ptr.vmem [resolvable:$true] %s34_s28 }
   0x6   :  { %p4104_p1 = scmp.lt.u32.totalorder %s4100_s9, %s4477_s1 }
   0x8   :  { %p4106_p2 = pnand %p4104_p1, %p4101_p0 }
   0xa   :  { %4109 = shalt.err (!%p4106_p2)
}
   0xb   :  { %s4110_s14 = scalar_lea.vmem %s35_s28, 1024  ;;  %p4115_p4 = scmp.lt.s32.totalorder %s35_s28, %s35_s28 }
   0xc   :  { %p4111_p3 = scmp.ne.s32.totalorder %s35_s28, %s4110_s14  ;;  %p4116_p5 = scmp.lt.s32.totalorder %s4110_s14, %s4110_s14 }
   0xe   :  { %p4117_p6 = por %p4116_p5, %p4115_p4 }
  0x10   :  { %p4118_p7 = pnand %p4117_p6, %p4111_p3 }
  0x12   :  { %4121 = shalt.err (!%p4118_p7)
}
  0x13   :  { %s4243_s15 = smov 256   ;;  %s4244_s16 = smov 16  }
  0x14   :  { %40 = dma.hbm_to_vmem [thread:$0]  %s4477_s1, 1024, %s35_s28, [#allocation6], %s4243_s15, %s4243_s15, %s4244_s16  }
  0x15   :  { %s4245_s19 = smov [#allocation2]   ;;  %s4246_s21 = smov [#allocation7]  }
  0x16   :  { %s25_s20 = sshll.u32 %s4245_s19, 4  ;;  %s48_s22 = sshll.u32 %s4246_s21, 4  ;;  %s26_s20 = int_to_ptr.vmem [resolvable:$true] %s25_s20  ;;  %s49_s22 = int_to_ptr.vmem [resolvable:$true] %s48_s22 }
  0x17   :  { %s4122_s25 = scalar_lea.hbm %s4476_s0, 128 }
  0x18   :  { %p4123_p8 = scmp.ne.s32.totalorder %s4476_s0, %s4122_s25  ;;  %p4126_p9 = scmp.lt.u32.totalorder %s4122_s25, %s4476_s0 }
  0x1a   :  { %p4128_p10 = pnand %p4126_p9, %p4123_p8 }
  0x1c   :  { %4131 = shalt.err (!%p4128_p10)
}
  0x1d   :  { %s4132_s1 = scalar_lea.vmem %s26_s20, 128  ;;  %p4137_p12 = scmp.lt.s32.totalorder %s26_s20, %s26_s20 }
  0x1e   :  { %p4133_p11 = scmp.ne.s32.totalorder %s26_s20, %s4132_s1  ;;  %p4138_p13 = scmp.lt.s32.totalorder %s4132_s1, %s4132_s1 }
  0x20   :  { %p4139_p0 = por %p4138_p13, %p4137_p12 }
  0x22   :  { %p4140_p1 = pnand %p4139_p0, %p4133_p11 }
  0x24   :  { %4143 = shalt.err (!%p4140_p1)
}
  0x25   :  { %28 = dma.hbm_to_vmem [thread:$0]  %s4476_s0, 128, %s26_s20, [#allocation3]  }
  0x26   :  { %s4144_s12 = scalar_lea.hbm %s4479_s3, 16384 }
  0x27   :  { %p4145_p2 = scmp.ne.s32.totalorder %s4479_s3, %s4144_s12  ;;  %p4148_p3 = scmp.lt.u32.totalorder %s4144_s12, %s4479_s3 }
  0x29   :  { %p4150_p4 = pnand %p4148_p3, %p4145_p2 }
  0x2b   :  { %4153 = shalt.err (!%p4150_p4)
}
  0x2c   :  { %s4154_s19 = scalar_lea.vmem %s49_s22, 16384  ;;  %p4159_p6 = scmp.lt.s32.totalorder %s49_s22, %s49_s22 }
  0x2d   :  { %p4155_p5 = scmp.ne.s32.totalorder %s49_s22, %s4154_s19  ;;  %p4160_p7 = scmp.lt.s32.totalorder %s4154_s19, %s4154_s19 }
  0x2f   :  { %p4161_p8 = por %p4160_p7, %p4159_p6 }
  0x31   :  { %p4162_p9 = pnand %p4161_p8, %p4155_p5 }
  0x33   :  { %4165 = shalt.err (!%p4162_p9)
}
  0x34   :  { %54 = dma.hbm_to_vmem [thread:$0]  %s4479_s3, 16384, %s49_s22, [#allocation6], %s4243_s15, %s4243_s15, %s4244_s16  }
  0x35   :  { %s4247_s21 = smov [#allocation8]   ;;  %s4166_s26 = scalar_lea.hbm %s4481_s5, 28672 }
  0x36   :  { %s62_s23 = sshll.u32 %s4247_s21, 4  ;;  %p4167_p10 = scmp.ne.s32.totalorder %s4481_s5, %s4166_s26  ;;  %s63_s23 = int_to_ptr.vmem [resolvable:$true] %s62_s23 }
  0x37   :  { %p4170_p11 = scmp.lt.u32.totalorder %s4166_s26, %s4481_s5 }
  0x39   :  { %p4172_p12 = pnand %p4170_p11, %p4167_p10 }
  0x3b   :  { %4175 = shalt.err (!%p4172_p12)
}
  0x3c   :  { %s4176_s28 = scalar_lea.vmem %s63_s23, 28672  ;;  %p4181_p0 = scmp.lt.s32.totalorder %s63_s23, %s63_s23 }
  0x3d   :  { %p4177_p13 = scmp.ne.s32.totalorder %s63_s23, %s4176_s28  ;;  %p4182_p1 = scmp.lt.s32.totalorder %s4176_s28, %s4176_s28 }
  0x3f   :  { %p4183_p2 = por %p4182_p1, %p4181_p0 }
  0x41   :  { %p4184_p3 = pnand %p4183_p2, %p4177_p13 }
  0x43   :  { %4187 = shalt.err (!%p4184_p3)
}
  0x44   :  { %s4248_s3 = smov 448   ;;  %s4249_s15 = smov 28  }
  0x45   :  { %68 = dma.hbm_to_vmem [thread:$0]  %s4481_s5, 28672, %s63_s23, [#allocation9], %s4248_s3, %s4248_s3, %s4249_s15  }
  0x46   :  { %4232 = dma.done.wait [#allocation3], 128  }
  0x47   :  { %4233 = vsyncadd [#allocation3], 4294967168 }
  0x48   :  { %4234 = dma.done.wait [#allocation6], 17408  }
  0x49   :  { %4235 = vsyncadd [#allocation6], 4294949888 }
  0x4a   :  { %4236 = dma.done.wait [#allocation9], 28672  }
  0x4b   :  { %4237 = vsyncadd [#allocation9], 4294938624  ;;  %v4353_v0 = vld [vmem:[#allocation2] sm:$0xff]  ;;  %s4250_s9 = smov 96   ;;  %v3546_v1 = vld [vmem:[#allocation5 + $0x4] ss:$16 sps:$4 sm:$0xff]  }
  0x4c   :  { %89 = vrot.lane.b32.xlu0 %v4353_v0, %s4250_s9  ;;  %v3548_v2 = vld [vmem:[#allocation5] ss:$16 sps:$4 sm:$0xff]   ;;  %174 = vmatprep.subr.bf16.mxu1 %v3546_v1  ;;  %v85_v3 = vmul.f32 0.5, %v4353_v0  ;;  %v3549_v5 = vld [vmem:[#allocation5 + $0x24] ss:$16 sps:$4 sm:$0xff]   ;;  %v4251_v8 = vmov 0  }
  0x4d   :  { %175 = vmatpush1.bf16.msra.mxu1 %v3548_v2  ;;  %v3551_v6 = vld [vmem:[#allocation5 + $0x20] ss:$16 sps:$4 sm:$0xff]   ;;  %v3554_v7 = vld [vmem:[#allocation5 + $0xc] ss:$16 sps:$4 sm:$0xff]   ;;  %206 = vmatprep.mubr.bf16.mxu1 %v4251_v8  ;;  %v3558_v12 = vld [vmem:[#allocation7 + $0x4] ss:$16 sps:$4 sm:$0xff]  }
  0x4e   :  { %v86_v4 = vmul.f32 1.442695, %v85_v3  ;;  %176 = vmatprep.subr.bf16.mxu1 %v3549_v5  ;;  %v3563_v13 = vld [vmem:[#allocation7] ss:$16 sps:$4 sm:$0xff]   ;;  %v3564_v14 = vld [vmem:[#allocation7 + $0x24] ss:$16 sps:$4 sm:$0xff]   ;;  %1054 = vmatprep.subr.bf16.mxu0 %v3558_v12 }
  0x4f   :  { %v3569_v15 = vld [vmem:[#allocation7 + $0x20] ss:$16 sps:$4 sm:$0xff]   ;;  %1055 = vmatpush1.bf16.msra.mxu0 %v3563_v13  ;;  %v3570_v16 = vld [vmem:[#allocation7 + $0x44] ss:$16 sps:$4 sm:$0xff]   ;;  %vm98_vm0 = vcmask 261120  }
  0x50   :  { %4070 = vpow2.f32 %v86_v4  ;;  %1056 = vmatprep.subr.bf16.mxu0 %v3564_v14  ;;  %v3575_v17 = vld [vmem:[#allocation7 + $0x40] ss:$16 sps:$4 sm:$0xff]   ;;  %v3576_v18 = vld [vmem:[#allocation7 + $0x64] ss:$16 sps:$4 sm:$0xff]   ;;  %v3552_v42 = vld [vmem:[#allocation5 + $0x8] ss:$16 sps:$4 sm:$0xff]  }
  0x51   :  { %177 = vmatpush1.bf16.msra.mxu1 %v3551_v6  ;;  %v3581_v19 = vld [vmem:[#allocation7 + $0x60] ss:$16 sps:$4 sm:$0xff]   ;;  %v3582_v20 = vld [vmem:[#allocation7 + $0x84] ss:$16 sps:$4 sm:$0xff]   ;;  %v3557_v44 = vld [vmem:[#allocation5 + $0x2c] ss:$16 sps:$4 sm:$0xff]  }
  0x52   :  { %215 = vmatprep.subr.bf16.mxu1 %v3554_v7  ;;  %v3587_v21 = vld [vmem:[#allocation7 + $0x80] ss:$16 sps:$4 sm:$0xff]   ;;  %v3588_v22 = vld [vmem:[#allocation7 + $0xa4] ss:$16 sps:$4 sm:$0xff]   ;;  %v3555_v45 = vld [vmem:[#allocation5 + $0x28] ss:$16 sps:$4 sm:$0xff]  }
  0x53   :  { %1057 = vmatpush1.bf16.msra.mxu0 %v3569_v15  ;;  %v3593_v23 = vld [vmem:[#allocation7 + $0xa0] ss:$16 sps:$4 sm:$0xff]   ;;  %v3594_v24 = vld [vmem:[#allocation7 + $0xc4] ss:$16 sps:$4 sm:$0xff]   ;;  %v3562_v46 = vld [vmem:[#allocation7 + $0xc] ss:$16 sps:$4 sm:$0xff]  }
  0x54   :  { %1058 = vmatprep.subr.bf16.mxu0 %v3570_v16  ;;  %v3599_v25 = vld [vmem:[#allocation7 + $0xc0] ss:$16 sps:$4 sm:$0xff]   ;;  %v3600_v26 = vld [vmem:[#allocation7 + $0xe4] ss:$16 sps:$4 sm:$0xff]   ;;  %v3560_v47 = vld [vmem:[#allocation7 + $0x8] ss:$16 sps:$4 sm:$0xff]  }
  0x55   :  { %v3605_v27 = vld [vmem:[#allocation7 + $0xe0] ss:$16 sps:$4 sm:$0xff]   ;;  %v3606_v28 = vld [vmem:[#allocation7 + $0x104] ss:$16 sps:$4 sm:$0xff]   ;;  %v3568_v48 = vld [vmem:[#allocation7 + $0x2c] ss:$16 sps:$4 sm:$0xff]  }
  0x56   :  { %v3611_v29 = vld [vmem:[#allocation7 + $0x100] ss:$16 sps:$4 sm:$0xff]   ;;  %v3612_v30 = vld [vmem:[#allocation7 + $0x124] ss:$16 sps:$4 sm:$0xff]   ;;  %v3566_v49 = vld [vmem:[#allocation7 + $0x28] ss:$16 sps:$4 sm:$0xff]  }
  0x57   :  { %1059 = vmatpush1.bf16.msra.mxu0 %v3575_v17  ;;  %v3617_v31 = vld [vmem:[#allocation7 + $0x120] ss:$16 sps:$4 sm:$0xff]   ;;  %v3618_v32 = vld [vmem:[#allocation7 + $0x144] ss:$16 sps:$4 sm:$0xff]   ;;  %v3574_v50 = vld [vmem:[#allocation7 + $0x4c] ss:$16 sps:$4 sm:$0xff]  }
  0x58   :  { %1060 = vmatprep.subr.bf16.mxu0 %v3576_v18  ;;  %v3623_v33 = vld [vmem:[#allocation7 + $0x140] ss:$16 sps:$4 sm:$0xff]   ;;  %v3624_v34 = vld [vmem:[#allocation7 + $0x164] ss:$16 sps:$4 sm:$0xff]   ;;  %v3572_v51 = vld [vmem:[#allocation7 + $0x48] ss:$16 sps:$4 sm:$0xff]  }
  0x59   :  { %v3629_v35 = vld [vmem:[#allocation7 + $0x160] ss:$16 sps:$4 sm:$0xff]   ;;  %v3630_v36 = vld [vmem:[#allocation7 + $0x184] ss:$16 sps:$4 sm:$0xff]   ;;  %v3580_v52 = vld [vmem:[#allocation7 + $0x6c] ss:$16 sps:$4 sm:$0xff]  }
  0x5a   :  { %v4071_v9 = vpop.eup %4070  ;;  %v3635_v37 = vld [vmem:[#allocation7 + $0x180] ss:$16 sps:$4 sm:$0xff]   ;;  %v3636_v38 = vld [vmem:[#allocation7 + $0x1a4] ss:$16 sps:$4 sm:$0xff]   ;;  %v3578_v53 = vld [vmem:[#allocation7 + $0x68] ss:$16 sps:$4 sm:$0xff]  }
  0x5b   :  { %1061 = vmatpush1.bf16.msra.mxu0 %v3581_v19  ;;  %v3641_v39 = vld [vmem:[#allocation7 + $0x1a0] ss:$16 sps:$4 sm:$0xff]   ;;  %v3586_v54 = vld [vmem:[#allocation7 + $0x8c] ss:$16 sps:$4 sm:$0xff]   ;;  %v3584_v55 = vld [vmem:[#allocation7 + $0x88] ss:$16 sps:$4 sm:$0xff]  }
  0x5c   :  { %1062 = vmatprep.subr.bf16.mxu0 %v3582_v20  ;;  %v3592_v56 = vld [vmem:[#allocation7 + $0xac] ss:$16 sps:$4 sm:$0xff]   ;;  %v3590_v57 = vld [vmem:[#allocation7 + $0xa8] ss:$16 sps:$4 sm:$0xff]   ;;  %v3647_v13 = vld [vmem:[#allocation7 + $0x1c0] ss:$16 sps:$4 sm:$0xff]   ;;  %v111_v20 = vlaneseq }
  0x5d   :  { %v3598_v58 = vld [vmem:[#allocation7 + $0xcc] ss:$16 sps:$4 sm:$0xff]   ;;  %v3596_v59 = vld [vmem:[#allocation7 + $0xc8] ss:$16 sps:$4 sm:$0xff]   ;;  %v3648_v14 = vld [vmem:[#allocation7 + $0x1e4] ss:$16 sps:$4 sm:$0xff]  }
  0x5e   :  { %v3604_v60 = vld [vmem:[#allocation7 + $0xec] ss:$16 sps:$4 sm:$0xff]   ;;  %v3602_v61 = vld [vmem:[#allocation7 + $0xe8] ss:$16 sps:$4 sm:$0xff]   ;;  %v3653_v17 = vld [vmem:[#allocation7 + $0x1e0] ss:$16 sps:$4 sm:$0xff]  }
  0x5f   :  { %1063 = vmatpush1.bf16.msra.mxu0 %v3587_v21  ;;  %v3610_v62 = vld [vmem:[#allocation7 + $0x10c] ss:$16 sps:$4 sm:$0xff]   ;;  %v3608_v63 = vld [vmem:[#allocation7 + $0x108] ss:$16 sps:$4 sm:$0xff]   ;;  %v3656_v18 = vld [vmem:[#allocation7 + $0x204] ss:$16 sps:$4 sm:$0xff]  }
  0x60   :  { %1064 = vmatprep.subr.bf16.mxu0 %v3588_v22  ;;  %v3614_v1 = vld [vmem:[#allocation7 + $0x128] ss:$16 sps:$4 sm:$0xff]   ;;  %v3622_v2 = vld [vmem:[#allocation7 + $0x14c] ss:$16 sps:$4 sm:$0xff]   ;;  %v4363_v21 = vshrl.u32 %v111_v20, 7 }
  0x61   :  { %v3620_v3 = vld [vmem:[#allocation7 + $0x148] ss:$16 sps:$4 sm:$0xff]   ;;  %v3628_v4 = vld [vmem:[#allocation7 + $0x16c] ss:$16 sps:$4 sm:$0xff]   ;;  %v3716_v20 = vld [vmem:[#allocation7 + $0x344] ss:$16 sps:$4 sm:$0xff]  }
  0x62   :  { %v3626_v5 = vld [vmem:[#allocation7 + $0x168] ss:$16 sps:$4 sm:$0xff]   ;;  %v3634_v6 = vld [vmem:[#allocation7 + $0x18c] ss:$16 sps:$4 sm:$0xff]   ;;  %v4366_v22 = vsub.s32 0, %v4363_v21 }
  0x63   :  { %1065 = vmatpush1.bf16.msra.mxu0 %v3593_v23  ;;  %v3632_v7 = vld [vmem:[#allocation7 + $0x188] ss:$16 sps:$4 sm:$0xff]   ;;  %v3652_v15 = vld [vmem:[#allocation7 + $0x1ec] ss:$16 sps:$4 sm:$0xff]  }
  0x64   :  { %1066 = vmatprep.subr.bf16.mxu0 %v3594_v24  ;;  %v3644_v12 = vld [vmem:[#allocation7 + $0x1c8] ss:$16 sps:$4 sm:$0xff]   ;;  %v3659_v19 = vld [vmem:[#allocation7 + $0x20c] ss:$16 sps:$4 sm:$0xff]   ;;  %v4374_v24 = vsub.s32 1, %v4363_v21 }
  0x65   :  { %v3650_v16 = vld [vmem:[#allocation7 + $0x1e8] ss:$16 sps:$4 sm:$0xff]  }
  0x66   :  { %v4371_v23 = vld [vmem:[%s4478_s2] sm:$0xf] }
  0x67   :  { %1067 = vmatpush1.bf16.msra.mxu0 %v3599_v25  ;;  %v114_v25 = vrot.slane %v4371_v23, %v4366_v22 }
  0x68   :  { %1068 = vmatprep.subr.bf16.mxu0 %v3600_v26  ;;  %v118_v26 = vrot.slane %v4371_v23, %v4374_v24 }
  0x6b   :  { %1069 = vmatpush1.bf16.msra.mxu0 %v3605_v27 }
  0x6c   :  { %1070 = vmatprep.subr.bf16.mxu0 %v3606_v28 }
  0x6f   :  { %1071 = vmatpush1.bf16.msra.mxu0 %v3611_v29 }
  0x70   :  { %1072 = vmatprep.subr.bf16.mxu0 %v3612_v30 }
  0x73   :  { %1073 = vmatpush1.bf16.msra.mxu0 %v3617_v31 }
  0x74   :  { %1074 = vmatprep.subr.bf16.mxu0 %v3618_v32  ;;  %v4381_v32 = vsub.s32 3, %v4363_v21 }
  0x77   :  { %1075 = vmatpush1.bf16.msra.mxu0 %v3623_v33 }
  0x78   :  { %1076 = vmatprep.subr.bf16.mxu0 %v3624_v34 }
  0x7b   :  { %1077 = vmatpush1.bf16.msra.mxu0 %v3629_v35 }
  0x7c   :  { %1078 = vmatprep.subr.bf16.mxu0 %v3630_v36 }
  0x7f   :  { %1079 = vmatpush1.bf16.msra.mxu0 %v3635_v37  ;;  %v3654_v37 = vld [vmem:[#allocation7 + $0x200] ss:$16 sps:$4 sm:$0xff]  }
  0x80   :  { %1080 = vmatprep.subr.bf16.mxu0 %v3636_v38  ;;  %v3657_v38 = vld [vmem:[#allocation7 + $0x208] ss:$16 sps:$4 sm:$0xff]  }
  0x83   :  { %1081 = vmatpush1.bf16.msra.mxu0 %v3641_v39  ;;  %v126_v39 = vrot.slane %v4371_v23, %v4381_v32 }
  0xbe   :  { %v90_v10 = vpop.permute.xlu0 %89 }
  0xbf   :  { %v92_v11 = vmul.f32 %v4071_v9, %v90_v10  ;;  %v3638_v9 = vld [vmem:[#allocation7 + $0x1a8] ss:$16 sps:$4 sm:$0xff]   ;;  %v3642_v10 = vld [vmem:[#allocation7 + $0x1c4] ss:$16 sps:$4 sm:$0xff]  }
  0xc0   :  { %1082 = vmatprep.subr.bf16.mxu0 %v3642_v10  ;;  %v3696_v10 = vld [vmem:[#allocation7 + $0x2e0] ss:$16 sps:$4 sm:$0xff]  }
  0xc1   :  { %94 = vrot.lane.b32.xlu0 %v92_v11, %s4250_s9  ;;  %v3646_v11 = vld [vmem:[#allocation7 + $0x1cc] ss:$16 sps:$4 sm:$0xff]   ;;  %1083 = vmatpush1.bf16.msra.mxu0 %v3647_v13 }
  0xc2   :  { %1084 = vmatprep.subr.bf16.mxu0 %v3648_v14  ;;  %v3707_v13 = vld [vmem:[#allocation7 + $0x30c] ss:$16 sps:$4 sm:$0xff]   ;;  %v3702_v14 = vld [vmem:[#allocation7 + $0x300] ss:$16 sps:$4 sm:$0xff]  }
  0xc5   :  { %1085 = vmatpush1.bf16.msra.mxu0 %v3653_v17  ;;  %v3713_v17 = vld [vmem:[#allocation7 + $0x32c] ss:$16 sps:$4 sm:$0xff]  }
  0xc6   :  { %1095 = vmatprep.subr.bf16.mxu0 %v3656_v18  ;;  %v3708_v18 = vld [vmem:[#allocation7 + $0x320] ss:$16 sps:$4 sm:$0xff]  }
 0x133   :  { %v95_v40 = vpop.permute.xlu0 %94 }
 0x134   :  { %v97_v41 = vadd.f32 %v95_v40, %v4353_v0  ;;  %v3616_v0 = vld [vmem:[#allocation7 + $0x12c] ss:$16 sps:$4 sm:$0xff]  }
 0x136   :  { %v109_v43 = vpack.c.bf16 %v97_v41, %v97_v41  ;;  %99 = vst.msk [vmem:[#allocation11] sm:$0xff] %vm98_vm0, %v97_v41  ;;  %v3662_v41 = vld [vmem:[#allocation7 + $0x224] ss:$16 sps:$4 sm:$0xff]  }
 0x138   :  { %3099 = vmatmul.mubr.msk.bf16.vlgmr.msra.gmra.mrb[0].mxu1 %vm98_vm0, %v109_v43 }
 0x139   :  { %216 = vmatpush1.bf16.msra.mxu1 %v3552_v42  ;;  %247 = vmatprep.mubr.bf16.mxu1 %v4251_v8  ;;  %v3640_v8 = vld [vmem:[#allocation7 + $0x1ac] ss:$16 sps:$4 sm:$0xff]  }
 0x13a   :  { %217 = vmatprep.subr.bf16.mxu1 %v3557_v44  ;;  %v3665_v42 = vld [vmem:[#allocation7 + $0x22c] ss:$16 sps:$4 sm:$0xff]  }
 0x13d   :  { %218 = vmatpush1.bf16.msra.mxu1 %v3555_v45 }
 0x13e   :  { %1136 = vmatprep.subr.bf16.mxu1 %v3562_v46 }
 0x140   :  { %3100 = vmatmul.mubr.msk.bf16.vlgmr.msra.gmra.mrb[4].mxu1 %vm98_vm0, %v109_v43 }
 0x141   :  { %1137 = vmatpush1.bf16.msra.mxu1 %v3560_v47  ;;  %v3660_v47 = vld [vmem:[#allocation7 + $0x220] ss:$16 sps:$4 sm:$0xff]  }
 0x142   :  { %1138 = vmatprep.subr.bf16.mxu1 %v3568_v48  ;;  %v3663_v48 = vld [vmem:[#allocation7 + $0x228] ss:$16 sps:$4 sm:$0xff]  }
 0x145   :  { %1139 = vmatpush1.bf16.msra.mxu1 %v3566_v49 }
 0x146   :  { %1140 = vmatprep.subr.bf16.mxu1 %v3574_v50  ;;  %v3668_v50 = vld [vmem:[#allocation7 + $0x244] ss:$16 sps:$4 sm:$0xff]  }
 0x149   :  { %1141 = vmatpush1.bf16.msra.mxu1 %v3572_v51  ;;  %v3671_v51 = vld [vmem:[#allocation7 + $0x24c] ss:$16 sps:$4 sm:$0xff]  }
 0x14a   :  { %1142 = vmatprep.subr.bf16.mxu1 %v3580_v52 }
 0x14d   :  { %1143 = vmatpush1.bf16.msra.mxu1 %v3578_v53 }
 0x14e   :  { %1144 = vmatprep.subr.bf16.mxu1 %v3586_v54  ;;  %v3666_v54 = vld [vmem:[#allocation7 + $0x240] ss:$16 sps:$4 sm:$0xff]  }
 0x151   :  { %1145 = vmatpush1.bf16.msra.mxu1 %v3584_v55  ;;  %v3669_v55 = vld [vmem:[#allocation7 + $0x248] ss:$16 sps:$4 sm:$0xff]  }
 0x152   :  { %1146 = vmatprep.subr.bf16.mxu1 %v3592_v56  ;;  %v3674_v56 = vld [vmem:[#allocation7 + $0x264] ss:$16 sps:$4 sm:$0xff]  }
 0x155   :  { %1147 = vmatpush1.bf16.msra.mxu1 %v3590_v57  ;;  %v3677_v57 = vld [vmem:[#allocation7 + $0x26c] ss:$16 sps:$4 sm:$0xff]  }
 0x156   :  { %1148 = vmatprep.subr.bf16.mxu1 %v3598_v58  ;;  %v3672_v58 = vld [vmem:[#allocation7 + $0x260] ss:$16 sps:$4 sm:$0xff]  }
 0x159   :  { %1149 = vmatpush1.bf16.msra.mxu1 %v3596_v59  ;;  %v3675_v59 = vld [vmem:[#allocation7 + $0x268] ss:$16 sps:$4 sm:$0xff]  }
 0x15a   :  { %1150 = vmatprep.subr.bf16.mxu1 %v3604_v60  ;;  %v3680_v60 = vld [vmem:[#allocation7 + $0x284] ss:$16 sps:$4 sm:$0xff]  }
 0x15d   :  { %1151 = vmatpush1.bf16.msra.mxu1 %v3602_v61  ;;  %v3683_v61 = vld [vmem:[#allocation7 + $0x28c] ss:$16 sps:$4 sm:$0xff]  }
 0x15e   :  { %1152 = vmatprep.subr.bf16.mxu1 %v3610_v62  ;;  %v3678_v62 = vld [vmem:[#allocation7 + $0x280] ss:$16 sps:$4 sm:$0xff]  }
 0x161   :  { %1153 = vmatpush1.bf16.msra.mxu1 %v3608_v63  ;;  %v3681_v63 = vld [vmem:[#allocation7 + $0x288] ss:$16 sps:$4 sm:$0xff]  }
 0x162   :  { %1154 = vmatprep.subr.bf16.mxu1 %v3616_v0  ;;  %v3686_v0 = vld [vmem:[#allocation7 + $0x2a4] ss:$16 sps:$4 sm:$0xff]  }
 0x165   :  { %1155 = vmatpush1.bf16.msra.mxu1 %v3614_v1  ;;  %v3689_v1 = vld [vmem:[#allocation7 + $0x2ac] ss:$16 sps:$4 sm:$0xff]  }
 0x166   :  { %1156 = vmatprep.subr.bf16.mxu1 %v3622_v2  ;;  %v3684_v2 = vld [vmem:[#allocation7 + $0x2a0] ss:$16 sps:$4 sm:$0xff]  }
 0x169   :  { %1157 = vmatpush1.bf16.msra.mxu1 %v3620_v3  ;;  %v3687_v3 = vld [vmem:[#allocation7 + $0x2a8] ss:$16 sps:$4 sm:$0xff]  }
 0x16a   :  { %1158 = vmatprep.subr.bf16.mxu1 %v3628_v4  ;;  %v3692_v4 = vld [vmem:[#allocation7 + $0x2c4] ss:$16 sps:$4 sm:$0xff]  }
 0x16d   :  { %1159 = vmatpush1.bf16.msra.mxu1 %v3626_v5  ;;  %v3695_v5 = vld [vmem:[#allocation7 + $0x2cc] ss:$16 sps:$4 sm:$0xff]  }
 0x16e   :  { %1160 = vmatprep.subr.bf16.mxu1 %v3634_v6  ;;  %v3690_v6 = vld [vmem:[#allocation7 + $0x2c0] ss:$16 sps:$4 sm:$0xff]  }
 0x171   :  { %1161 = vmatpush1.bf16.msra.mxu1 %v3632_v7  ;;  %v3693_v7 = vld [vmem:[#allocation7 + $0x2c8] ss:$16 sps:$4 sm:$0xff]  }
 0x172   :  { %1162 = vmatprep.subr.bf16.mxu1 %v3640_v8  ;;  %v3698_v8 = vld [vmem:[#allocation7 + $0x2e4] ss:$16 sps:$4 sm:$0xff]  }
 0x175   :  { %1163 = vmatpush1.bf16.msra.mxu1 %v3638_v9  ;;  %v3701_v9 = vld [vmem:[#allocation7 + $0x2ec] ss:$16 sps:$4 sm:$0xff]  }
 0x176   :  { %1164 = vmatprep.subr.bf16.mxu1 %v3646_v11  ;;  %v3699_v11 = vld [vmem:[#allocation7 + $0x2e8] ss:$16 sps:$4 sm:$0xff]  }
 0x179   :  { %1165 = vmatpush1.bf16.msra.mxu1 %v3644_v12  ;;  %v3704_v12 = vld [vmem:[#allocation7 + $0x304] ss:$16 sps:$4 sm:$0xff]  }
 0x17a   :  { %1166 = vmatprep.subr.bf16.mxu1 %v3652_v15  ;;  %v3705_v15 = vld [vmem:[#allocation7 + $0x308] ss:$16 sps:$4 sm:$0xff]  }
 0x17d   :  { %1167 = vmatpush1.bf16.msra.mxu1 %v3650_v16  ;;  %v3710_v16 = vld [vmem:[#allocation7 + $0x324] ss:$16 sps:$4 sm:$0xff]  }
 0x17e   :  { %1177 = vmatprep.subr.bf16.mxu1 %v3659_v19  ;;  %v3711_v19 = vld [vmem:[#allocation7 + $0x328] ss:$16 sps:$4 sm:$0xff]  }
 0x20b   :  { %v208_v27 = vpop.f32.mrb[0].mxu1 }
 0x20c   :  { %v209_v28 = vadd.f32 %v208_v27, %v114_v25  ;;  %v210_v29 = vpop.f32.mrb[1].mxu1  ;;  %v3719_v25 = vld [vmem:[#allocation7 + $0x34c] ss:$16 sps:$4 sm:$0xff]   ;;  %v3717_v27 = vld [vmem:[#allocation7 + $0x348] ss:$16 sps:$4 sm:$0xff]  }
 0x20d   :  { %v211_v30 = vadd.f32 %v210_v29, %v118_v26  ;;  %v212_v31 = vpop.f32.mrb[2].mxu1  ;;  %v3714_v26 = vld [vmem:[#allocation7 + $0x340] ss:$16 sps:$4 sm:$0xff]   ;;  %v3725_v29 = vld [vmem:[#allocation7 + $0x36c] ss:$16 sps:$4 sm:$0xff]  }
 0x20e   :  { %v256_v33 = vmax.f32 %v209_v28, 0.0  ;;  %v213_v34 = vpop.f32.mrb[3].mxu1  ;;  %v3722_v28 = vld [vmem:[#allocation7 + $0x364] ss:$16 sps:$4 sm:$0xff]   ;;  %v3723_v31 = vld [vmem:[#allocation7 + $0x368] ss:$16 sps:$4 sm:$0xff]  }
 0x20f   :  { %v257_v35 = vmax.f32 %v211_v30, 0.0  ;;  %v3720_v30 = vld [vmem:[#allocation7 + $0x360] ss:$16 sps:$4 sm:$0xff]   ;;  %v3731_v34 = vld [vmem:[#allocation7 + $0x38c] ss:$16 sps:$4 sm:$0xff]  }
 0x210   :  { %v389_v40 = vpack.c.bf16 %v256_v33, %v256_v33  ;;  %v3728_v33 = vld [vmem:[#allocation7 + $0x384] ss:$16 sps:$4 sm:$0xff]  }
 0x211   :  { %v390_v36 = vpack.c.bf16 %v257_v35, %v257_v35  ;;  %v3726_v35 = vld [vmem:[#allocation7 + $0x380] ss:$16 sps:$4 sm:$0xff]  }
 0x213   :  { %v4385_v43 = vpop.f32.mrb[4].mxu1  ;;  %1086 = vmatprep.mubr.bf16.mxu0 %v390_v36  ;;  %1168 = vmatprep.mubr.bf16.mxu1 %v390_v36  ;;  %v3729_v36 = vld [vmem:[#allocation7 + $0x388] ss:$16 sps:$4 sm:$0xff]  }
 0x214   :  { %v251_v44 = vpop.f32.mrb[5].mxu1  ;;  %1087 = vmatmul.mubr.bf16.vlgmr.msra.gmra.mrb[0].mxu0 %v389_v40  ;;  %1169 = vmatmul.mubr.bf16.vlgmr.msra.gmra.mrb[8].mxu1 %v389_v40  ;;  %v3732_v40 = vld [vmem:[#allocation7 + $0x3a0] ss:$16 sps:$4 sm:$0xff]  }
 0x215   :  { %v252_v45 = vadd.f32 %v251_v44, %v126_v39  ;;  %1096 = vmatpush1.bf16.msra.mxu0 %v3654_v37  ;;  %1178 = vmatpush1.bf16.msra.mxu1 %v3657_v38  ;;  %v253_v46 = vpop.f32.mrb[6].mxu1  ;;  %v4388_v37 = vsub.s32 2, %v4363_v21  ;;  %v3734_v38 = vld [vmem:[#allocation7 + $0x3a4] ss:$16 sps:$4 sm:$0xff]   ;;  %v3737_v39 = vld [vmem:[#allocation7 + $0x3ac] ss:$16 sps:$4 sm:$0xff]  }
 0x216   :  { %v254_v49 = vpop.f32.mrb[7].mxu1  ;;  %1097 = vmatprep.subr.bf16.mxu0 %v3662_v41  ;;  %1179 = vmatprep.subr.bf16.mxu1 %v3665_v42  ;;  %v3735_v41 = vld [vmem:[#allocation7 + $0x3a8] ss:$16 sps:$4 sm:$0xff]   ;;  %v3740_v44 = vld [vmem:[#allocation7 + $0x3c4] ss:$16 sps:$4 sm:$0xff]  }
 0x217   :  { %v259_v52 = vmax.f32 %v252_v45, 0.0  ;;  %v122_v42 = vrot.slane %v4371_v23, %v4388_v37  ;;  %v3743_v45 = vld [vmem:[#allocation7 + $0x3cc] ss:$16 sps:$4 sm:$0xff]   ;;  %v3738_v46 = vld [vmem:[#allocation7 + $0x3c0] ss:$16 sps:$4 sm:$0xff]  }
 0x218   :  { %v3746_v49 = vld [vmem:[#allocation7 + $0x3e4] ss:$16 sps:$4 sm:$0xff]  }
 0x219   :  { %v392_v53 = vpack.c.bf16 %v259_v52, %v259_v52  ;;  %1098 = vmatpush1.bf16.msra.mxu0 %v3660_v47  ;;  %1180 = vmatpush1.bf16.msra.mxu1 %v3663_v48  ;;  %v3741_v47 = vld [vmem:[#allocation7 + $0x3c8] ss:$16 sps:$4 sm:$0xff]   ;;  %v250_v48 = vadd.f32 %v4385_v43, %v122_v42  ;;  %v3752_v23 = vld [vmem:[#allocation8 + $0x4] ss:$28 sps:$4 sm:$0xff]   ;;  %v3819_v42 = vld [vmem:[#allocation8 + $0x270] ss:$28 sps:$4 sm:$0xff]  }
 0x21a   :  { %1099 = vmatprep.subr.bf16.mxu0 %v3668_v50  ;;  %1181 = vmatprep.subr.bf16.mxu1 %v3671_v51  ;;  %v3749_v50 = vld [vmem:[#allocation7 + $0x3ec] ss:$16 sps:$4 sm:$0xff]   ;;  %v3744_v51 = vld [vmem:[#allocation7 + $0x3e0] ss:$16 sps:$4 sm:$0xff]   ;;  %v3747_v52 = vld [vmem:[#allocation7 + $0x3e8] ss:$16 sps:$4 sm:$0xff]  }
 0x21b   :  { %1127 = vmatprep.mubr.bf16.mxu0 %v392_v53  ;;  %1209 = vmatprep.mubr.bf16.mxu1 %v392_v53  ;;  %v258_v53 = vmax.f32 %v250_v48, 0.0  ;;  %v3758_v43 = vld [vmem:[#allocation8 + $0x3c] ss:$28 sps:$4 sm:$0xff]  }
 0x21c   :  { %v3830_v48 = vld [vmem:[#allocation8 + $0x2dc] ss:$28 sps:$4 sm:$0xff]  }
 0x21d   :  { %1100 = vmatpush1.bf16.msra.mxu0 %v3666_v54  ;;  %1182 = vmatpush1.bf16.msra.mxu1 %v3669_v55  ;;  %v3755_v54 = vld [vmem:[#allocation8 + $0xc] ss:$28 sps:$4 sm:$0xff]   ;;  %v3750_v55 = vld [vmem:[#allocation8] ss:$28 sps:$4 sm:$0xff]  }
 0x21e   :  { %1101 = vmatprep.subr.bf16.mxu0 %v3674_v56  ;;  %1183 = vmatprep.subr.bf16.mxu1 %v3677_v57  ;;  %v3753_v56 = vld [vmem:[#allocation8 + $0x8] ss:$28 sps:$4 sm:$0xff]   ;;  %v391_v57 = vpack.c.bf16 %v258_v53, %v258_v53  ;;  %v3839_v53 = vld [vmem:[#allocation8 + $0x31c] ss:$28 sps:$4 sm:$0xff]  }
 0x221   :  { %1102 = vmatpush1.bf16.msra.mxu0 %v3672_v58  ;;  %1184 = vmatpush1.bf16.msra.mxu1 %v3675_v59  ;;  %v3761_v58 = vld [vmem:[#allocation8 + $0x44] ss:$28 sps:$4 sm:$0xff]   ;;  %v3756_v59 = vld [vmem:[#allocation8 + $0x38] ss:$28 sps:$4 sm:$0xff]  }
 0x222   :  { %1103 = vmatprep.subr.bf16.mxu0 %v3680_v60  ;;  %1185 = vmatprep.subr.bf16.mxu1 %v3683_v61  ;;  %v3759_v60 = vld [vmem:[#allocation8 + $0x40] ss:$28 sps:$4 sm:$0xff]   ;;  %v3764_v61 = vld [vmem:[#allocation8 + $0x74] ss:$28 sps:$4 sm:$0xff]  }
 0x225   :  { %1104 = vmatpush1.bf16.msra.mxu0 %v3678_v62  ;;  %1186 = vmatpush1.bf16.msra.mxu1 %v3681_v63  ;;  %v3767_v62 = vld [vmem:[#allocation8 + $0x7c] ss:$28 sps:$4 sm:$0xff]   ;;  %v3762_v63 = vld [vmem:[#allocation8 + $0x70] ss:$28 sps:$4 sm:$0xff]  }
 0x226   :  { %1105 = vmatprep.subr.bf16.mxu0 %v3686_v0  ;;  %1187 = vmatprep.subr.bf16.mxu1 %v3689_v1  ;;  %v3765_v0 = vld [vmem:[#allocation8 + $0x78] ss:$28 sps:$4 sm:$0xff]   ;;  %v3770_v1 = vld [vmem:[#allocation8 + $0xac] ss:$28 sps:$4 sm:$0xff]  }
 0x229   :  { %1106 = vmatpush1.bf16.msra.mxu0 %v3684_v2  ;;  %1188 = vmatpush1.bf16.msra.mxu1 %v3687_v3  ;;  %v3773_v2 = vld [vmem:[#allocation8 + $0xb4] ss:$28 sps:$4 sm:$0xff]   ;;  %v3768_v3 = vld [vmem:[#allocation8 + $0xa8] ss:$28 sps:$4 sm:$0xff]  }
 0x22a   :  { %1107 = vmatprep.subr.bf16.mxu0 %v3692_v4  ;;  %1189 = vmatprep.subr.bf16.mxu1 %v3695_v5  ;;  %v3771_v4 = vld [vmem:[#allocation8 + $0xb0] ss:$28 sps:$4 sm:$0xff]   ;;  %v3776_v5 = vld [vmem:[#allocation8 + $0xe4] ss:$28 sps:$4 sm:$0xff]  }
 0x22d   :  { %1108 = vmatpush1.bf16.msra.mxu0 %v3690_v6  ;;  %1190 = vmatpush1.bf16.msra.mxu1 %v3693_v7  ;;  %v3779_v6 = vld [vmem:[#allocation8 + $0xec] ss:$28 sps:$4 sm:$0xff]   ;;  %v3774_v7 = vld [vmem:[#allocation8 + $0xe0] ss:$28 sps:$4 sm:$0xff]  }
 0x22e   :  { %1109 = vmatprep.subr.bf16.mxu0 %v3698_v8  ;;  %1191 = vmatprep.subr.bf16.mxu1 %v3701_v9  ;;  %v3777_v8 = vld [vmem:[#allocation8 + $0xe8] ss:$28 sps:$4 sm:$0xff]   ;;  %v3782_v9 = vld [vmem:[#allocation8 + $0x11c] ss:$28 sps:$4 sm:$0xff]  }
 0x231   :  { %1110 = vmatpush1.bf16.msra.mxu0 %v3696_v10  ;;  %1192 = vmatpush1.bf16.msra.mxu1 %v3699_v11  ;;  %v3785_v10 = vld [vmem:[#allocation8 + $0x124] ss:$28 sps:$4 sm:$0xff]   ;;  %v3780_v11 = vld [vmem:[#allocation8 + $0x118] ss:$28 sps:$4 sm:$0xff]  }
 0x232   :  { %1111 = vmatprep.subr.bf16.mxu0 %v3704_v12  ;;  %1193 = vmatprep.subr.bf16.mxu1 %v3707_v13  ;;  %v3783_v12 = vld [vmem:[#allocation8 + $0x120] ss:$28 sps:$4 sm:$0xff]   ;;  %v3788_v13 = vld [vmem:[#allocation8 + $0x154] ss:$28 sps:$4 sm:$0xff]  }
 0x235   :  { %1112 = vmatpush1.bf16.msra.mxu0 %v3702_v14  ;;  %1194 = vmatpush1.bf16.msra.mxu1 %v3705_v15  ;;  %v3791_v14 = vld [vmem:[#allocation8 + $0x15c] ss:$28 sps:$4 sm:$0xff]   ;;  %v3786_v15 = vld [vmem:[#allocation8 + $0x150] ss:$28 sps:$4 sm:$0xff]  }
 0x236   :  { %1113 = vmatprep.subr.bf16.mxu0 %v3710_v16  ;;  %1195 = vmatprep.subr.bf16.mxu1 %v3713_v17  ;;  %v3789_v16 = vld [vmem:[#allocation8 + $0x158] ss:$28 sps:$4 sm:$0xff]   ;;  %v3794_v17 = vld [vmem:[#allocation8 + $0x18c] ss:$28 sps:$4 sm:$0xff]  }
 0x239   :  { %1114 = vmatpush1.bf16.msra.mxu0 %v3708_v18  ;;  %1196 = vmatpush1.bf16.msra.mxu1 %v3711_v19  ;;  %v3797_v18 = vld [vmem:[#allocation8 + $0x194] ss:$28 sps:$4 sm:$0xff]   ;;  %v3792_v19 = vld [vmem:[#allocation8 + $0x188] ss:$28 sps:$4 sm:$0xff]  }
 0x23a   :  { %1115 = vmatprep.subr.bf16.mxu0 %v3716_v20  ;;  %1197 = vmatprep.subr.bf16.mxu1 %v3719_v25  ;;  %v3795_v20 = vld [vmem:[#allocation8 + $0x190] ss:$28 sps:$4 sm:$0xff]   ;;  %v3800_v25 = vld [vmem:[#allocation8 + $0x1c4] ss:$28 sps:$4 sm:$0xff]  }
 0x23d   :  { %1116 = vmatpush1.bf16.msra.mxu0 %v3714_v26  ;;  %1198 = vmatpush1.bf16.msra.mxu1 %v3717_v27  ;;  %v3803_v26 = vld [vmem:[#allocation8 + $0x1cc] ss:$28 sps:$4 sm:$0xff]   ;;  %v3798_v27 = vld [vmem:[#allocation8 + $0x1c0] ss:$28 sps:$4 sm:$0xff]  }
 0x23e   :  { %1117 = vmatprep.subr.bf16.mxu0 %v3722_v28  ;;  %1199 = vmatprep.subr.bf16.mxu1 %v3725_v29  ;;  %v3801_v28 = vld [vmem:[#allocation8 + $0x1c8] ss:$28 sps:$4 sm:$0xff]   ;;  %v3806_v29 = vld [vmem:[#allocation8 + $0x1fc] ss:$28 sps:$4 sm:$0xff]  }
 0x241   :  { %1118 = vmatpush1.bf16.msra.mxu0 %v3720_v30  ;;  %1200 = vmatpush1.bf16.msra.mxu1 %v3723_v31  ;;  %v3809_v30 = vld [vmem:[#allocation8 + $0x204] ss:$28 sps:$4 sm:$0xff]   ;;  %v3804_v31 = vld [vmem:[#allocation8 + $0x1f8] ss:$28 sps:$4 sm:$0xff]  }
 0x242   :  { %1119 = vmatprep.subr.bf16.mxu0 %v3728_v33  ;;  %1201 = vmatprep.subr.bf16.mxu1 %v3731_v34  ;;  %v3807_v33 = vld [vmem:[#allocation8 + $0x200] ss:$28 sps:$4 sm:$0xff]   ;;  %v3812_v34 = vld [vmem:[#allocation8 + $0x234] ss:$28 sps:$4 sm:$0xff]  }
 0x245   :  { %1120 = vmatpush1.bf16.msra.mxu0 %v3726_v35  ;;  %1202 = vmatpush1.bf16.msra.mxu1 %v3729_v36  ;;  %v3815_v35 = vld [vmem:[#allocation8 + $0x23c] ss:$28 sps:$4 sm:$0xff]   ;;  %v3810_v36 = vld [vmem:[#allocation8 + $0x230] ss:$28 sps:$4 sm:$0xff]  }
 0x246   :  { %1121 = vmatprep.subr.bf16.mxu0 %v3734_v38  ;;  %1203 = vmatprep.subr.bf16.mxu1 %v3737_v39  ;;  %v3813_v38 = vld [vmem:[#allocation8 + $0x238] ss:$28 sps:$4 sm:$0xff]   ;;  %v3818_v39 = vld [vmem:[#allocation8 + $0x26c] ss:$28 sps:$4 sm:$0xff]  }
 0x249   :  { %1122 = vmatpush1.bf16.msra.mxu0 %v3732_v40  ;;  %1204 = vmatpush1.bf16.msra.mxu1 %v3735_v41  ;;  %v3821_v40 = vld [vmem:[#allocation8 + $0x274] ss:$28 sps:$4 sm:$0xff]   ;;  %v3816_v41 = vld [vmem:[#allocation8 + $0x268] ss:$28 sps:$4 sm:$0xff]  }
 0x24a   :  { %1123 = vmatprep.subr.bf16.mxu0 %v3740_v44  ;;  %1205 = vmatprep.subr.bf16.mxu1 %v3743_v45  ;;  %v3824_v44 = vld [vmem:[#allocation8 + $0x2a4] ss:$28 sps:$4 sm:$0xff]   ;;  %v3827_v45 = vld [vmem:[#allocation8 + $0x2ac] ss:$28 sps:$4 sm:$0xff]  }
 0x24d   :  { %1124 = vmatpush1.bf16.msra.mxu0 %v3738_v46  ;;  %1206 = vmatpush1.bf16.msra.mxu1 %v3741_v47  ;;  %v3822_v46 = vld [vmem:[#allocation8 + $0x2a0] ss:$28 sps:$4 sm:$0xff]   ;;  %v3825_v47 = vld [vmem:[#allocation8 + $0x2a8] ss:$28 sps:$4 sm:$0xff]  }
 0x24e   :  { %1125 = vmatprep.subr.bf16.mxu0 %v3746_v49  ;;  %1207 = vmatprep.subr.bf16.mxu1 %v3749_v50  ;;  %v3833_v49 = vld [vmem:[#allocation8 + $0x2e4] ss:$28 sps:$4 sm:$0xff]   ;;  %v3828_v50 = vld [vmem:[#allocation8 + $0x2d8] ss:$28 sps:$4 sm:$0xff]  }
 0x251   :  { %1126 = vmatpush1.bf16.msra.mxu0 %v3744_v51  ;;  %1208 = vmatpush1.bf16.msra.mxu1 %v3747_v52  ;;  %v3831_v51 = vld [vmem:[#allocation8 + $0x2e0] ss:$28 sps:$4 sm:$0xff]   ;;  %v3836_v52 = vld [vmem:[#allocation8 + $0x314] ss:$28 sps:$4 sm:$0xff]  }
 0x252   :  { %2671 = vmatprep.subr.bf16.mxu0 %v3752_v23  ;;  %2753 = vmatprep.subr.bf16.mxu1 %v3755_v54  ;;  %v3834_v23 = vld [vmem:[#allocation8 + $0x310] ss:$28 sps:$4 sm:$0xff]   ;;  %v3837_v54 = vld [vmem:[#allocation8 + $0x318] ss:$28 sps:$4 sm:$0xff]  }
 0x254   :  { %1128 = vmatmul.mubr.bf16.vlgmr.msra.gmra.mrb[0].mxu0 %v391_v57  ;;  %1210 = vmatmul.mubr.bf16.vlgmr.msra.gmra.mrb[8].mxu1 %v391_v57  ;;  %v3840_v57 = vld [vmem:[#allocation8 + $0x348] ss:$28 sps:$4 sm:$0xff]  }
 0x255   :  { %2672 = vmatpush1.bf16.msra.mxu0 %v3750_v55  ;;  %2754 = vmatpush1.bf16.msra.mxu1 %v3753_v56  ;;  %v3842_v55 = vld [vmem:[#allocation8 + $0x34c] ss:$28 sps:$4 sm:$0xff]   ;;  %v3845_v56 = vld [vmem:[#allocation8 + $0x354] ss:$28 sps:$4 sm:$0xff]  }
 0x256   :  { %2673 = vmatprep.subr.bf16.mxu0 %v3758_v43  ;;  %2755 = vmatprep.subr.bf16.mxu1 %v3761_v58  ;;  %v3843_v43 = vld [vmem:[#allocation8 + $0x350] ss:$28 sps:$4 sm:$0xff]   ;;  %v3848_v58 = vld [vmem:[#allocation8 + $0x384] ss:$28 sps:$4 sm:$0xff]  }
 0x259   :  { %2674 = vmatpush1.bf16.msra.mxu0 %v3756_v59  ;;  %2756 = vmatpush1.bf16.msra.mxu1 %v3759_v60  ;;  %v3851_v59 = vld [vmem:[#allocation8 + $0x38c] ss:$28 sps:$4 sm:$0xff]   ;;  %v4396_v60 = vld [vmem:[%s4480_s4] sm:$0xf] }
 0x25a   :  { %2675 = vmatprep.subr.bf16.mxu0 %v3764_v61  ;;  %2757 = vmatprep.subr.bf16.mxu1 %v3767_v62  ;;  %v397_v61 = vrot.slane %v4396_v60, %v4366_v22  ;;  %v401_v62 = vrot.slane %v4396_v60, %v4374_v24 }
 0x25d   :  { %2676 = vmatpush1.bf16.msra.mxu0 %v3762_v63  ;;  %2758 = vmatpush1.bf16.msra.mxu1 %v3765_v0  ;;  %v409_v63 = vrot.slane %v4396_v60, %v4381_v32 }
 0x25e   :  { %2677 = vmatprep.subr.bf16.mxu0 %v3770_v1  ;;  %2759 = vmatprep.subr.bf16.mxu1 %v3773_v2 }
 0x261   :  { %2678 = vmatpush1.bf16.msra.mxu0 %v3768_v3  ;;  %2760 = vmatpush1.bf16.msra.mxu1 %v3771_v4 }
 0x262   :  { %2679 = vmatprep.subr.bf16.mxu0 %v3776_v5  ;;  %2761 = vmatprep.subr.bf16.mxu1 %v3779_v6 }
 0x265   :  { %2680 = vmatpush1.bf16.msra.mxu0 %v3774_v7  ;;  %2762 = vmatpush1.bf16.msra.mxu1 %v3777_v8 }
 0x266   :  { %2681 = vmatprep.subr.bf16.mxu0 %v3782_v9  ;;  %2763 = vmatprep.subr.bf16.mxu1 %v3785_v10 }
 0x269   :  { %2682 = vmatpush1.bf16.msra.mxu0 %v3780_v11  ;;  %2764 = vmatpush1.bf16.msra.mxu1 %v3783_v12 }
 0x26a   :  { %2683 = vmatprep.subr.bf16.mxu0 %v3788_v13  ;;  %2765 = vmatprep.subr.bf16.mxu1 %v3791_v14 }
 0x26d   :  { %2684 = vmatpush1.bf16.msra.mxu0 %v3786_v15  ;;  %2766 = vmatpush1.bf16.msra.mxu1 %v3789_v16  ;;  %v3846_v15 = vld [vmem:[#allocation8 + $0x380] ss:$28 sps:$4 sm:$0xff]   ;;  %v3849_v16 = vld [vmem:[#allocation8 + $0x388] ss:$28 sps:$4 sm:$0xff]  }
 0x26e   :  { %2685 = vmatprep.subr.bf16.mxu0 %v3794_v17  ;;  %2767 = vmatprep.subr.bf16.mxu1 %v3797_v18  ;;  %v3854_v18 = vld [vmem:[#allocation8 + $0x3bc] ss:$28 sps:$4 sm:$0xff]  }
 0x271   :  { %2686 = vmatpush1.bf16.msra.mxu0 %v3792_v19  ;;  %2768 = vmatpush1.bf16.msra.mxu1 %v3795_v20  ;;  %v3857_v19 = vld [vmem:[#allocation8 + $0x3c4] ss:$28 sps:$4 sm:$0xff]  }
 0x272   :  { %2687 = vmatprep.subr.bf16.mxu0 %v3800_v25  ;;  %2769 = vmatprep.subr.bf16.mxu1 %v3803_v26  ;;  %v3852_v25 = vld [vmem:[#allocation8 + $0x3b8] ss:$28 sps:$4 sm:$0xff]   ;;  %v3855_v26 = vld [vmem:[#allocation8 + $0x3c0] ss:$28 sps:$4 sm:$0xff]  }
 0x275   :  { %2688 = vmatpush1.bf16.msra.mxu0 %v3798_v27  ;;  %2770 = vmatpush1.bf16.msra.mxu1 %v3801_v28  ;;  %v3860_v27 = vld [vmem:[#allocation8 + $0x3f4] ss:$28 sps:$4 sm:$0xff]   ;;  %v3863_v28 = vld [vmem:[#allocation8 + $0x3fc] ss:$28 sps:$4 sm:$0xff]  }
 0x276   :  { %2689 = vmatprep.subr.bf16.mxu0 %v3806_v29  ;;  %2771 = vmatprep.subr.bf16.mxu1 %v3809_v30  ;;  %v3858_v29 = vld [vmem:[#allocation8 + $0x3f0] ss:$28 sps:$4 sm:$0xff]   ;;  %v3861_v30 = vld [vmem:[#allocation8 + $0x3f8] ss:$28 sps:$4 sm:$0xff]  }
 0x279   :  { %2690 = vmatpush1.bf16.msra.mxu0 %v3804_v31  ;;  %2772 = vmatpush1.bf16.msra.mxu1 %v3807_v33  ;;  %v3866_v31 = vld [vmem:[#allocation8 + $0x42c] ss:$28 sps:$4 sm:$0xff]   ;;  %v3869_v33 = vld [vmem:[#allocation8 + $0x434] ss:$28 sps:$4 sm:$0xff]  }
 0x27a   :  { %2691 = vmatprep.subr.bf16.mxu0 %v3812_v34  ;;  %2773 = vmatprep.subr.bf16.mxu1 %v3815_v35  ;;  %v3864_v34 = vld [vmem:[#allocation8 + $0x428] ss:$28 sps:$4 sm:$0xff]   ;;  %v3867_v35 = vld [vmem:[#allocation8 + $0x430] ss:$28 sps:$4 sm:$0xff]  }
 0x27d   :  { %2692 = vmatpush1.bf16.msra.mxu0 %v3810_v36  ;;  %2774 = vmatpush1.bf16.msra.mxu1 %v3813_v38  ;;  %v3872_v36 = vld [vmem:[#allocation8 + $0x464] ss:$28 sps:$4 sm:$0xff]   ;;  %v3875_v38 = vld [vmem:[#allocation8 + $0x46c] ss:$28 sps:$4 sm:$0xff]  }
 0x27e   :  { %2693 = vmatprep.subr.bf16.mxu0 %v3818_v39  ;;  %2775 = vmatprep.subr.bf16.mxu1 %v3821_v40  ;;  %v3870_v39 = vld [vmem:[#allocation8 + $0x460] ss:$28 sps:$4 sm:$0xff]   ;;  %v3873_v40 = vld [vmem:[#allocation8 + $0x468] ss:$28 sps:$4 sm:$0xff]  }
 0x281   :  { %2694 = vmatpush1.bf16.msra.mxu0 %v3816_v41  ;;  %2776 = vmatpush1.bf16.msra.mxu1 %v3819_v42  ;;  %v3878_v41 = vld [vmem:[#allocation8 + $0x49c] ss:$28 sps:$4 sm:$0xff]   ;;  %v3881_v42 = vld [vmem:[#allocation8 + $0x4a4] ss:$28 sps:$4 sm:$0xff]  }
 0x282   :  { %2695 = vmatprep.subr.bf16.mxu0 %v3824_v44  ;;  %2777 = vmatprep.subr.bf16.mxu1 %v3827_v45  ;;  %v3876_v44 = vld [vmem:[#allocation8 + $0x498] ss:$28 sps:$4 sm:$0xff]   ;;  %v3879_v45 = vld [vmem:[#allocation8 + $0x4a0] ss:$28 sps:$4 sm:$0xff]  }
 0x285   :  { %2696 = vmatpush1.bf16.msra.mxu0 %v3822_v46  ;;  %2778 = vmatpush1.bf16.msra.mxu1 %v3825_v47  ;;  %v3884_v46 = vld [vmem:[#allocation8 + $0x4d4] ss:$28 sps:$4 sm:$0xff]   ;;  %v3887_v47 = vld [vmem:[#allocation8 + $0x4dc] ss:$28 sps:$4 sm:$0xff]  }
 0x286   :  { %2697 = vmatprep.subr.bf16.mxu0 %v3830_v48  ;;  %2779 = vmatprep.subr.bf16.mxu1 %v3833_v49  ;;  %v3882_v48 = vld [vmem:[#allocation8 + $0x4d0] ss:$28 sps:$4 sm:$0xff]   ;;  %v3885_v49 = vld [vmem:[#allocation8 + $0x4d8] ss:$28 sps:$4 sm:$0xff]  }
 0x289   :  { %2698 = vmatpush1.bf16.msra.mxu0 %v3828_v50  ;;  %2780 = vmatpush1.bf16.msra.mxu1 %v3831_v51  ;;  %v3890_v50 = vld [vmem:[#allocation8 + $0x50c] ss:$28 sps:$4 sm:$0xff]   ;;  %v3893_v51 = vld [vmem:[#allocation8 + $0x514] ss:$28 sps:$4 sm:$0xff]  }
 0x28a   :  { %2699 = vmatprep.subr.bf16.mxu0 %v3836_v52  ;;  %2781 = vmatprep.subr.bf16.mxu1 %v3839_v53  ;;  %v3888_v52 = vld [vmem:[#allocation8 + $0x508] ss:$28 sps:$4 sm:$0xff]   ;;  %v3891_v53 = vld [vmem:[#allocation8 + $0x510] ss:$28 sps:$4 sm:$0xff]  }
 0x28d   :  { %2700 = vmatpush1.bf16.msra.mxu0 %v3834_v23  ;;  %2782 = vmatpush1.bf16.msra.mxu1 %v3837_v54  ;;  %v3896_v23 = vld [vmem:[#allocation8 + $0x544] ss:$28 sps:$4 sm:$0xff]   ;;  %v3899_v54 = vld [vmem:[#allocation8 + $0x54c] ss:$28 sps:$4 sm:$0xff]  }
 0x28e   :  { %2701 = vmatprep.subr.bf16.mxu0 %v3842_v55  ;;  %2783 = vmatprep.subr.bf16.mxu1 %v3845_v56  ;;  %v3894_v55 = vld [vmem:[#allocation8 + $0x540] ss:$28 sps:$4 sm:$0xff]   ;;  %v3897_v56 = vld [vmem:[#allocation8 + $0x548] ss:$28 sps:$4 sm:$0xff]  }
 0x291   :  { %2702 = vmatpush1.bf16.msra.mxu0 %v3840_v57  ;;  %2784 = vmatpush1.bf16.msra.mxu1 %v3843_v43  ;;  %v3902_v57 = vld [vmem:[#allocation8 + $0x57c] ss:$28 sps:$4 sm:$0xff]   ;;  %v3905_v43 = vld [vmem:[#allocation8 + $0x584] ss:$28 sps:$4 sm:$0xff]  }
 0x292   :  { %2712 = vmatprep.subr.bf16.mxu0 %v3848_v58  ;;  %2794 = vmatprep.subr.bf16.mxu1 %v3851_v59  ;;  %v3900_v58 = vld [vmem:[#allocation8 + $0x578] ss:$28 sps:$4 sm:$0xff]   ;;  %v3903_v59 = vld [vmem:[#allocation8 + $0x580] ss:$28 sps:$4 sm:$0xff]  }
 0x327   :  { %v1129_v0 = vpop.f32.mrb[0].mxu0  ;;  %v4404_v1 = vpop.f32.mrb[8].mxu1 }
 0x328   :  { %v3504_v2 = vadd.f32 %v1129_v0, %v397_v61  ;;  %v1131_v3 = vpop.f32.mrb[1].mxu0  ;;  %v1213_v4 = vpop.f32.mrb[9].mxu1  ;;  %v3908_v61 = vld [vmem:[#allocation8 + $0x5b4] ss:$28 sps:$4 sm:$0xff]  }
 0x329   :  { %v3505_v5 = vadd.f32 %v1131_v3, %v401_v62  ;;  %v3507_v6 = vadd.f32 %v1213_v4, %v409_v63  ;;  %v1133_v7 = vpop.f32.mrb[2].mxu0  ;;  %v1215_v8 = vpop.f32.mrb[10].mxu1  ;;  %v3911_v62 = vld [vmem:[#allocation8 + $0x5bc] ss:$28 sps:$4 sm:$0xff]   ;;  %v3906_v63 = vld [vmem:[#allocation8 + $0x5b0] ss:$28 sps:$4 sm:$0xff]  }
 0x32a   :  { %v1218_v9 = vmax.f32 %v3504_v2, 0.0  ;;  %v1134_v10 = vpop.f32.mrb[3].mxu0  ;;  %v1216_v11 = vpop.f32.mrb[11].mxu1  ;;  %v3909_v0 = vld [vmem:[#allocation8 + $0x5b8] ss:$28 sps:$4 sm:$0xff]  }
 0x32b   :  { %v1219_v12 = vmax.f32 %v3505_v5, 0.0  ;;  %v1221_v13 = vmax.f32 %v3507_v6, 0.0  ;;  %v3914_v2 = vld [vmem:[#allocation8 + $0x5ec] ss:$28 sps:$4 sm:$0xff]   ;;  %v3917_v3 = vld [vmem:[#allocation8 + $0x5f4] ss:$28 sps:$4 sm:$0xff]  }
 0x32c   :  { %v4408_v17 = vpack.c.bf16 %v1218_v9, %v1218_v9  ;;  %v3912_v4 = vld [vmem:[#allocation8 + $0x5e8] ss:$28 sps:$4 sm:$0xff]   ;;  %v3915_v5 = vld [vmem:[#allocation8 + $0x5f0] ss:$28 sps:$4 sm:$0xff]   ;;  %v3918_v8 = vld [vmem:[#allocation8 + $0x620] ss:$28 sps:$4 sm:$0xff]  }
 0x32d   :  { %v4406_v14 = vpack.c.bf16 %v1219_v12, %v1219_v12  ;;  %v4412_v20 = vpack.c.bf16 %v1221_v13, %v1221_v13  ;;  %v3920_v6 = vld [vmem:[#allocation8 + $0x624] ss:$28 sps:$4 sm:$0xff]   ;;  %v3923_v7 = vld [vmem:[#allocation8 + $0x62c] ss:$28 sps:$4 sm:$0xff]   ;;  %v3926_v10 = vld [vmem:[#allocation8 + $0x65c] ss:$28 sps:$4 sm:$0xff]  }
 0x32e   :  { %v3921_v9 = vld [vmem:[#allocation8 + $0x628] ss:$28 sps:$4 sm:$0xff]   ;;  %v3924_v12 = vld [vmem:[#allocation8 + $0x658] ss:$28 sps:$4 sm:$0xff]   ;;  %v3927_v13 = vld [vmem:[#allocation8 + $0x660] ss:$28 sps:$4 sm:$0xff]  }
 0x32f   :  { %2703 = vmatprep.mubr.bf16.mxu0 %v4406_v14  ;;  %2785 = vmatprep.mubr.bf16.mxu1 %v4406_v14  ;;  %v3929_v11 = vld [vmem:[#allocation8 + $0x664] ss:$28 sps:$4 sm:$0xff]  }
 0x330   :  { %2704 = vmatmul.mubr.bf16.vlgmr.msra.gmra.mrb[4].mxu0 %v4408_v17  ;;  %2786 = vmatmul.mubr.bf16.vlgmr.msra.gmra.mrb[12].mxu1 %v4408_v17 }
 0x331   :  { %2713 = vmatpush1.bf16.msra.mxu0 %v3846_v15  ;;  %2795 = vmatpush1.bf16.msra.mxu1 %v3849_v16  ;;  %v405_v15 = vrot.slane %v4396_v60, %v4388_v37  ;;  %v3932_v16 = vld [vmem:[#allocation8 + $0x694] ss:$28 sps:$4 sm:$0xff]  }
 0x332   :  { %2744 = vmatprep.mubr.bf16.mxu0 %v4412_v20  ;;  %2826 = vmatprep.mubr.bf16.mxu1 %v4412_v20  ;;  %v3944_v60 = vld [vmem:[#allocation8 + $0x14] ss:$28 sps:$4 sm:$0xff]  }
 0x333   :  { %2714 = vmatprep.subr.bf16.mxu0 %v3854_v18  ;;  %2796 = vmatprep.subr.bf16.mxu1 %v3857_v19  ;;  %v3935_v18 = vld [vmem:[#allocation8 + $0x69c] ss:$28 sps:$4 sm:$0xff]   ;;  %v3930_v19 = vld [vmem:[#allocation8 + $0x690] ss:$28 sps:$4 sm:$0xff]  }
 0x335   :  { %2715 = vmatpush1.bf16.msra.mxu0 %v3852_v25  ;;  %2797 = vmatpush1.bf16.msra.mxu1 %v3855_v26  ;;  %v3933_v25 = vld [vmem:[#allocation8 + $0x698] ss:$28 sps:$4 sm:$0xff]   ;;  %v3506_v26 = vadd.f32 %v4404_v1, %v405_v15  ;;  %v4000_v15 = vld [vmem:[#allocation8 + $0x600] ss:$28 sps:$4 sm:$0xff]  }
 0x336   :  { %2716 = vmatprep.subr.bf16.mxu0 %v3860_v27  ;;  %2798 = vmatprep.subr.bf16.mxu1 %v3863_v28  ;;  %v3938_v27 = vld [vmem:[#allocation8 + $0x6cc] ss:$28 sps:$4 sm:$0xff]   ;;  %v3941_v28 = vld [vmem:[#allocation8 + $0x6d4] ss:$28 sps:$4 sm:$0xff]  }
 0x337   :  { %v3946_v1 = vld [vmem:[#allocation8 + $0x18] ss:$28 sps:$4 sm:$0xff]  }
 0x339   :  { %2717 = vmatpush1.bf16.msra.mxu0 %v3858_v29  ;;  %2799 = vmatpush1.bf16.msra.mxu1 %v3861_v30  ;;  %v3936_v29 = vld [vmem:[#allocation8 + $0x6c8] ss:$28 sps:$4 sm:$0xff]   ;;  %v3939_v30 = vld [vmem:[#allocation8 + $0x6d0] ss:$28 sps:$4 sm:$0xff]  }
 0x33a   :  { %2718 = vmatprep.subr.bf16.mxu0 %v3866_v31  ;;  %2800 = vmatprep.subr.bf16.mxu1 %v3869_v33  ;;  %v1220_v31 = vmax.f32 %v3506_v26, 0.0  ;;  %v3945_v33 = vld [vmem:[#allocation8 + $0x1d8] ss:$28 sps:$4 sm:$0xff]   ;;  %v4002_v26 = vld [vmem:[#allocation8 + $0x2b0] ss:$28 sps:$4 sm:$0xff]  }
 0x33d   :  { %2719 = vmatpush1.bf16.msra.mxu0 %v3864_v34  ;;  %2801 = vmatpush1.bf16.msra.mxu1 %v3867_v35  ;;  %v3942_v34 = vld [vmem:[#allocation8 + $0x10] ss:$28 sps:$4 sm:$0xff]   ;;  %v4421_v35 = vpack.c.bf16 %v1220_v31, %v1220_v31 }
 0x33e   :  { %2720 = vmatprep.subr.bf16.mxu0 %v3872_v36  ;;  %2802 = vmatprep.subr.bf16.mxu1 %v3875_v38  ;;  %v3949_v36 = vld [vmem:[#allocation8 + $0x4c] ss:$28 sps:$4 sm:$0xff]  }
 0x33f   :  { %v3950_v38 = vld [vmem:[#allocation8 + $0x210] ss:$28 sps:$4 sm:$0xff]  }
 0x340   :  { %v4011_v31 = vld [vmem:[#allocation8 + $0x4b0] ss:$28 sps:$4 sm:$0xff]  }
 0x341   :  { %2721 = vmatpush1.bf16.msra.mxu0 %v3870_v39  ;;  %2803 = vmatpush1.bf16.msra.mxu1 %v3873_v40  ;;  %v3947_v39 = vld [vmem:[#allocation8 + $0x48] ss:$28 sps:$4 sm:$0xff]   ;;  %v3951_v40 = vld [vmem:[#allocation8 + $0x50] ss:$28 sps:$4 sm:$0xff]  }
 0x342   :  { %2722 = vmatprep.subr.bf16.mxu0 %v3878_v41  ;;  %2804 = vmatprep.subr.bf16.mxu1 %v3881_v42  ;;  %v3954_v41 = vld [vmem:[#allocation8 + $0x84] ss:$28 sps:$4 sm:$0xff]  }
 0x343   :  { %v3955_v42 = vld [vmem:[#allocation8 + $0x248] ss:$28 sps:$4 sm:$0xff]  }
 0x345   :  { %2723 = vmatpush1.bf16.msra.mxu0 %v3876_v44  ;;  %2805 = vmatpush1.bf16.msra.mxu1 %v3879_v45  ;;  %v3952_v44 = vld [vmem:[#allocation8 + $0x80] ss:$28 sps:$4 sm:$0xff]   ;;  %v3956_v45 = vld [vmem:[#allocation8 + $0x88] ss:$28 sps:$4 sm:$0xff]  }
 0x346   :  { %2724 = vmatprep.subr.bf16.mxu0 %v3884_v46  ;;  %2806 = vmatprep.subr.bf16.mxu1 %v3887_v47  ;;  %v3959_v46 = vld [vmem:[#allocation8 + $0xbc] ss:$28 sps:$4 sm:$0xff]  }
 0x347   :  { %v3960_v47 = vld [vmem:[#allocation8 + $0x280] ss:$28 sps:$4 sm:$0xff]  }
 0x349   :  { %2725 = vmatpush1.bf16.msra.mxu0 %v3882_v48  ;;  %2807 = vmatpush1.bf16.msra.mxu1 %v3885_v49  ;;  %v3957_v48 = vld [vmem:[#allocation8 + $0xb8] ss:$28 sps:$4 sm:$0xff]   ;;  %v3961_v49 = vld [vmem:[#allocation8 + $0xc0] ss:$28 sps:$4 sm:$0xff]  }
 0x34a   :  { %2726 = vmatprep.subr.bf16.mxu0 %v3890_v50  ;;  %2808 = vmatprep.subr.bf16.mxu1 %v3893_v51  ;;  %v3964_v50 = vld [vmem:[#allocation8 + $0xf4] ss:$28 sps:$4 sm:$0xff]  }
 0x34b   :  { %v3962_v51 = vld [vmem:[#allocation8 + $0xf0] ss:$28 sps:$4 sm:$0xff]  }
 0x34d   :  { %2727 = vmatpush1.bf16.msra.mxu0 %v3888_v52  ;;  %2809 = vmatpush1.bf16.msra.mxu1 %v3891_v53  ;;  %v3966_v52 = vld [vmem:[#allocation8 + $0xf8] ss:$28 sps:$4 sm:$0xff]   ;;  %v3969_v53 = vld [vmem:[#allocation8 + $0x12c] ss:$28 sps:$4 sm:$0xff]  }
 0x34e   :  { %2728 = vmatprep.subr.bf16.mxu0 %v3896_v23  ;;  %2810 = vmatprep.subr.bf16.mxu1 %v3899_v54  ;;  %v3970_v23 = vld [vmem:[#allocation8 + $0x2f0] ss:$28 sps:$4 sm:$0xff]   ;;  %v3967_v54 = vld [vmem:[#allocation8 + $0x128] ss:$28 sps:$4 sm:$0xff]  }
 0x351   :  { %2729 = vmatpush1.bf16.msra.mxu0 %v3894_v55  ;;  %2811 = vmatpush1.bf16.msra.mxu1 %v3897_v56  ;;  %v3971_v55 = vld [vmem:[#allocation8 + $0x130] ss:$28 sps:$4 sm:$0xff]   ;;  %v3974_v56 = vld [vmem:[#allocation8 + $0x164] ss:$28 sps:$4 sm:$0xff]  }
 0x352   :  { %2730 = vmatprep.subr.bf16.mxu0 %v3902_v57  ;;  %2812 = vmatprep.subr.bf16.mxu1 %v3905_v43  ;;  %v3975_v57 = vld [vmem:[#allocation8 + $0x328] ss:$28 sps:$4 sm:$0xff]   ;;  %v3972_v43 = vld [vmem:[#allocation8 + $0x160] ss:$28 sps:$4 sm:$0xff]  }
 0x355   :  { %2731 = vmatpush1.bf16.msra.mxu0 %v3900_v58  ;;  %2813 = vmatpush1.bf16.msra.mxu1 %v3903_v59  ;;  %v3976_v58 = vld [vmem:[#allocation8 + $0x168] ss:$28 sps:$4 sm:$0xff]   ;;  %v3979_v59 = vld [vmem:[#allocation8 + $0x19c] ss:$28 sps:$4 sm:$0xff]  }
 0x356   :  { %2732 = vmatprep.subr.bf16.mxu0 %v3908_v61  ;;  %2814 = vmatprep.subr.bf16.mxu1 %v3911_v62  ;;  %v3980_v61 = vld [vmem:[#allocation8 + $0x360] ss:$28 sps:$4 sm:$0xff]   ;;  %v3977_v62 = vld [vmem:[#allocation8 + $0x198] ss:$28 sps:$4 sm:$0xff]  }
 0x359   :  { %2733 = vmatpush1.bf16.msra.mxu0 %v3906_v63  ;;  %2815 = vmatpush1.bf16.msra.mxu1 %v3909_v0  ;;  %v3981_v63 = vld [vmem:[#allocation8 + $0x1a0] ss:$28 sps:$4 sm:$0xff]   ;;  %v3984_v0 = vld [vmem:[#allocation8 + $0x1d4] ss:$28 sps:$4 sm:$0xff]  }
 0x35a   :  { %2734 = vmatprep.subr.bf16.mxu0 %v3914_v2  ;;  %2816 = vmatprep.subr.bf16.mxu1 %v3917_v3  ;;  %v3985_v2 = vld [vmem:[#allocation8 + $0x558] ss:$28 sps:$4 sm:$0xff]   ;;  %v3982_v3 = vld [vmem:[#allocation8 + $0x1d0] ss:$28 sps:$4 sm:$0xff]  }
 0x35d   :  { %2735 = vmatpush1.bf16.msra.mxu0 %v3912_v4  ;;  %2817 = vmatpush1.bf16.msra.mxu1 %v3915_v5  ;;  %v3986_v4 = vld [vmem:[#allocation8 + $0x398] ss:$28 sps:$4 sm:$0xff]   ;;  %v3989_v5 = vld [vmem:[#allocation8 + $0x20c] ss:$28 sps:$4 sm:$0xff]  }
 0x35e   :  { %2736 = vmatprep.subr.bf16.mxu0 %v3920_v6  ;;  %2818 = vmatprep.subr.bf16.mxu1 %v3923_v7  ;;  %v3990_v6 = vld [vmem:[#allocation8 + $0x590] ss:$28 sps:$4 sm:$0xff]   ;;  %v3987_v7 = vld [vmem:[#allocation8 + $0x208] ss:$28 sps:$4 sm:$0xff]  }
 0x361   :  { %2737 = vmatpush1.bf16.msra.mxu0 %v3918_v8  ;;  %2819 = vmatpush1.bf16.msra.mxu1 %v3921_v9  ;;  %v3991_v8 = vld [vmem:[#allocation8 + $0x3d0] ss:$28 sps:$4 sm:$0xff]   ;;  %v3994_v9 = vld [vmem:[#allocation8 + $0x244] ss:$28 sps:$4 sm:$0xff]  }
 0x362   :  { %2738 = vmatprep.subr.bf16.mxu0 %v3926_v10  ;;  %2820 = vmatprep.subr.bf16.mxu1 %v3929_v11  ;;  %v3995_v10 = vld [vmem:[#allocation8 + $0x5c8] ss:$28 sps:$4 sm:$0xff]   ;;  %v3992_v11 = vld [vmem:[#allocation8 + $0x240] ss:$28 sps:$4 sm:$0xff]  }
 0x365   :  { %2739 = vmatpush1.bf16.msra.mxu0 %v3924_v12  ;;  %2821 = vmatpush1.bf16.msra.mxu1 %v3927_v13  ;;  %v3996_v12 = vld [vmem:[#allocation8 + $0x408] ss:$28 sps:$4 sm:$0xff]   ;;  %v3999_v13 = vld [vmem:[#allocation8 + $0x27c] ss:$28 sps:$4 sm:$0xff]  }
 0x366   :  { %2740 = vmatprep.subr.bf16.mxu0 %v3932_v16  ;;  %2822 = vmatprep.subr.bf16.mxu1 %v3935_v18  ;;  %v3997_v16 = vld [vmem:[#allocation8 + $0x278] ss:$28 sps:$4 sm:$0xff]   ;;  %v4001_v18 = vld [vmem:[#allocation8 + $0x440] ss:$28 sps:$4 sm:$0xff]  }
 0x369   :  { %2741 = vmatpush1.bf16.msra.mxu0 %v3930_v19  ;;  %2823 = vmatpush1.bf16.msra.mxu1 %v3933_v25  ;;  %v4004_v19 = vld [vmem:[#allocation8 + $0x2b4] ss:$28 sps:$4 sm:$0xff]  }
 0x36a   :  { %2742 = vmatprep.subr.bf16.mxu0 %v3938_v27  ;;  %2824 = vmatprep.subr.bf16.mxu1 %v3941_v28  ;;  %v4005_v25 = vld [vmem:[#allocation8 + $0x638] ss:$28 sps:$4 sm:$0xff]   ;;  %v4009_v28 = vld [vmem:[#allocation8 + $0x2ec] ss:$28 sps:$4 sm:$0xff]  }
 0x36b   :  { %v4006_v27 = vld [vmem:[#allocation8 + $0x478] ss:$28 sps:$4 sm:$0xff]  }
 0x36d   :  { %2743 = vmatpush1.bf16.msra.mxu0 %v3936_v29  ;;  %2825 = vmatpush1.bf16.msra.mxu1 %v3939_v30  ;;  %v4010_v29 = vld [vmem:[#allocation8 + $0x670] ss:$28 sps:$4 sm:$0xff]   ;;  %v4007_v30 = vld [vmem:[#allocation8 + $0x2e8] ss:$28 sps:$4 sm:$0xff]  }
 0x36e   :  { %2835 = vmatprep.subr.bf16.mxu0 %v3944_v60  ;;  %3460 = vmatprep.subr.bf16.mxu1 %v3945_v33  ;;  %v4014_v60 = vld [vmem:[#allocation8 + $0x324] ss:$28 sps:$4 sm:$0xff]  }
 0x36f   :  { %v4015_v33 = vld [vmem:[#allocation8 + $0x6a8] ss:$28 sps:$4 sm:$0xff]  }
 0x370   :  { %2745 = vmatmul.mubr.bf16.vlgmr.msra.gmra.mrb[4].mxu0 %v4421_v35  ;;  %2827 = vmatmul.mubr.bf16.vlgmr.msra.gmra.mrb[12].mxu1 %v4421_v35 }
 0x371   :  { %2836 = vmatpush1.bf16.msra.mxu0 %v3942_v34  ;;  %2867 = vmatprep.mubr.bf16.mxu0 %v4406_v14  ;;  %v4012_v34 = vld [vmem:[#allocation8 + $0x320] ss:$28 sps:$4 sm:$0xff]  }
 0x372   :  { %3461 = vmatpush3.bf16.msra.mxu1 %v3946_v1  ;;  %2949 = vmatprep.mubr.bf16.mxu1 %v4406_v14  ;;  %v3965_v14 = vld [vmem:[#allocation8 + $0x2b8] ss:$28 sps:$4 sm:$0xff]   ;;  %v4016_v1 = vld [vmem:[#allocation8 + $0x4e8] ss:$28 sps:$4 sm:$0xff]  }
 0x373   :  { %2837 = vmatprep.subr.bf16.mxu0 %v3949_v36  ;;  %3462 = vmatprep.subr.bf16.mxu1 %v3950_v38  ;;  %v4019_v36 = vld [vmem:[#allocation8 + $0x35c] ss:$28 sps:$4 sm:$0xff]  }
 0x374   :  { %v4020_v38 = vld [vmem:[#allocation8 + $0x6e0] ss:$28 sps:$4 sm:$0xff]  }
 0x375   :  { %2838 = vmatpush1.bf16.msra.mxu0 %v3947_v39  ;;  %v4017_v39 = vld [vmem:[#allocation8 + $0x358] ss:$28 sps:$4 sm:$0xff]  }
 0x376   :  { %3463 = vmatpush3.bf16.msra.mxu1 %v3951_v40  ;;  %2839 = vmatprep.subr.bf16.mxu0 %v3954_v41  ;;  %v4021_v40 = vld [vmem:[#allocation8 + $0x520] ss:$28 sps:$4 sm:$0xff]   ;;  %v4024_v41 = vld [vmem:[#allocation8 + $0x394] ss:$28 sps:$4 sm:$0xff]  }
 0x377   :  { %3464 = vmatprep.subr.bf16.mxu1 %v3955_v42  ;;  %v4022_v42 = vld [vmem:[#allocation8 + $0x390] ss:$28 sps:$4 sm:$0xff]  }
 0x379   :  { %2840 = vmatpush1.bf16.msra.mxu0 %v3952_v44  ;;  %v4027_v44 = vld [vmem:[#allocation8 + $0x3cc] ss:$28 sps:$4 sm:$0xff]  }
 0x37a   :  { %3465 = vmatpush3.bf16.msra.mxu1 %v3956_v45  ;;  %2841 = vmatprep.subr.bf16.mxu0 %v3959_v46  ;;  %v4025_v45 = vld [vmem:[#allocation8 + $0x3c8] ss:$28 sps:$4 sm:$0xff]  }
 0x37b   :  { %3466 = vmatprep.subr.bf16.mxu1 %v3960_v47  ;;  %v4030_v46 = vld [vmem:[#allocation8 + $0x404] ss:$28 sps:$4 sm:$0xff]  }
 0x37c   :  { %v4028_v47 = vld [vmem:[#allocation8 + $0x400] ss:$28 sps:$4 sm:$0xff]  }
 0x37d   :  { %2842 = vmatpush1.bf16.msra.mxu0 %v3957_v48  ;;  %v4033_v48 = vld [vmem:[#allocation8 + $0x43c] ss:$28 sps:$4 sm:$0xff]  }
 0x37e   :  { %3467 = vmatpush3.bf16.msra.mxu1 %v3961_v49  ;;  %2843 = vmatprep.subr.bf16.mxu0 %v3964_v50  ;;  %v4031_v49 = vld [vmem:[#allocation8 + $0x438] ss:$28 sps:$4 sm:$0xff]  }
 0x37f   :  { %3468 = vmatprep.subr.bf16.mxu1 %v3965_v14  ;;  %v4036_v50 = vld [vmem:[#allocation8 + $0x474] ss:$28 sps:$4 sm:$0xff]  }
 0x380   :  { %v4034_v14 = vld [vmem:[#allocation8 + $0x470] ss:$28 sps:$4 sm:$0xff]  }
 0x381   :  { %2844 = vmatpush1.bf16.msra.mxu0 %v3962_v51  ;;  %v4037_v51 = vld [vmem:[#allocation8 + $0x4a8] ss:$28 sps:$4 sm:$0xff]  }
 0x382   :  { %3469 = vmatpush3.bf16.msra.mxu1 %v3966_v52  ;;  %2845 = vmatprep.subr.bf16.mxu0 %v3969_v53  ;;  %v4042_v52 = vld [vmem:[#allocation8 + $0x4e4] ss:$28 sps:$4 sm:$0xff]   ;;  %v4045_v53 = vld [vmem:[#allocation8 + $0x51c] ss:$28 sps:$4 sm:$0xff]  }
 0x383   :  { %3470 = vmatprep.subr.bf16.mxu1 %v3970_v23  ;;  %v4043_v23 = vld [vmem:[#allocation8 + $0x518] ss:$28 sps:$4 sm:$0xff]  }
 0x385   :  { %2846 = vmatpush1.bf16.msra.mxu0 %v3967_v54  ;;  %v4048_v54 = vld [vmem:[#allocation8 + $0x554] ss:$28 sps:$4 sm:$0xff]  }
 0x386   :  { %3471 = vmatpush3.bf16.msra.mxu1 %v3971_v55  ;;  %2847 = vmatprep.subr.bf16.mxu0 %v3974_v56  ;;  %v4046_v55 = vld [vmem:[#allocation8 + $0x550] ss:$28 sps:$4 sm:$0xff]  }
 0x387   :  { %3472 = vmatprep.subr.bf16.mxu1 %v3975_v57  ;;  %v4051_v56 = vld [vmem:[#allocation8 + $0x58c] ss:$28 sps:$4 sm:$0xff]  }
 0x388   :  { %v4049_v57 = vld [vmem:[#allocation8 + $0x588] ss:$28 sps:$4 sm:$0xff]  }
 0x389   :  { %2848 = vmatpush1.bf16.msra.mxu0 %v3972_v43  ;;  %v4054_v43 = vld [vmem:[#allocation8 + $0x5c4] ss:$28 sps:$4 sm:$0xff]  }
 0x38a   :  { %3473 = vmatpush3.bf16.msra.mxu1 %v3976_v58  ;;  %2849 = vmatprep.subr.bf16.mxu0 %v3979_v59  ;;  %v4052_v58 = vld [vmem:[#allocation8 + $0x5c0] ss:$28 sps:$4 sm:$0xff]  }
 0x38b   :  { %3474 = vmatprep.subr.bf16.mxu1 %v3980_v61  ;;  %v4057_v59 = vld [vmem:[#allocation8 + $0x5fc] ss:$28 sps:$4 sm:$0xff]  }
 0x38c   :  { %v4055_v61 = vld [vmem:[#allocation8 + $0x5f8] ss:$28 sps:$4 sm:$0xff]  }
 0x38d   :  { %2850 = vmatpush1.bf16.msra.mxu0 %v3977_v62  ;;  %v4060_v62 = vld [vmem:[#allocation8 + $0x634] ss:$28 sps:$4 sm:$0xff]  }
 0x38e   :  { %3475 = vmatpush3.bf16.msra.mxu1 %v3981_v63  ;;  %2851 = vmatprep.subr.bf16.mxu0 %v3984_v0  ;;  %v4058_v63 = vld [vmem:[#allocation8 + $0x630] ss:$28 sps:$4 sm:$0xff]  }
 0x38f   :  { %3482 = vmatprep.subr.bf16.mxu1 %v3985_v2  ;;  %v4063_v0 = vld [vmem:[#allocation8 + $0x66c] ss:$28 sps:$4 sm:$0xff]  }
 0x390   :  { %v4061_v2 = vld [vmem:[#allocation8 + $0x668] ss:$28 sps:$4 sm:$0xff]  }
 0x391   :  { %2950 = vmatmul.mubr.bf16.vlgmr.msra.gmra.mrb[16].mxu1 %v4408_v17  ;;  %2852 = vmatpush1.bf16.msra.mxu0 %v3982_v3  ;;  %v4066_v3 = vld [vmem:[#allocation8 + $0x6a4] ss:$28 sps:$4 sm:$0xff]  }
 0x392   :  { %3483 = vmatpush3.bf16.msra.mxu1 %v3986_v4  ;;  %2989 = vmatprep.mubr.bf16.mxu1 %v4412_v20  ;;  %v4064_v4 = vld [vmem:[#allocation8 + $0x6a0] ss:$28 sps:$4 sm:$0xff]  }
 0x393   :  { %2853 = vmatprep.subr.bf16.mxu0 %v3989_v5  ;;  %3484 = vmatprep.subr.bf16.mxu1 %v3990_v6  ;;  %v4069_v5 = vld [vmem:[#allocation8 + $0x6dc] ss:$28 sps:$4 sm:$0xff]  }
 0x394   :  { %v4067_v6 = vld [vmem:[#allocation8 + $0x6d8] ss:$28 sps:$4 sm:$0xff]  }
 0x395   :  { %2854 = vmatpush1.bf16.msra.mxu0 %v3987_v7  ;;  %v4436_v7 = vld [vmem:[%s4482_s6] sm:$0xff]  ;;  %s4252_s6 = smov [#allocation11]  }
 0x396   :  { %3485 = vmatpush3.bf16.msra.mxu1 %v3991_v8  ;;  %2855 = vmatprep.subr.bf16.mxu0 %v3994_v9  ;;  %v1487_v8 = vrot.slane %v4436_v7, %v4366_v22  ;;  %v1495_v9 = vrot.slane %v4436_v7, %v4388_v37  ;;  %s3076_s13 = sshll.u32 %s4252_s6, 4  ;;  %s3077_s13 = int_to_ptr.vmem [resolvable:$true] %s3076_s13 }
 0x397   :  { %3486 = vmatprep.subr.bf16.mxu1 %v3995_v10  ;;  %v1491_v10 = vrot.slane %v4436_v7, %v4374_v24  ;;  %s4188_s14 = scalar_lea.vmem %s3077_s13, 128  ;;  %p4193_p5 = scmp.lt.s32.totalorder %s3077_s13, %s3077_s13 }
 0x398   :  { %p4189_p4 = scmp.ne.s32.totalorder %s3077_s13, %s4188_s14  ;;  %p4194_p6 = scmp.lt.s32.totalorder %s4188_s14, %s4188_s14 }
 0x399   :  { %2856 = vmatpush1.bf16.msra.mxu0 %v3992_v11  ;;  %v1499_v11 = vrot.slane %v4436_v7, %v4381_v32 }
 0x39a   :  { %3487 = vmatpush3.bf16.msra.mxu1 %v3996_v12  ;;  %2857 = vmatprep.subr.bf16.mxu0 %v3999_v13  ;;  %p4195_p7 = por %p4194_p6, %p4193_p5 }
 0x39b   :  { %3488 = vmatprep.subr.bf16.mxu1 %v4000_v15 }
 0x39c   :  { %p4196_p8 = pnand %p4195_p7, %p4189_p4 }
 0x39d   :  { %2858 = vmatpush1.bf16.msra.mxu0 %v3997_v16 }
 0x39e   :  { %3489 = vmatpush3.bf16.msra.mxu1 %v4001_v18  ;;  %2859 = vmatprep.subr.bf16.mxu0 %v4004_v19 }
 0x39f   :  { %3490 = vmatprep.subr.bf16.mxu1 %v4005_v25 }
 0x3a1   :  { %2860 = vmatpush1.bf16.msra.mxu0 %v4002_v26 }
 0x3a2   :  { %3491 = vmatpush3.bf16.msra.mxu1 %v4006_v27  ;;  %2861 = vmatprep.subr.bf16.mxu0 %v4009_v28 }
 0x3a3   :  { %3492 = vmatprep.subr.bf16.mxu1 %v4010_v29 }
 0x3a5   :  { %2862 = vmatpush1.bf16.msra.mxu0 %v4007_v30 }
 0x3a6   :  { %3493 = vmatpush3.bf16.msra.mxu1 %v4011_v31  ;;  %2863 = vmatprep.subr.bf16.mxu0 %v4014_v60 }
 0x3a7   :  { %3494 = vmatprep.subr.bf16.mxu1 %v4015_v33 }
 0x3a9   :  { %2864 = vmatpush1.bf16.msra.mxu0 %v4012_v34 }
 0x3aa   :  { %3495 = vmatpush3.bf16.msra.mxu1 %v4016_v1  ;;  %2865 = vmatprep.subr.bf16.mxu0 %v4019_v36 }
 0x3ab   :  { %3496 = vmatprep.subr.bf16.mxu1 %v4020_v38 }
 0x3ad   :  { %2866 = vmatpush1.bf16.msra.mxu0 %v4017_v39 }
 0x3ae   :  { %3497 = vmatpush3.bf16.msra.mxu1 %v4021_v40  ;;  %2876 = vmatprep.subr.bf16.mxu0 %v4024_v41 }
 0x3b0   :  { %2868 = vmatmul.mubr.bf16.vlgmr.msra.gmra.mrb[8].mxu0 %v4408_v17  ;;  %v4039_v17 = vld [vmem:[#allocation8 + $0x4ac] ss:$28 sps:$4 sm:$0xff]  }
 0x3b1   :  { %2990 = vmatmul.mubr.bf16.vlgmr.msra.gmra.mrb[20].mxu1 %v4421_v35  ;;  %2877 = vmatpush1.bf16.msra.mxu0 %v4022_v42 }
 0x3b2   :  { %2908 = vmatprep.mubr.bf16.mxu0 %v4412_v20  ;;  %2878 = vmatprep.subr.bf16.mxu0 %v4027_v44  ;;  %v4040_v20 = vld [vmem:[#allocation8 + $0x4e0] ss:$28 sps:$4 sm:$0xff]  }
 0x3b5   :  { %2879 = vmatpush1.bf16.msra.mxu0 %v4025_v45 }
 0x3b6   :  { %2880 = vmatprep.subr.bf16.mxu0 %v4030_v46 }
 0x3b9   :  { %2881 = vmatpush1.bf16.msra.mxu0 %v4028_v47 }
 0x3ba   :  { %2882 = vmatprep.subr.bf16.mxu0 %v4033_v48 }
 0x3bd   :  { %2883 = vmatpush1.bf16.msra.mxu0 %v4031_v49 }
 0x3be   :  { %2884 = vmatprep.subr.bf16.mxu0 %v4036_v50 }
 0x3c1   :  { %2885 = vmatpush1.bf16.msra.mxu0 %v4034_v14 }
 0x3c2   :  { %2886 = vmatprep.subr.bf16.mxu0 %v4039_v17 }
 0x3c5   :  { %2887 = vmatpush1.bf16.msra.mxu0 %v4037_v51 }
 0x3c6   :  { %2888 = vmatprep.subr.bf16.mxu0 %v4042_v52 }
 0x3c9   :  { %2889 = vmatpush1.bf16.msra.mxu0 %v4040_v20 }
 0x3ca   :  { %2890 = vmatprep.subr.bf16.mxu0 %v4045_v53 }
 0x3cd   :  { %2891 = vmatpush1.bf16.msra.mxu0 %v4043_v23 }
 0x3ce   :  { %2892 = vmatprep.subr.bf16.mxu0 %v4048_v54 }
 0x3d1   :  { %2893 = vmatpush1.bf16.msra.mxu0 %v4046_v55 }
 0x3d2   :  { %2894 = vmatprep.subr.bf16.mxu0 %v4051_v56 }
 0x3d5   :  { %2895 = vmatpush1.bf16.msra.mxu0 %v4049_v57 }
 0x3d6   :  { %2896 = vmatprep.subr.bf16.mxu0 %v4054_v43 }
 0x3d9   :  { %2897 = vmatpush1.bf16.msra.mxu0 %v4052_v58 }
 0x3da   :  { %2898 = vmatprep.subr.bf16.mxu0 %v4057_v59 }
 0x3dd   :  { %2899 = vmatpush1.bf16.msra.mxu0 %v4055_v61 }
 0x3de   :  { %2900 = vmatprep.subr.bf16.mxu0 %v4060_v62 }
 0x3e1   :  { %2901 = vmatpush1.bf16.msra.mxu0 %v4058_v63 }
 0x3e2   :  { %2902 = vmatprep.subr.bf16.mxu0 %v4063_v0 }
 0x3e5   :  { %2903 = vmatpush1.bf16.msra.mxu0 %v4061_v2 }
 0x3e6   :  { %2904 = vmatprep.subr.bf16.mxu0 %v4066_v3 }
 0x3e9   :  { %2905 = vmatpush1.bf16.msra.mxu0 %v4064_v4 }
 0x3ea   :  { %2906 = vmatprep.subr.bf16.mxu0 %v4069_v5 }
 0x3ed   :  { %2907 = vmatpush1.bf16.msra.mxu0 %v4067_v6 }
 0x3f0   :  { %2909 = vmatmul.mubr.bf16.vlgmr.msra.gmra.mrb[8].mxu0 %v4421_v35 }
 0x443   :  { %v2746_v12 = vpop.f32.mrb[4].mxu0  ;;  %v2828_v13 = vpop.f32.mrb[12].mxu1 }
 0x444   :  { %v3508_v35 = vadd.f32 %v2746_v12, %v1487_v8  ;;  %v3510_v15 = vadd.f32 %v2828_v13, %v1495_v9  ;;  %v2748_v16 = vpop.f32.mrb[5].mxu0  ;;  %v2830_v18 = vpop.f32.mrb[13].mxu1 }
 0x445   :  { %v3509_v19 = vadd.f32 %v2748_v16, %v1491_v10  ;;  %v3511_v25 = vadd.f32 %v2830_v18, %v1499_v11  ;;  %v2750_v26 = vpop.f32.mrb[6].mxu0  ;;  %v2832_v27 = vpop.f32.mrb[14].mxu1 }
 0x446   :  { %v3453_v22 = vmul.f32 -1.442695, %v3508_v35  ;;  %v3455_v28 = vmul.f32 -1.442695, %v3510_v15  ;;  %v2751_v29 = vpop.f32.mrb[7].mxu0  ;;  %v2833_v37 = vpop.f32.mrb[15].mxu1 }
 0x447   :  { %v3454_v30 = vmul.f32 -1.442695, %v3509_v19  ;;  %v3456_v31 = vmul.f32 -1.442695, %v3511_v25 }
 0x448   :  { %4072 = vpow2.f32 %v3453_v22 }
 0x449   :  { %4074 = vpow2.f32 %v3455_v28 }
 0x44a   :  { %4076 = vpow2.f32 %v3454_v30 }
 0x44b   :  { %4078 = vpow2.f32 %v3456_v31 }
 0x452   :  { %v4073_v24 = vpop.eup %4072 }
 0x453   :  { %v4075_v32 = vpop.eup %4074  ;;  %v3018_v60 = vadd.f32 1.0, %v4073_v24 }
 0x454   :  { %v4077_v33 = vpop.eup %4076  ;;  %v3020_v34 = vadd.f32 1.0, %v4075_v32 }
 0x455   :  { %v4079_v1 = vpop.eup %4078  ;;  %4080 = vrcp.f32 %v3018_v60  ;;  %v3019_v36 = vadd.f32 1.0, %v4077_v33 }
 0x456   :  { %4082 = vrcp.f32 %v3020_v34  ;;  %v3021_v38 = vadd.f32 1.0, %v4079_v1 }
 0x457   :  { %4084 = vrcp.f32 %v3019_v36 }
 0x458   :  { %4086 = vrcp.f32 %v3021_v38 }
 0x45f   :  { %v4081_v39 = vpop.eup %4080 }
 0x460   :  { %v4083_v40 = vpop.eup %4082  ;;  %v3039_v41 = vmax.f32 %v4081_v39, 1e-06 }
 0x461   :  { %v4085_v42 = vpop.eup %4084  ;;  %v3041_v44 = vmax.f32 %v4083_v40, 1e-06 }
 0x462   :  { %v4087_v45 = vpop.eup %4086  ;;  %v3046_v46 = vmin.f32 %v3039_v41, 0.999999  ;;  %v3040_v47 = vmax.f32 %v4085_v42, 1e-06 }
 0x463   :  { %v3048_v48 = vmin.f32 %v3041_v44, 0.999999  ;;  %v3042_v49 = vmax.f32 %v4087_v45, 1e-06 }
 0x464   :  { %3053 = vst [vmem:[#allocation10] sm:$0xff] %v3046_v46  ;;  %v3047_v50 = vmin.f32 %v3040_v47, 0.999999  ;;  %v3476_v14 = vpop.f32.mrb[16].mxu1 }
 0x465   :  { %3055 = vst [vmem:[#allocation10 + $0x10] sm:$0xff] %v3048_v48  ;;  %v3049_v17 = vmin.f32 %v3042_v49, 0.999999  ;;  %v3477_v51 = vpop.f32.mrb[17].mxu1 }
 0x466   :  { %3054 = vst [vmem:[#allocation10 + $0x8] sm:$0xff] %v3047_v50  ;;  %v3478_v52 = vadd.f32 %v3477_v51, %v3476_v14  ;;  %v3479_v20 = vpop.f32.mrb[18].mxu1 }
 0x467   :  { %3056 = vst [vmem:[#allocation10 + $0x18] sm:$0xff] %v3049_v17  ;;  %v3480_v53 = vpop.f32.mrb[19].mxu1 }
 0x468   :  { %4199 = shalt.err (!%p4196_p8)
}
 0x469   :  { %s4200_s19 = scalar_lea.hbm %s4484_s8, 128 }
 0x46a   :  { %p4201_p9 = scmp.ne.s32.totalorder %s4484_s8, %s4200_s19  ;;  %p4204_p10 = scmp.lt.u32.totalorder %s4200_s19, %s4484_s8 }
 0x46c   :  { %p4206_p11 = pnand %p4204_p10, %p4201_p9 }
 0x46e   :  { %4209 = shalt.err (!%p4206_p11)
}
 0x46f   :  { %3079 = dma.vmem_to_hbm [thread:$0]  %s3077_s13, 128, %s4484_s8, [#allocation12]   ;;  %v1510_v23 = vsub.s32 6, %v4363_v21  ;;  %v1502_v5 = vsub.s32 4, %v4363_v21  ;;  %v1506_v6 = vsub.s32 5, %v4363_v21 }
 0x470   :  { %s4253_s8 = smov [#allocation10]  }
 0x471   :  { %v1511_v54 = vrot.slane %v4436_v7, %v1510_v23  ;;  %v1503_v8 = vrot.slane %v4436_v7, %v1502_v5  ;;  %v1507_v9 = vrot.slane %v4436_v7, %v1506_v6  ;;  %s3066_s26 = sshll.u32 %s4253_s8, 4  ;;  %s3067_s26 = int_to_ptr.vmem [resolvable:$true] %s3066_s26 }
 0x472   :  { %s4210_s27 = scalar_lea.vmem %s3067_s26, 896  ;;  %p4215_p13 = scmp.lt.s32.totalorder %s3067_s26, %s3067_s26 }
 0x473   :  { %v2952_v57 = vadd.f32 %v3478_v52, %v1511_v54  ;;  %p4211_p12 = scmp.ne.s32.totalorder %s3067_s26, %s4210_s27  ;;  %p4216_p0 = scmp.lt.s32.totalorder %s4210_s27, %s4210_s27 }
 0x475   :  { %p4217_p1 = por %p4216_p0, %p4215_p13 }
 0x477   :  { %p4218_p2 = pnand %p4217_p1, %p4211_p12 }
 0x484   :  { %v3498_v55 = vpop.f32.mrb[20].mxu1 }
 0x485   :  { %v3499_v56 = vpop.f32.mrb[21].mxu1 }
 0x486   :  { %v3500_v43 = vadd.f32 %v3499_v56, %v3498_v55  ;;  %v3501_v58 = vpop.f32.mrb[22].mxu1 }
 0x487   :  { %v3502_v59 = vpop.f32.mrb[23].mxu1 }
 0x488   :  { %v2992_v61 = vadd.f32 %v3500_v43, %v2952_v57 }
 0x48a   :  { %v3459_v62 = vmul.f32 -1.442695, %v2992_v61 }
 0x48c   :  { %4088 = vpow2.f32 %v3459_v62 }
 0x496   :  { %v4089_v63 = vpop.eup %4088 }
 0x497   :  { %v3024_v0 = vadd.f32 1.0, %v4089_v63 }
 0x499   :  { %4090 = vrcp.f32 %v3024_v0 }
 0x4a3   :  { %v4091_v2 = vpop.eup %4090 }
 0x4a4   :  { %v3045_v3 = vmax.f32 %v4091_v2, 1e-06 }
 0x4a6   :  { %v3052_v4 = vmin.f32 %v3045_v3, 0.999999 }
 0x4a8   :  { %3059 = vst [vmem:[#allocation10 + $0x30] sm:$0xff] %v3052_v4 }
 0x4c3   :  { %v2910_v10 = vpop.f32.mrb[8].mxu0 }
 0x4c4   :  { %v3512_v11 = vadd.f32 %v2910_v10, %v1503_v8  ;;  %v2912_v12 = vpop.f32.mrb[9].mxu0 }
 0x4c5   :  { %v3513_v13 = vadd.f32 %v2912_v12, %v1507_v9  ;;  %v2914_v35 = vpop.f32.mrb[10].mxu0 }
 0x4c6   :  { %v3457_v15 = vmul.f32 -1.442695, %v3512_v11  ;;  %v2915_v16 = vpop.f32.mrb[11].mxu0 }
 0x4c7   :  { %v3458_v18 = vmul.f32 -1.442695, %v3513_v13 }
 0x4c8   :  { %4092 = vpow2.f32 %v3457_v15 }
 0x4c9   :  { %4094 = vpow2.f32 %v3458_v18 }
 0x4d2   :  { %v4093_v19 = vpop.eup %4092 }
 0x4d3   :  { %v4095_v25 = vpop.eup %4094  ;;  %v3022_v26 = vadd.f32 1.0, %v4093_v19 }
 0x4d4   :  { %v3023_v27 = vadd.f32 1.0, %v4095_v25 }
 0x4d5   :  { %4096 = vrcp.f32 %v3022_v26 }
 0x4d6   :  { %4098 = vrcp.f32 %v3023_v27 }
 0x4df   :  { %v4097_v21 = vpop.eup %4096 }
 0x4e0   :  { %v4099_v22 = vpop.eup %4098  ;;  %v3043_v28 = vmax.f32 %v4097_v21, 1e-06 }
 0x4e1   :  { %v3044_v7 = vmax.f32 %v4099_v22, 1e-06 }
 0x4e2   :  { %v3050_v29 = vmin.f32 %v3043_v28, 0.999999 }
 0x4e3   :  { %v3051_v37 = vmin.f32 %v3044_v7, 0.999999 }
 0x4e4   :  { %3057 = vst [vmem:[#allocation10 + $0x20] sm:$0xff] %v3050_v29 }
 0x4e5   :  { %3058 = vst [vmem:[#allocation10 + $0x28] sm:$0xff] %v3051_v37 }
 0x4e6   :  { %4221 = shalt.err (!%p4218_p2)
}
 0x4e7   :  { %s4222_s1 = scalar_lea.hbm %s4483_s7, 896 }
 0x4e8   :  { %p4223_p3 = scmp.ne.s32.totalorder %s4483_s7, %s4222_s1  ;;  %p4226_p4 = scmp.lt.u32.totalorder %s4222_s1, %s4483_s7 }
 0x4ea   :  { %p4228_p5 = pnand %p4226_p4, %p4223_p3 }
 0x4ec   :  { %4231 = shalt.err (!%p4228_p5)
}
 0x4ed   :  { %3069 = dma.vmem_to_hbm [thread:$0]  %s3067_s26, 896, %s4483_s7, [#allocation4]  }
 0x4ee   :  { %4238 = dma.done.wait [#allocation4], 896  }
 0x4ef   :  { %4239 = vsyncadd [#allocation4], 4294966400 }
 0x4f0   :  { %4240 = dma.done.wait [#allocation12], 128  }
 0x4f1   :  { %4241 = vsyncadd [#allocation12], 4294967168 }
 0x4f2   :  { %3086 = vsyncpa [#allocation3], 1 }
 0x4f3   :  { %3087 = vsyncpa [#allocation6], 1 }
 0x4f4   :  { %3088 = vsyncpa [#allocation9], 1 }
 0x4f5   :  { %3089 = vsyncpa [#allocation4], 1 }
 0x4f6   :  { %3090 = vsyncpa [#allocation12], 1 }

</bundles_post_ra>
